<compile_context>
chip_gen: v5e
topology: v5e:2x2
jax: 0.10.0
libtpu: 0.0.40
codegen_flags: <defaults>
</compile_context>

<pallas_src>
import functools

import jax
import jax.numpy as jnp
from jax.experimental import pallas as pl
from jax.experimental.pallas import tpu as pltpu


def _round_up(x, m):
    return (x + m - 1) // m * m


def lstm_chunk_kernel(x_ref, w_emb_ref, b_emb_ref, w_ih_ref, w_hh_ref,
                      b_gate_ref, out_ref, pre_ref, h_ref, c_ref,
                      *, chunk, unroll):
    """One grid step = one chunk of `chunk` timesteps.

    x_ref      : (chunk*Bp, I)   time-major flattened input rows (row = t*Bp + b)
    w_emb_ref  : (I, E)          input_embedding weight^T
    b_emb_ref  : (1, E)
    w_ih_ref   : (E, 4*Hp)       LSTMCell weight_ih^T, gate order (i, f, o, g), H padded
    w_hh_ref   : (Hp, 4*Hp)      LSTMCell weight_hh^T, same order/padding
    b_gate_ref : (1, 4*Hp)       b_ih + b_hh (added exactly once, in phase 1)
    out_ref    : (chunk*Bp, Hp)  relu(h_t) outputs for this chunk
    pre_ref    : (chunk*Bp, 4*Hp) VMEM scratch: hoisted pre-gates
    h_ref/c_ref: (Bp, Hp)        VMEM scratch: recurrent state (persists across chunks)
    """
    Bp, Hp = h_ref.shape
    mxu = w_emb_ref.dtype

    # hidden_states / cell_states start at zero (as in the module __init__).
    @pl.when(pl.program_id(0) == 0)
    def _():
        h_ref[...] = jnp.zeros_like(h_ref)
        c_ref[...] = jnp.zeros_like(c_ref)

    # ---- Phase 1: non-recurrent path, hoisted off the serial critical path ----
    # One batched (chunk*Bp, E) matmul for the whole chunk.
    emb = jnp.dot(x_ref[...].astype(mxu), w_emb_ref[...],
                  preferred_element_type=jnp.float32)
    emb = jnp.maximum(emb + b_emb_ref[...], 0.0)
    # TODO(synk): nn.Dropout treated as eval-mode identity.
    pre = jnp.dot(emb.astype(mxu), w_ih_ref[...],
                  preferred_element_type=jnp.float32) + b_gate_ref[...]
    pre_ref[...] = pre.astype(pre_ref.dtype)

    w_hh = w_hh_ref[...]  # hoist the weight load out of the recurrence

    # ---- Phase 2: serial recurrence; only h @ w_hh + gate math per step ----
    def step(tt, carry):
        h = h_ref[...]
        c = c_ref[...]
        row = pl.multiple_of(tt * Bp, Bp)
        gates = (pre_ref[pl.ds(row, Bp), :].astype(jnp.float32)
                 + jnp.dot(h.astype(w_hh.dtype), w_hh,
                           preferred_element_type=jnp.float32))    # (Bp, 4Hp)

        # gate columns were permuted to (i, f, o, g): one fused sigmoid + one tanh.
        sig = jax.nn.sigmoid(gates[:, :3 * Hp])
        i_g = sig[:, 0 * Hp:1 * Hp]
        f_g = sig[:, 1 * Hp:2 * Hp]
        o_g = sig[:, 2 * Hp:3 * Hp]
        g_g = jnp.tanh(gates[:, 3 * Hp:])

        c_new = f_g * c + i_g * g_g
        h_new = o_g * jnp.tanh(c_new)

        h_ref[...] = h_new
        c_ref[...] = c_new
        out_ref[pl.ds(row, Bp), :] = h_new   # raw h; ReLU applied once per chunk
        return carry

    jax.lax.fori_loop(0, chunk, step, 0, unroll=unroll)

    # outputs.append(relu(h_t)) — done once per chunk at full vreg occupancy.
    out_ref[...] = jnp.maximum(out_ref[...], 0.0)


def _const_spec(shape):
    """BlockSpec for a grid-invariant operand (single-buffered if supported)."""
    index_map = lambda t: (0,) * len(shape)
    try:
        return pl.BlockSpec(shape, index_map, pipeline_mode=pl.Buffered(1))
    except TypeError:   # older jax without pipeline_mode kwarg
        return pl.BlockSpec(shape, index_map)


def lstm_forward(x, w_emb, b_emb, w_ih, b_ih, w_hh, b_hh, *,
                 mxu_dtype=jnp.float32,
                 vmem_budget_bytes=40 * 1024 * 1024,
                 chunk_timesteps=None):
    """Pallas implementation of LSTM.forward.

    x     : (B, S, I)
    w_emb : (E, I),  b_emb : (E,)      -- nn.Linear(input_size, embedding_size)
    w_ih  : (4H, E), b_ih  : (4H,)     -- nn.LSTMCell (PyTorch gate order i,f,g,o)
    w_hh  : (4H, H), b_hh  : (4H,)
    mxu_dtype: jnp.bfloat16 on v6e/v7x for faster MXU + smaller VMEM footprint
               (accumulation and gate math stay f32).
    returns (B, S, H) float32
    """
    B, S, I = x.shape
    E = w_emb.shape[0]
    H = w_hh.shape[1]

    Bp = _round_up(B, 8)       # sublane alignment for f32
    Hp = _round_up(H, 128)     # lane alignment -> aligned gate slices / stores
    G = 4 * Hp
    f32 = jnp.float32

    # ---- weight prep: gate reorder (i,f,g,o) -> (i,f,o,g) + pad H -> Hp ----
    def _reorder_pad(w, pad_cols):
        # w: (4H, K) rows ordered i,f,g,o -> rows ordered i,f,o,g, each gate padded to Hp.
        i_, f_, g_, o_ = jnp.split(w, 4, axis=0)
        pads = ((0, Hp - H), (0, pad_cols))
        return jnp.concatenate([jnp.pad(blk, pads) for blk in (i_, f_, o_, g_)], axis=0)

    w_emb_t = jnp.transpose(w_emb).astype(mxu_dtype)                   # (I, E)
    b_emb2 = b_emb.reshape(1, E).astype(f32)
    w_ih_t = jnp.transpose(_reorder_pad(w_ih, 0)).astype(mxu_dtype)    # (E, 4Hp)
    w_hh_t = jnp.transpose(_reorder_pad(w_hh, Hp - H)).astype(mxu_dtype)  # (Hp, 4Hp)

    bg = (b_ih + b_hh).reshape(4, H)
    bg = jnp.pad(bg[jnp.array([0, 1, 3, 2])], ((0, 0), (0, Hp - H)))
    b_gate2 = bg.reshape(1, G).astype(f32)

    # Time-major flatten (row = t*Bp + b) so the per-step pre-gate / out slabs are
    # contiguous, aligned (Bp, .) row groups.  Batch padded with zero rows.
    x_pad = jnp.pad(x.astype(f32), ((0, Bp - B), (0, 0), (0, 0)))
    x_flat = jnp.transpose(x_pad, (1, 0, 2)).reshape(S * Bp, I)

    # ---- chunk sizing (re-derived from a VMEM budget; 40 MiB is v7x-safe) ----
    isz = jnp.dtype(mxu_dtype).itemsize
    weight_bytes = (I * E + E * G + Hp * G) * isz + (E + G) * 4
    state_bytes = 2 * Bp * Hp * 4
    per_t_bytes = Bp * (2 * I * 4 + 2 * Hp * 4 + G * isz)   # x(2buf) + out(2buf) + pre
    if chunk_timesteps is not None:
        tc = max(1, min(S, int(chunk_timesteps)))
    else:
        avail = max(vmem_budget_bytes - 2 * weight_bytes - state_bytes, per_t_bytes)
        tc = int(max(1, min(S, avail // per_t_bytes)))
    while S % tc:
        tc -= 1
    num_chunks = S // tc
    unroll = tc if tc <= 16 else 8   # bounded unroll: LLO visibility without code blowup

    total_bytes = 2 * weight_bytes + state_bytes + tc * per_t_bytes
    vmem_limit = int(min(128 * 1024 * 1024,
                         max(32 * 1024 * 1024, 1.4 * total_bytes + (8 << 20))))

    kernel = functools.partial(lstm_chunk_kernel, chunk=tc, unroll=unroll)

    out_flat = pl.pallas_call(
        kernel,
        out_shape=jax.ShapeDtypeStruct((S * Bp, Hp), f32),
        grid_spec=pltpu.PrefetchScalarGridSpec(
            num_scalar_prefetch=0,
            grid=(num_chunks,),
            in_specs=[
                pl.BlockSpec((tc * Bp, I), lambda t: (t, 0)),   # streamed x chunk
                _const_spec((I, E)),
                _const_spec((1, E)),
                _const_spec((E, G)),
                _const_spec((Hp, G)),
                _const_spec((1, G)),
            ],
            out_specs=pl.BlockSpec((tc * Bp, Hp), lambda t: (t, 0)),
            scratch_shapes=[
                pltpu.VMEM((tc * Bp, G), mxu_dtype),   # hoisted pre-gates (chunk)
                pltpu.VMEM((Bp, Hp), f32),             # hidden_states carry
                pltpu.VMEM((Bp, Hp), f32),             # cell_states carry
            ],
        ),
        compiler_params=pltpu.CompilerParams(
            # time recurrence is sequential; never mark it "parallel".
            dimension_semantics=("arbitrary",),
            vmem_limit_bytes=vmem_limit),
    )(x_flat, w_emb_t, b_emb2, w_ih_t, w_hh_t, b_gate2)

    out = out_flat.reshape(S, Bp, Hp)[:, :B, :H]       # drop padding
    return jnp.transpose(out, (1, 0, 2))               # (B, S, H)


def lstm_forward_ref(x, w_emb, b_emb, w_ih, b_ih, w_hh, b_hh):
    """Pure-JAX reference mirroring the PyTorch forward (eval-mode dropout)."""
    B, S, _ = x.shape
    H = w_hh.shape[1]
    emb = jnp.maximum(jnp.einsum('bsi,ei->bse', x, w_emb) + b_emb, 0.0)
    h = jnp.zeros((B, H), jnp.float32)
    c = jnp.zeros((B, H), jnp.float32)
    outs = []
    for t in range(S):
        gates = emb[:, t] @ w_ih.T + h @ w_hh.T + b_ih + b_hh
        i_g = jax.nn.sigmoid(gates[:, 0 * H:1 * H])
        f_g = jax.nn.sigmoid(gates[:, 1 * H:2 * H])
        g_g = jnp.tanh(gates[:, 2 * H:3 * H])
        o_g = jax.nn.sigmoid(gates[:, 3 * H:4 * H])
        c = f_g * c + i_g * g_g
        h = o_g * jnp.tanh(c)
        outs.append(jnp.maximum(h, 0.0))
    return jnp.stack(outs, axis=1)


if __name__ == "__main__":
    # batch=2, seq_length=8, input_size=8, embedding_size=32, rnn_size=32
    B, S, I, E, H = 2, 8, 8, 32, 32

    key = jax.random.PRNGKey(0)
    ks = jax.random.split(key, 7)
    x = jax.random.normal(ks[0], (B, S, I), jnp.float32)
    w_emb = jax.random.normal(ks[1], (E, I), jnp.float32) * 0.1
    b_emb = jax.random.normal(ks[2], (E,), jnp.float32) * 0.1
    w_ih = jax.random.normal(ks[3], (4 * H, E), jnp.float32) * 0.1
    b_ih = jax.random.normal(ks[4], (4 * H,), jnp.float32) * 0.1
    w_hh = jax.random.normal(ks[5], (4 * H, H), jnp.float32) * 0.1
    b_hh = jax.random.normal(ks[6], (4 * H,), jnp.float32) * 0.1

    ref = lstm_forward_ref(x, w_emb, b_emb, w_ih, b_ih, w_hh, b_hh)

    # Single-chunk path (whole sequence in one grid step).
    out = lstm_forward(x, w_emb, b_emb, w_ih, b_ih, w_hh, b_hh)
    out = jax.block_until_ready(out)
    assert out.shape == (B, S, H)
    assert jnp.allclose(out, ref, atol=1e-4, rtol=1e-4)

    # Multi-chunk path: exercises the h/c carry across grid iterations.
    out2 = lstm_forward(x, w_emb, b_emb, w_ih, b_ih, w_hh, b_hh,
                        chunk_timesteps=2)
    out2 = jax.block_until_ready(out2)
    assert jnp.allclose(out2, ref, atol=1e-4, rtol=1e-4)

    print("KERNEL_OK")
</pallas_src>

<mosaic_0001>
module attributes {stable_mosaic.version = 11 : i64} {
  func.func @lstm_chunk_kernel(%arg0: i32, %arg1: memref<64x8xf32, #tpu.memory_space<vmem>>, %arg2: memref<8x32xf32, #tpu.memory_space<vmem>>, %arg3: memref<1x32xf32, #tpu.memory_space<vmem>>, %arg4: memref<32x512xf32, #tpu.memory_space<vmem>>, %arg5: memref<128x512xf32, #tpu.memory_space<vmem>>, %arg6: memref<1x512xf32, #tpu.memory_space<vmem>>, %arg7: memref<64x128xf32, #tpu.memory_space<vmem>>, %arg8: memref<64x512xf32, #tpu.memory_space<vmem>>, %arg9: memref<8x128xf32, #tpu.memory_space<vmem>>, %arg10: memref<8x128xf32, #tpu.memory_space<vmem>>) attributes {dimension_semantics = [#tpu.dimension_semantics<arbitrary>], iteration_bounds = array<i64: 1>, scalar_prefetch = 0 : i64, scratch_operands = 3 : i64, tpu.core_type = #tpu.core_type<tc>, window_params = [{transform_indices = @transform_0, window_bounds = array<i64: 64, 8>}, {pipeline_mode = #tpu.pipeline_mode<synchronous>, transform_indices = @transform_1, window_bounds = array<i64: 8, 32>}, {pipeline_mode = #tpu.pipeline_mode<synchronous>, transform_indices = @transform_2, window_bounds = array<i64: 1, 32>}, {pipeline_mode = #tpu.pipeline_mode<synchronous>, transform_indices = @transform_3, window_bounds = array<i64: 32, 512>}, {pipeline_mode = #tpu.pipeline_mode<synchronous>, transform_indices = @transform_4, window_bounds = array<i64: 128, 512>}, {pipeline_mode = #tpu.pipeline_mode<synchronous>, transform_indices = @transform_5, window_bounds = array<i64: 1, 512>}, {transform_indices = @transform_6, window_bounds = array<i64: 64, 128>}]} {
    %c0_i32 = arith.constant 0 : i32
    %0 = arith.cmpi eq, %arg0, %c0_i32 : i32
    %1 = arith.extui %0 : i1 to i32
    %c0_i32_0 = arith.constant 0 : i32
    %2 = arith.cmpi ne, %1, %c0_i32_0 : i32
    scf.if %2 {
      %cst_126 = arith.constant 0.000000e+00 : f32
      %246 = vector.broadcast %cst_126 : f32 to vector<8x128xf32>
      %c0_127 = arith.constant 0 : index
      %c0_128 = arith.constant 0 : index
      %247 = vector.load %arg9[%c0_127, %c0_128] : memref<8x128xf32, #tpu.memory_space<vmem>>, vector<8x128xf32>
      tpu.vector_store %arg9[%c0_127, %c0_128], %246 {strides = array<i32>} : memref<8x128xf32, #tpu.memory_space<vmem>>, vector<8x128xf32>,
      %cst_129 = arith.constant 0.000000e+00 : f32
      %248 = vector.broadcast %cst_129 : f32 to vector<8x128xf32>
      %c0_130 = arith.constant 0 : index
      %c0_131 = arith.constant 0 : index
      %249 = vector.load %arg10[%c0_130, %c0_131] : memref<8x128xf32, #tpu.memory_space<vmem>>, vector<8x128xf32>
      tpu.vector_store %arg10[%c0_130, %c0_131], %248 {strides = array<i32>} : memref<8x128xf32, #tpu.memory_space<vmem>>, vector<8x128xf32>,
    } else {
    }
    %c0 = arith.constant 0 : index
    %c0_1 = arith.constant 0 : index
    %3 = vector.load %arg1[%c0, %c0_1] : memref<64x8xf32, #tpu.memory_space<vmem>>, vector<64x8xf32>
    %c0_2 = arith.constant 0 : index
    %c0_3 = arith.constant 0 : index
    %4 = vector.load %arg2[%c0_2, %c0_3] : memref<8x32xf32, #tpu.memory_space<vmem>>, vector<8x32xf32>
    %cst = arith.constant dense<0.000000e+00> : vector<64x32xf32>
    %5 = tpu.matmul %3, %4, %cst {dimension_numbers = #tpu.dot_dimension_numbers<[1], [0], [0], [1], [0, 0, 1, 1], [], []>} : vector<64x8xf32>, vector<8x32xf32>, vector<64x32xf32> -> vector<64x32xf32>
    %c0_4 = arith.constant 0 : index
    %c0_5 = arith.constant 0 : index
    %6 = vector.load %arg3[%c0_4, %c0_5] : memref<1x32xf32, #tpu.memory_space<vmem>>, vector<1x32xf32>
    %7 = vector.broadcast %6 : vector<1x32xf32> to vector<64x32xf32>
    %8 = arith.addf %5, %7 : vector<64x32xf32>
    %cst_6 = arith.constant 0.000000e+00 : f32
    %9 = vector.broadcast %cst_6 : f32 to vector<64x32xf32>
    %10 = arith.maximumf %8, %9 : vector<64x32xf32>
    %c0_7 = arith.constant 0 : index
    %c0_8 = arith.constant 0 : index
    %11 = vector.load %arg4[%c0_7, %c0_8] : memref<32x512xf32, #tpu.memory_space<vmem>>, vector<32x512xf32>
    %cst_9 = arith.constant dense<0.000000e+00> : vector<64x512xf32>
    %12 = tpu.matmul %10, %11, %cst_9 {dimension_numbers = #tpu.dot_dimension_numbers<[1], [0], [0], [1], [0, 0, 1, 1], [], []>} : vector<64x32xf32>, vector<32x512xf32>, vector<64x512xf32> -> vector<64x512xf32>
    %c0_10 = arith.constant 0 : index
    %c0_11 = arith.constant 0 : index
    %13 = vector.load %arg6[%c0_10, %c0_11] : memref<1x512xf32, #tpu.memory_space<vmem>>, vector<1x512xf32>
    %14 = vector.broadcast %13 : vector<1x512xf32> to vector<64x512xf32>
    %15 = arith.addf %12, %14 : vector<64x512xf32>
    %c0_12 = arith.constant 0 : index
    %c0_13 = arith.constant 0 : index
    %16 = vector.load %arg8[%c0_12, %c0_13] : memref<64x512xf32, #tpu.memory_space<vmem>>, vector<64x512xf32>
    tpu.vector_store %arg8[%c0_12, %c0_13], %15 {strides = array<i32>} : memref<64x512xf32, #tpu.memory_space<vmem>>, vector<64x512xf32>,
    %c0_14 = arith.constant 0 : index
    %c0_15 = arith.constant 0 : index
    %17 = vector.load %arg5[%c0_14, %c0_15] : memref<128x512xf32, #tpu.memory_space<vmem>>, vector<128x512xf32>
    %c0_i32_16 = arith.constant 0 : i32
    %c0_17 = arith.constant 0 : index
    %c0_18 = arith.constant 0 : index
    %18 = vector.load %arg9[%c0_17, %c0_18] : memref<8x128xf32, #tpu.memory_space<vmem>>, vector<8x128xf32>
    %c0_19 = arith.constant 0 : index
    %c0_20 = arith.constant 0 : index
    %19 = vector.load %arg10[%c0_19, %c0_20] : memref<8x128xf32, #tpu.memory_space<vmem>>, vector<8x128xf32>
    %c8_i32 = arith.constant 8 : i32
    %20 = arith.muli %c0_i32_16, %c8_i32 : i32
    %21 = tpu.assume_multiple %20, 8 : i32
    %22 = arith.index_cast %21 : i32 to index
    %c0_21 = arith.constant 0 : index
    %23 = vector.load %arg8[%22, %c0_21] : memref<64x512xf32, #tpu.memory_space<vmem>>, vector<8x512xf32>
    %cst_22 = arith.constant dense<0.000000e+00> : vector<8x512xf32>
    %24 = tpu.matmul %18, %17, %cst_22 {dimension_numbers = #tpu.dot_dimension_numbers<[1], [0], [0], [1], [0, 0, 1, 1], [], []>} : vector<8x128xf32>, vector<128x512xf32>, vector<8x512xf32> -> vector<8x512xf32>
    %25 = arith.addf %23, %24 : vector<8x512xf32>
    %26 = vector.extract_strided_slice %25 {offsets = [0, 0], sizes = [8, 384], strides = [1, 1]} : vector<8x512xf32> to vector<8x384xf32>
    %27 = arith.negf %26 : vector<8x384xf32>
    %28 = math.exp %27 : vector<8x384xf32>
    %cst_23 = arith.constant 1.000000e+00 : f32
    %29 = vector.broadcast %cst_23 : f32 to vector<8x384xf32>
    %30 = arith.addf %29, %28 : vector<8x384xf32>
    %31 = arith.divf %29, %30 : vector<8x384xf32>
    %32 = vector.extract_strided_slice %31 {offsets = [0, 0], sizes = [8, 128], strides = [1, 1]} : vector<8x384xf32> to vector<8x128xf32>
    %33 = vector.extract_strided_slice %31 {offsets = [0, 128], sizes = [8, 128], strides = [1, 1]} : vector<8x384xf32> to vector<8x128xf32>
    %34 = vector.extract_strided_slice %31 {offsets = [0, 256], sizes = [8, 128], strides = [1, 1]} : vector<8x384xf32> to vector<8x128xf32>
    %35 = vector.extract_strided_slice %25 {offsets = [0, 384], sizes = [8, 128], strides = [1, 1]} : vector<8x512xf32> to vector<8x128xf32>
    %36 = math.tanh %35 : vector<8x128xf32>
    %37 = arith.mulf %33, %19 : vector<8x128xf32>
    %38 = arith.mulf %32, %36 : vector<8x128xf32>
    %39 = arith.addf %37, %38 : vector<8x128xf32>
    %40 = math.tanh %39 : vector<8x128xf32>
    %41 = arith.mulf %34, %40 : vector<8x128xf32>
    %c0_24 = arith.constant 0 : index
    %c0_25 = arith.constant 0 : index
    %42 = vector.load %arg9[%c0_24, %c0_25] : memref<8x128xf32, #tpu.memory_space<vmem>>, vector<8x128xf32>
    tpu.vector_store %arg9[%c0_24, %c0_25], %41 {strides = array<i32>} : memref<8x128xf32, #tpu.memory_space<vmem>>, vector<8x128xf32>,
    %c0_26 = arith.constant 0 : index
    %c0_27 = arith.constant 0 : index
    %43 = vector.load %arg10[%c0_26, %c0_27] : memref<8x128xf32, #tpu.memory_space<vmem>>, vector<8x128xf32>
    tpu.vector_store %arg10[%c0_26, %c0_27], %39 {strides = array<i32>} : memref<8x128xf32, #tpu.memory_space<vmem>>, vector<8x128xf32>,
    %44 = arith.index_cast %21 : i32 to index
    %c0_28 = arith.constant 0 : index
    %45 = vector.load %arg7[%44, %c0_28] : memref<64x128xf32, #tpu.memory_space<vmem>>, vector<8x128xf32>
    tpu.vector_store %arg7[%44, %c0_28], %41 {strides = array<i32>} : memref<64x128xf32, #tpu.memory_space<vmem>>, vector<8x128xf32>,
    %c1_i32 = arith.constant 1 : i32
    %c0_29 = arith.constant 0 : index
    %c0_30 = arith.constant 0 : index
    %46 = vector.load %arg9[%c0_29, %c0_30] : memref<8x128xf32, #tpu.memory_space<vmem>>, vector<8x128xf32>
    %c0_31 = arith.constant 0 : index
    %c0_32 = arith.constant 0 : index
    %47 = vector.load %arg10[%c0_31, %c0_32] : memref<8x128xf32, #tpu.memory_space<vmem>>, vector<8x128xf32>
    %c8_i32_33 = arith.constant 8 : i32
    %48 = arith.muli %c1_i32, %c8_i32_33 : i32
    %49 = tpu.assume_multiple %48, 8 : i32
    %50 = arith.index_cast %49 : i32 to index
    %c0_34 = arith.constant 0 : index
    %51 = vector.load %arg8[%50, %c0_34] : memref<64x512xf32, #tpu.memory_space<vmem>>, vector<8x512xf32>
    %cst_35 = arith.constant dense<0.000000e+00> : vector<8x512xf32>
    %52 = tpu.matmul %46, %17, %cst_35 {dimension_numbers = #tpu.dot_dimension_numbers<[1], [0], [0], [1], [0, 0, 1, 1], [], []>} : vector<8x128xf32>, vector<128x512xf32>, vector<8x512xf32> -> vector<8x512xf32>
    %53 = arith.addf %51, %52 : vector<8x512xf32>
    %54 = vector.extract_strided_slice %53 {offsets = [0, 0], sizes = [8, 384], strides = [1, 1]} : vector<8x512xf32> to vector<8x384xf32>
    %55 = arith.negf %54 : vector<8x384xf32>
    %56 = math.exp %55 : vector<8x384xf32>
    %cst_36 = arith.constant 1.000000e+00 : f32
    %57 = vector.broadcast %cst_36 : f32 to vector<8x384xf32>
    %58 = arith.addf %57, %56 : vector<8x384xf32>
    %59 = arith.divf %57, %58 : vector<8x384xf32>
    %60 = vector.extract_strided_slice %59 {offsets = [0, 0], sizes = [8, 128], strides = [1, 1]} : vector<8x384xf32> to vector<8x128xf32>
    %61 = vector.extract_strided_slice %59 {offsets = [0, 128], sizes = [8, 128], strides = [1, 1]} : vector<8x384xf32> to vector<8x128xf32>
    %62 = vector.extract_strided_slice %59 {offsets = [0, 256], sizes = [8, 128], strides = [1, 1]} : vector<8x384xf32> to vector<8x128xf32>
    %63 = vector.extract_strided_slice %53 {offsets = [0, 384], sizes = [8, 128], strides = [1, 1]} : vector<8x512xf32> to vector<8x128xf32>
    %64 = math.tanh %63 : vector<8x128xf32>
    %65 = arith.mulf %61, %47 : vector<8x128xf32>
    %66 = arith.mulf %60, %64 : vector<8x128xf32>
    %67 = arith.addf %65, %66 : vector<8x128xf32>
    %68 = math.tanh %67 : vector<8x128xf32>
    %69 = arith.mulf %62, %68 : vector<8x128xf32>
    %c0_37 = arith.constant 0 : index
    %c0_38 = arith.constant 0 : index
    %70 = vector.load %arg9[%c0_37, %c0_38] : memref<8x128xf32, #tpu.memory_space<vmem>>, vector<8x128xf32>
    tpu.vector_store %arg9[%c0_37, %c0_38], %69 {strides = array<i32>} : memref<8x128xf32, #tpu.memory_space<vmem>>, vector<8x128xf32>,
    %c0_39 = arith.constant 0 : index
    %c0_40 = arith.constant 0 : index
    %71 = vector.load %arg10[%c0_39, %c0_40] : memref<8x128xf32, #tpu.memory_space<vmem>>, vector<8x128xf32>
    tpu.vector_store %arg10[%c0_39, %c0_40], %67 {strides = array<i32>} : memref<8x128xf32, #tpu.memory_space<vmem>>, vector<8x128xf32>,
    %72 = arith.index_cast %49 : i32 to index
    %c0_41 = arith.constant 0 : index
    %73 = vector.load %arg7[%72, %c0_41] : memref<64x128xf32, #tpu.memory_space<vmem>>, vector<8x128xf32>
    tpu.vector_store %arg7[%72, %c0_41], %69 {strides = array<i32>} : memref<64x128xf32, #tpu.memory_space<vmem>>, vector<8x128xf32>,
    %c2_i32 = arith.constant 2 : i32
    %c0_42 = arith.constant 0 : index
    %c0_43 = arith.constant 0 : index
    %74 = vector.load %arg9[%c0_42, %c0_43] : memref<8x128xf32, #tpu.memory_space<vmem>>, vector<8x128xf32>
    %c0_44 = arith.constant 0 : index
    %c0_45 = arith.constant 0 : index
    %75 = vector.load %arg10[%c0_44, %c0_45] : memref<8x128xf32, #tpu.memory_space<vmem>>, vector<8x128xf32>
    %c8_i32_46 = arith.constant 8 : i32
    %76 = arith.muli %c2_i32, %c8_i32_46 : i32
    %77 = tpu.assume_multiple %76, 8 : i32
    %78 = arith.index_cast %77 : i32 to index
    %c0_47 = arith.constant 0 : index
    %79 = vector.load %arg8[%78, %c0_47] : memref<64x512xf32, #tpu.memory_space<vmem>>, vector<8x512xf32>
    %cst_48 = arith.constant dense<0.000000e+00> : vector<8x512xf32>
    %80 = tpu.matmul %74, %17, %cst_48 {dimension_numbers = #tpu.dot_dimension_numbers<[1], [0], [0], [1], [0, 0, 1, 1], [], []>} : vector<8x128xf32>, vector<128x512xf32>, vector<8x512xf32> -> vector<8x512xf32>
    %81 = arith.addf %79, %80 : vector<8x512xf32>
    %82 = vector.extract_strided_slice %81 {offsets = [0, 0], sizes = [8, 384], strides = [1, 1]} : vector<8x512xf32> to vector<8x384xf32>
    %83 = arith.negf %82 : vector<8x384xf32>
    %84 = math.exp %83 : vector<8x384xf32>
    %cst_49 = arith.constant 1.000000e+00 : f32
    %85 = vector.broadcast %cst_49 : f32 to vector<8x384xf32>
    %86 = arith.addf %85, %84 : vector<8x384xf32>
    %87 = arith.divf %85, %86 : vector<8x384xf32>
    %88 = vector.extract_strided_slice %87 {offsets = [0, 0], sizes = [8, 128], strides = [1, 1]} : vector<8x384xf32> to vector<8x128xf32>
    %89 = vector.extract_strided_slice %87 {offsets = [0, 128], sizes = [8, 128], strides = [1, 1]} : vector<8x384xf32> to vector<8x128xf32>
    %90 = vector.extract_strided_slice %87 {offsets = [0, 256], sizes = [8, 128], strides = [1, 1]} : vector<8x384xf32> to vector<8x128xf32>
    %91 = vector.extract_strided_slice %81 {offsets = [0, 384], sizes = [8, 128], strides = [1, 1]} : vector<8x512xf32> to vector<8x128xf32>
    %92 = math.tanh %91 : vector<8x128xf32>
    %93 = arith.mulf %89, %75 : vector<8x128xf32>
    %94 = arith.mulf %88, %92 : vector<8x128xf32>
    %95 = arith.addf %93, %94 : vector<8x128xf32>
    %96 = math.tanh %95 : vector<8x128xf32>
    %97 = arith.mulf %90, %96 : vector<8x128xf32>
    %c0_50 = arith.constant 0 : index
    %c0_51 = arith.constant 0 : index
    %98 = vector.load %arg9[%c0_50, %c0_51] : memref<8x128xf32, #tpu.memory_space<vmem>>, vector<8x128xf32>
    tpu.vector_store %arg9[%c0_50, %c0_51], %97 {strides = array<i32>} : memref<8x128xf32, #tpu.memory_space<vmem>>, vector<8x128xf32>,
    %c0_52 = arith.constant 0 : index
    %c0_53 = arith.constant 0 : index
    %99 = vector.load %arg10[%c0_52, %c0_53] : memref<8x128xf32, #tpu.memory_space<vmem>>, vector<8x128xf32>
    tpu.vector_store %arg10[%c0_52, %c0_53], %95 {strides = array<i32>} : memref<8x128xf32, #tpu.memory_space<vmem>>, vector<8x128xf32>,
    %100 = arith.index_cast %77 : i32 to index
    %c0_54 = arith.constant 0 : index
    %101 = vector.load %arg7[%100, %c0_54] : memref<64x128xf32, #tpu.memory_space<vmem>>, vector<8x128xf32>
    tpu.vector_store %arg7[%100, %c0_54], %97 {strides = array<i32>} : memref<64x128xf32, #tpu.memory_space<vmem>>, vector<8x128xf32>,
    %c3_i32 = arith.constant 3 : i32
    %c0_55 = arith.constant 0 : index
    %c0_56 = arith.constant 0 : index
    %102 = vector.load %arg9[%c0_55, %c0_56] : memref<8x128xf32, #tpu.memory_space<vmem>>, vector<8x128xf32>
    %c0_57 = arith.constant 0 : index
    %c0_58 = arith.constant 0 : index
    %103 = vector.load %arg10[%c0_57, %c0_58] : memref<8x128xf32, #tpu.memory_space<vmem>>, vector<8x128xf32>
    %c8_i32_59 = arith.constant 8 : i32
    %104 = arith.muli %c3_i32, %c8_i32_59 : i32
    %105 = tpu.assume_multiple %104, 8 : i32
    %106 = arith.index_cast %105 : i32 to index
    %c0_60 = arith.constant 0 : index
    %107 = vector.load %arg8[%106, %c0_60] : memref<64x512xf32, #tpu.memory_space<vmem>>, vector<8x512xf32>
    %cst_61 = arith.constant dense<0.000000e+00> : vector<8x512xf32>
    %108 = tpu.matmul %102, %17, %cst_61 {dimension_numbers = #tpu.dot_dimension_numbers<[1], [0], [0], [1], [0, 0, 1, 1], [], []>} : vector<8x128xf32>, vector<128x512xf32>, vector<8x512xf32> -> vector<8x512xf32>
    %109 = arith.addf %107, %108 : vector<8x512xf32>
    %110 = vector.extract_strided_slice %109 {offsets = [0, 0], sizes = [8, 384], strides = [1, 1]} : vector<8x512xf32> to vector<8x384xf32>
    %111 = arith.negf %110 : vector<8x384xf32>
    %112 = math.exp %111 : vector<8x384xf32>
    %cst_62 = arith.constant 1.000000e+00 : f32
    %113 = vector.broadcast %cst_62 : f32 to vector<8x384xf32>
    %114 = arith.addf %113, %112 : vector<8x384xf32>
    %115 = arith.divf %113, %114 : vector<8x384xf32>
    %116 = vector.extract_strided_slice %115 {offsets = [0, 0], sizes = [8, 128], strides = [1, 1]} : vector<8x384xf32> to vector<8x128xf32>
    %117 = vector.extract_strided_slice %115 {offsets = [0, 128], sizes = [8, 128], strides = [1, 1]} : vector<8x384xf32> to vector<8x128xf32>
    %118 = vector.extract_strided_slice %115 {offsets = [0, 256], sizes = [8, 128], strides = [1, 1]} : vector<8x384xf32> to vector<8x128xf32>
    %119 = vector.extract_strided_slice %109 {offsets = [0, 384], sizes = [8, 128], strides = [1, 1]} : vector<8x512xf32> to vector<8x128xf32>
    %120 = math.tanh %119 : vector<8x128xf32>
    %121 = arith.mulf %117, %103 : vector<8x128xf32>
    %122 = arith.mulf %116, %120 : vector<8x128xf32>
    %123 = arith.addf %121, %122 : vector<8x128xf32>
    %124 = math.tanh %123 : vector<8x128xf32>
    %125 = arith.mulf %118, %124 : vector<8x128xf32>
    %c0_63 = arith.constant 0 : index
    %c0_64 = arith.constant 0 : index
    %126 = vector.load %arg9[%c0_63, %c0_64] : memref<8x128xf32, #tpu.memory_space<vmem>>, vector<8x128xf32>
    tpu.vector_store %arg9[%c0_63, %c0_64], %125 {strides = array<i32>} : memref<8x128xf32, #tpu.memory_space<vmem>>, vector<8x128xf32>,
    %c0_65 = arith.constant 0 : index
    %c0_66 = arith.constant 0 : index
    %127 = vector.load %arg10[%c0_65, %c0_66] : memref<8x128xf32, #tpu.memory_space<vmem>>, vector<8x128xf32>
    tpu.vector_store %arg10[%c0_65, %c0_66], %123 {strides = array<i32>} : memref<8x128xf32, #tpu.memory_space<vmem>>, vector<8x128xf32>,
    %128 = arith.index_cast %105 : i32 to index
    %c0_67 = arith.constant 0 : index
    %129 = vector.load %arg7[%128, %c0_67] : memref<64x128xf32, #tpu.memory_space<vmem>>, vector<8x128xf32>
    tpu.vector_store %arg7[%128, %c0_67], %125 {strides = array<i32>} : memref<64x128xf32, #tpu.memory_space<vmem>>, vector<8x128xf32>,
    %c4_i32 = arith.constant 4 : i32
    %c0_68 = arith.constant 0 : index
    %c0_69 = arith.constant 0 : index
    %130 = vector.load %arg9[%c0_68, %c0_69] : memref<8x128xf32, #tpu.memory_space<vmem>>, vector<8x128xf32>
    %c0_70 = arith.constant 0 : index
    %c0_71 = arith.constant 0 : index
    %131 = vector.load %arg10[%c0_70, %c0_71] : memref<8x128xf32, #tpu.memory_space<vmem>>, vector<8x128xf32>
    %c8_i32_72 = arith.constant 8 : i32
    %132 = arith.muli %c4_i32, %c8_i32_72 : i32
    %133 = tpu.assume_multiple %132, 8 : i32
    %134 = arith.index_cast %133 : i32 to index
    %c0_73 = arith.constant 0 : index
    %135 = vector.load %arg8[%134, %c0_73] : memref<64x512xf32, #tpu.memory_space<vmem>>, vector<8x512xf32>
    %cst_74 = arith.constant dense<0.000000e+00> : vector<8x512xf32>
    %136 = tpu.matmul %130, %17, %cst_74 {dimension_numbers = #tpu.dot_dimension_numbers<[1], [0], [0], [1], [0, 0, 1, 1], [], []>} : vector<8x128xf32>, vector<128x512xf32>, vector<8x512xf32> -> vector<8x512xf32>
    %137 = arith.addf %135, %136 : vector<8x512xf32>
    %138 = vector.extract_strided_slice %137 {offsets = [0, 0], sizes = [8, 384], strides = [1, 1]} : vector<8x512xf32> to vector<8x384xf32>
    %139 = arith.negf %138 : vector<8x384xf32>
    %140 = math.exp %139 : vector<8x384xf32>
    %cst_75 = arith.constant 1.000000e+00 : f32
    %141 = vector.broadcast %cst_75 : f32 to vector<8x384xf32>
    %142 = arith.addf %141, %140 : vector<8x384xf32>
    %143 = arith.divf %141, %142 : vector<8x384xf32>
    %144 = vector.extract_strided_slice %143 {offsets = [0, 0], sizes = [8, 128], strides = [1, 1]} : vector<8x384xf32> to vector<8x128xf32>
    %145 = vector.extract_strided_slice %143 {offsets = [0, 128], sizes = [8, 128], strides = [1, 1]} : vector<8x384xf32> to vector<8x128xf32>
    %146 = vector.extract_strided_slice %143 {offsets = [0, 256], sizes = [8, 128], strides = [1, 1]} : vector<8x384xf32> to vector<8x128xf32>
    %147 = vector.extract_strided_slice %137 {offsets = [0, 384], sizes = [8, 128], strides = [1, 1]} : vector<8x512xf32> to vector<8x128xf32>
    %148 = math.tanh %147 : vector<8x128xf32>
    %149 = arith.mulf %145, %131 : vector<8x128xf32>
    %150 = arith.mulf %144, %148 : vector<8x128xf32>
    %151 = arith.addf %149, %150 : vector<8x128xf32>
    %152 = math.tanh %151 : vector<8x128xf32>
    %153 = arith.mulf %146, %152 : vector<8x128xf32>
    %c0_76 = arith.constant 0 : index
    %c0_77 = arith.constant 0 : index
    %154 = vector.load %arg9[%c0_76, %c0_77] : memref<8x128xf32, #tpu.memory_space<vmem>>, vector<8x128xf32>
    tpu.vector_store %arg9[%c0_76, %c0_77], %153 {strides = array<i32>} : memref<8x128xf32, #tpu.memory_space<vmem>>, vector<8x128xf32>,
    %c0_78 = arith.constant 0 : index
    %c0_79 = arith.constant 0 : index
    %155 = vector.load %arg10[%c0_78, %c0_79] : memref<8x128xf32, #tpu.memory_space<vmem>>, vector<8x128xf32>
    tpu.vector_store %arg10[%c0_78, %c0_79], %151 {strides = array<i32>} : memref<8x128xf32, #tpu.memory_space<vmem>>, vector<8x128xf32>,
    %156 = arith.index_cast %133 : i32 to index
    %c0_80 = arith.constant 0 : index
    %157 = vector.load %arg7[%156, %c0_80] : memref<64x128xf32, #tpu.memory_space<vmem>>, vector<8x128xf32>
    tpu.vector_store %arg7[%156, %c0_80], %153 {strides = array<i32>} : memref<64x128xf32, #tpu.memory_space<vmem>>, vector<8x128xf32>,
    %c5_i32 = arith.constant 5 : i32
    %c0_81 = arith.constant 0 : index
    %c0_82 = arith.constant 0 : index
    %158 = vector.load %arg9[%c0_81, %c0_82] : memref<8x128xf32, #tpu.memory_space<vmem>>, vector<8x128xf32>
    %c0_83 = arith.constant 0 : index
    %c0_84 = arith.constant 0 : index
    %159 = vector.load %arg10[%c0_83, %c0_84] : memref<8x128xf32, #tpu.memory_space<vmem>>, vector<8x128xf32>
    %c8_i32_85 = arith.constant 8 : i32
    %160 = arith.muli %c5_i32, %c8_i32_85 : i32
    %161 = tpu.assume_multiple %160, 8 : i32
    %162 = arith.index_cast %161 : i32 to index
    %c0_86 = arith.constant 0 : index
    %163 = vector.load %arg8[%162, %c0_86] : memref<64x512xf32, #tpu.memory_space<vmem>>, vector<8x512xf32>
    %cst_87 = arith.constant dense<0.000000e+00> : vector<8x512xf32>
    %164 = tpu.matmul %158, %17, %cst_87 {dimension_numbers = #tpu.dot_dimension_numbers<[1], [0], [0], [1], [0, 0, 1, 1], [], []>} : vector<8x128xf32>, vector<128x512xf32>, vector<8x512xf32> -> vector<8x512xf32>
    %165 = arith.addf %163, %164 : vector<8x512xf32>
    %166 = vector.extract_strided_slice %165 {offsets = [0, 0], sizes = [8, 384], strides = [1, 1]} : vector<8x512xf32> to vector<8x384xf32>
    %167 = arith.negf %166 : vector<8x384xf32>
    %168 = math.exp %167 : vector<8x384xf32>
    %cst_88 = arith.constant 1.000000e+00 : f32
    %169 = vector.broadcast %cst_88 : f32 to vector<8x384xf32>
    %170 = arith.addf %169, %168 : vector<8x384xf32>
    %171 = arith.divf %169, %170 : vector<8x384xf32>
    %172 = vector.extract_strided_slice %171 {offsets = [0, 0], sizes = [8, 128], strides = [1, 1]} : vector<8x384xf32> to vector<8x128xf32>
    %173 = vector.extract_strided_slice %171 {offsets = [0, 128], sizes = [8, 128], strides = [1, 1]} : vector<8x384xf32> to vector<8x128xf32>
    %174 = vector.extract_strided_slice %171 {offsets = [0, 256], sizes = [8, 128], strides = [1, 1]} : vector<8x384xf32> to vector<8x128xf32>
    %175 = vector.extract_strided_slice %165 {offsets = [0, 384], sizes = [8, 128], strides = [1, 1]} : vector<8x512xf32> to vector<8x128xf32>
    %176 = math.tanh %175 : vector<8x128xf32>
    %177 = arith.mulf %173, %159 : vector<8x128xf32>
    %178 = arith.mulf %172, %176 : vector<8x128xf32>
    %179 = arith.addf %177, %178 : vector<8x128xf32>
    %180 = math.tanh %179 : vector<8x128xf32>
    %181 = arith.mulf %174, %180 : vector<8x128xf32>
    %c0_89 = arith.constant 0 : index
    %c0_90 = arith.constant 0 : index
    %182 = vector.load %arg9[%c0_89, %c0_90] : memref<8x128xf32, #tpu.memory_space<vmem>>, vector<8x128xf32>
    tpu.vector_store %arg9[%c0_89, %c0_90], %181 {strides = array<i32>} : memref<8x128xf32, #tpu.memory_space<vmem>>, vector<8x128xf32>,
    %c0_91 = arith.constant 0 : index
    %c0_92 = arith.constant 0 : index
    %183 = vector.load %arg10[%c0_91, %c0_92] : memref<8x128xf32, #tpu.memory_space<vmem>>, vector<8x128xf32>
    tpu.vector_store %arg10[%c0_91, %c0_92], %179 {strides = array<i32>} : memref<8x128xf32, #tpu.memory_space<vmem>>, vector<8x128xf32>,
    %184 = arith.index_cast %161 : i32 to index
    %c0_93 = arith.constant 0 : index
    %185 = vector.load %arg7[%184, %c0_93] : memref<64x128xf32, #tpu.memory_space<vmem>>, vector<8x128xf32>
    tpu.vector_store %arg7[%184, %c0_93], %181 {strides = array<i32>} : memref<64x128xf32, #tpu.memory_space<vmem>>, vector<8x128xf32>,
    %c6_i32 = arith.constant 6 : i32
    %c0_94 = arith.constant 0 : index
    %c0_95 = arith.constant 0 : index
    %186 = vector.load %arg9[%c0_94, %c0_95] : memref<8x128xf32, #tpu.memory_space<vmem>>, vector<8x128xf32>
    %c0_96 = arith.constant 0 : index
    %c0_97 = arith.constant 0 : index
    %187 = vector.load %arg10[%c0_96, %c0_97] : memref<8x128xf32, #tpu.memory_space<vmem>>, vector<8x128xf32>
    %c8_i32_98 = arith.constant 8 : i32
    %188 = arith.muli %c6_i32, %c8_i32_98 : i32
    %189 = tpu.assume_multiple %188, 8 : i32
    %190 = arith.index_cast %189 : i32 to index
    %c0_99 = arith.constant 0 : index
    %191 = vector.load %arg8[%190, %c0_99] : memref<64x512xf32, #tpu.memory_space<vmem>>, vector<8x512xf32>
    %cst_100 = arith.constant dense<0.000000e+00> : vector<8x512xf32>
    %192 = tpu.matmul %186, %17, %cst_100 {dimension_numbers = #tpu.dot_dimension_numbers<[1], [0], [0], [1], [0, 0, 1, 1], [], []>} : vector<8x128xf32>, vector<128x512xf32>, vector<8x512xf32> -> vector<8x512xf32>
    %193 = arith.addf %191, %192 : vector<8x512xf32>
    %194 = vector.extract_strided_slice %193 {offsets = [0, 0], sizes = [8, 384], strides = [1, 1]} : vector<8x512xf32> to vector<8x384xf32>
    %195 = arith.negf %194 : vector<8x384xf32>
    %196 = math.exp %195 : vector<8x384xf32>
    %cst_101 = arith.constant 1.000000e+00 : f32
    %197 = vector.broadcast %cst_101 : f32 to vector<8x384xf32>
    %198 = arith.addf %197, %196 : vector<8x384xf32>
    %199 = arith.divf %197, %198 : vector<8x384xf32>
    %200 = vector.extract_strided_slice %199 {offsets = [0, 0], sizes = [8, 128], strides = [1, 1]} : vector<8x384xf32> to vector<8x128xf32>
    %201 = vector.extract_strided_slice %199 {offsets = [0, 128], sizes = [8, 128], strides = [1, 1]} : vector<8x384xf32> to vector<8x128xf32>
    %202 = vector.extract_strided_slice %199 {offsets = [0, 256], sizes = [8, 128], strides = [1, 1]} : vector<8x384xf32> to vector<8x128xf32>
    %203 = vector.extract_strided_slice %193 {offsets = [0, 384], sizes = [8, 128], strides = [1, 1]} : vector<8x512xf32> to vector<8x128xf32>
    %204 = math.tanh %203 : vector<8x128xf32>
    %205 = arith.mulf %201, %187 : vector<8x128xf32>
    %206 = arith.mulf %200, %204 : vector<8x128xf32>
    %207 = arith.addf %205, %206 : vector<8x128xf32>
    %208 = math.tanh %207 : vector<8x128xf32>
    %209 = arith.mulf %202, %208 : vector<8x128xf32>
    %c0_102 = arith.constant 0 : index
    %c0_103 = arith.constant 0 : index
    %210 = vector.load %arg9[%c0_102, %c0_103] : memref<8x128xf32, #tpu.memory_space<vmem>>, vector<8x128xf32>
    tpu.vector_store %arg9[%c0_102, %c0_103], %209 {strides = array<i32>} : memref<8x128xf32, #tpu.memory_space<vmem>>, vector<8x128xf32>,
    %c0_104 = arith.constant 0 : index
    %c0_105 = arith.constant 0 : index
    %211 = vector.load %arg10[%c0_104, %c0_105] : memref<8x128xf32, #tpu.memory_space<vmem>>, vector<8x128xf32>
    tpu.vector_store %arg10[%c0_104, %c0_105], %207 {strides = array<i32>} : memref<8x128xf32, #tpu.memory_space<vmem>>, vector<8x128xf32>,
    %212 = arith.index_cast %189 : i32 to index
    %c0_106 = arith.constant 0 : index
    %213 = vector.load %arg7[%212, %c0_106] : memref<64x128xf32, #tpu.memory_space<vmem>>, vector<8x128xf32>
    tpu.vector_store %arg7[%212, %c0_106], %209 {strides = array<i32>} : memref<64x128xf32, #tpu.memory_space<vmem>>, vector<8x128xf32>,
    %c7_i32 = arith.constant 7 : i32
    %c0_107 = arith.constant 0 : index
    %c0_108 = arith.constant 0 : index
    %214 = vector.load %arg9[%c0_107, %c0_108] : memref<8x128xf32, #tpu.memory_space<vmem>>, vector<8x128xf32>
    %c0_109 = arith.constant 0 : index
    %c0_110 = arith.constant 0 : index
    %215 = vector.load %arg10[%c0_109, %c0_110] : memref<8x128xf32, #tpu.memory_space<vmem>>, vector<8x128xf32>
    %c8_i32_111 = arith.constant 8 : i32
    %216 = arith.muli %c7_i32, %c8_i32_111 : i32
    %217 = tpu.assume_multiple %216, 8 : i32
    %218 = arith.index_cast %217 : i32 to index
    %c0_112 = arith.constant 0 : index
    %219 = vector.load %arg8[%218, %c0_112] : memref<64x512xf32, #tpu.memory_space<vmem>>, vector<8x512xf32>
    %cst_113 = arith.constant dense<0.000000e+00> : vector<8x512xf32>
    %220 = tpu.matmul %214, %17, %cst_113 {dimension_numbers = #tpu.dot_dimension_numbers<[1], [0], [0], [1], [0, 0, 1, 1], [], []>} : vector<8x128xf32>, vector<128x512xf32>, vector<8x512xf32> -> vector<8x512xf32>
    %221 = arith.addf %219, %220 : vector<8x512xf32>
    %222 = vector.extract_strided_slice %221 {offsets = [0, 0], sizes = [8, 384], strides = [1, 1]} : vector<8x512xf32> to vector<8x384xf32>
    %223 = arith.negf %222 : vector<8x384xf32>
    %224 = math.exp %223 : vector<8x384xf32>
    %cst_114 = arith.constant 1.000000e+00 : f32
    %225 = vector.broadcast %cst_114 : f32 to vector<8x384xf32>
    %226 = arith.addf %225, %224 : vector<8x384xf32>
    %227 = arith.divf %225, %226 : vector<8x384xf32>
    %228 = vector.extract_strided_slice %227 {offsets = [0, 0], sizes = [8, 128], strides = [1, 1]} : vector<8x384xf32> to vector<8x128xf32>
    %229 = vector.extract_strided_slice %227 {offsets = [0, 128], sizes = [8, 128], strides = [1, 1]} : vector<8x384xf32> to vector<8x128xf32>
    %230 = vector.extract_strided_slice %227 {offsets = [0, 256], sizes = [8, 128], strides = [1, 1]} : vector<8x384xf32> to vector<8x128xf32>
    %231 = vector.extract_strided_slice %221 {offsets = [0, 384], sizes = [8, 128], strides = [1, 1]} : vector<8x512xf32> to vector<8x128xf32>
    %232 = math.tanh %231 : vector<8x128xf32>
    %233 = arith.mulf %229, %215 : vector<8x128xf32>
    %234 = arith.mulf %228, %232 : vector<8x128xf32>
    %235 = arith.addf %233, %234 : vector<8x128xf32>
    %236 = math.tanh %235 : vector<8x128xf32>
    %237 = arith.mulf %230, %236 : vector<8x128xf32>
    %c0_115 = arith.constant 0 : index
    %c0_116 = arith.constant 0 : index
    %238 = vector.load %arg9[%c0_115, %c0_116] : memref<8x128xf32, #tpu.memory_space<vmem>>, vector<8x128xf32>
    tpu.vector_store %arg9[%c0_115, %c0_116], %237 {strides = array<i32>} : memref<8x128xf32, #tpu.memory_space<vmem>>, vector<8x128xf32>,
    %c0_117 = arith.constant 0 : index
    %c0_118 = arith.constant 0 : index
    %239 = vector.load %arg10[%c0_117, %c0_118] : memref<8x128xf32, #tpu.memory_space<vmem>>, vector<8x128xf32>
    tpu.vector_store %arg10[%c0_117, %c0_118], %235 {strides = array<i32>} : memref<8x128xf32, #tpu.memory_space<vmem>>, vector<8x128xf32>,
    %240 = arith.index_cast %217 : i32 to index
    %c0_119 = arith.constant 0 : index
    %241 = vector.load %arg7[%240, %c0_119] : memref<64x128xf32, #tpu.memory_space<vmem>>, vector<8x128xf32>
    tpu.vector_store %arg7[%240, %c0_119], %237 {strides = array<i32>} : memref<64x128xf32, #tpu.memory_space<vmem>>, vector<8x128xf32>,
    %c8_i32_120 = arith.constant 8 : i32
    %c0_121 = arith.constant 0 : index
    %c0_122 = arith.constant 0 : index
    %242 = vector.load %arg7[%c0_121, %c0_122] : memref<64x128xf32, #tpu.memory_space<vmem>>, vector<64x128xf32>
    %cst_123 = arith.constant 0.000000e+00 : f32
    %243 = vector.broadcast %cst_123 : f32 to vector<64x128xf32>
    %244 = arith.maximumf %242, %243 : vector<64x128xf32>
    %c0_124 = arith.constant 0 : index
    %c0_125 = arith.constant 0 : index
    %245 = vector.load %arg7[%c0_124, %c0_125] : memref<64x128xf32, #tpu.memory_space<vmem>>, vector<64x128xf32>
    tpu.vector_store %arg7[%c0_124, %c0_125], %244 {strides = array<i32>} : memref<64x128xf32, #tpu.memory_space<vmem>>, vector<64x128xf32>,
    return
  }
  func.func @transform_0(%arg0: i32) -> (i32, i32) {
    %c0_i32 = arith.constant 0 : i32
    %c0_i32_0 = arith.constant 0 : i32
    return %arg0, %c0_i32 : i32, i32
  }
  func.func @transform_1(%arg0: i32) -> (i32, i32) {
    %c0_i32 = arith.constant 0 : i32
    %c0_i32_0 = arith.constant 0 : i32
    %c0_i32_1 = arith.constant 0 : i32
    return %c0_i32, %c0_i32_0 : i32, i32
  }
  func.func @transform_2(%arg0: i32) -> (i32, i32) {
    %c0_i32 = arith.constant 0 : i32
    %c0_i32_0 = arith.constant 0 : i32
    %c0_i32_1 = arith.constant 0 : i32
    return %c0_i32, %c0_i32_0 : i32, i32
  }
  func.func @transform_3(%arg0: i32) -> (i32, i32) {
    %c0_i32 = arith.constant 0 : i32
    %c0_i32_0 = arith.constant 0 : i32
    %c0_i32_1 = arith.constant 0 : i32
    return %c0_i32, %c0_i32_0 : i32, i32
  }
  func.func @transform_4(%arg0: i32) -> (i32, i32) {
    %c0_i32 = arith.constant 0 : i32
    %c0_i32_0 = arith.constant 0 : i32
    %c0_i32_1 = arith.constant 0 : i32
    return %c0_i32, %c0_i32_0 : i32, i32
  }
  func.func @transform_5(%arg0: i32) -> (i32, i32) {
    %c0_i32 = arith.constant 0 : i32
    %c0_i32_0 = arith.constant 0 : i32
    %c0_i32_1 = arith.constant 0 : i32
    return %c0_i32, %c0_i32_0 : i32, i32
  }
  func.func @transform_6(%arg0: i32) -> (i32, i32) {
    %c0_i32 = arith.constant 0 : i32
    %c0_i32_0 = arith.constant 0 : i32
    return %arg0, %c0_i32 : i32, i32
  }
}

</mosaic_0001>

<bundles_post_ra>
// kernel: tpu_custom_call.1
= control target key start
LH: loop header
LB: loop body
LE: loop exit
PB: predicated region body
PF: predicated region fallthrough
CT: control target
= control target key end

     0   :  { %11 = vsyncpa [#allocation6], 0  ;;  %s3244_s0 = inlined_call_operand.vmem [shape: f32[64,8], index: 0, kind: input, shape index: {}]   ;;  %s3245_s1 = inlined_call_operand.vmem [shape: f32[8,32], index: 1, kind: input, shape index: {}]   ;;  %s3246_s2 = inlined_call_operand.vmem [shape: f32[1,32], index: 2, kind: input, shape index: {}]   ;;  %s3247_s3 = inlined_call_operand.hbm [shape: f32[32,512], index: 3, kind: input, shape index: {}]   ;;  %s3248_s4 = inlined_call_operand.hbm [shape: f32[128,512], index: 4, kind: input, shape index: {}]   ;;  %s3249_s5 = inlined_call_operand.vmem [shape: f32[1,512], index: 5, kind: input, shape index: {}]   ;;  %s3250_s6 = inlined_call_operand.hbm [shape: f32[64,128], index: 6, kind: output, shape index: {}]  }
   0x1   :  { %12 = vsyncpa [#allocation9], 0 }
   0x2   :  { %13 = vsyncpa [#allocation7], 0  ;;  %s24_s23 = sshll.u32 %s3247_s3, 4  ;;  %s2138_s24 = smov [#allocation5]   ;;  %s25_s23 = int_to_ptr.hbm [resolvable:$true] %s24_s23 }
   0x3   :  { %s26_s25 = sshll.u32 %s2138_s24, 4  ;;  %s37_s28 = sshll.u32 %s3248_s4, 4  ;;  %s27_s25 = int_to_ptr.vmem [resolvable:$true] %s26_s25  ;;  %s38_s28 = int_to_ptr.hbm [resolvable:$true] %s37_s28 }
   0x4   :  { %s2139_s29 = smov 512   ;;  %s2140_s30 = smov 32  }
   0x5   :  { %32 = dma.hbm_to_vmem [thread:$0]  %s25_s23, 2048, %s27_s25, [#allocation6], %s2139_s29, %s2139_s29, %s2140_s30  }
   0x6   :  { %s2141_s7 = smov [#allocation8]  }
   0x7   :  { %s39_s8 = sshll.u32 %s2141_s7, 4  ;;  %s40_s8 = int_to_ptr.vmem [resolvable:$true] %s39_s8 }
   0x8   :  { %45 = dma.hbm_to_vmem [thread:$0]  %s38_s28, 8192, %s40_s8, [#allocation9], %s2139_s29, %s2139_s29, %s2140_s30  }
   0x9   :  { %2132 = dma.done.wait [#allocation6], 2048  }
   0xa   :  { %2133 = vsyncadd [#allocation6], 4294965248 }
   0xb   :  { %2134 = dma.done.wait [#allocation9], 8192  }
   0xc   :  { %2135 = vsyncadd [#allocation9], 4294959104  ;;  %vm75_vm0 = vcmask 64512   ;;  %v70_v0 = vld [vmem:[%s3245_s1] sm:$0xff]  ;;  %v63_v2 = vld [vmem:[%s3244_s0 + $0x8] sm:$0xff]  ;;  %vm175_vm1 = vcmask 261120  }
   0xd   :  { %v62_v1 = vld [vmem:[%s3244_s0] sm:$0xff]  ;;  %115 = vmatpush.msra.mxu0 %v70_v0  ;;  %1854 = vmatpush.msra.mxu3 %v70_v0  ;;  %v64_v3 = vld [vmem:[%s3244_s0 + $0x10] sm:$0xff]  ;;  %v69_v4 = vld [vmem:[%s3244_s0 + $0x38] sm:$0xff]  ;;  %s1769_s29 = sshll.u32 %s3250_s6, 4  ;;  %s2144_s30 = smov 128   ;;  %s1770_s29 = int_to_ptr.hbm [resolvable:$true] %s1769_s29 }
   0xe   :  { %1790 = vmatmul.msk.f32.vlgmr.msra.gmra.mxu0 %vm75_vm0, %v62_v1  ;;  %v161_v5 = vld [vmem:[#allocation5 + $0x60] sm:$0xff]  ;;  %1797 = vmatmul.msk.f32.vlgmr.msra.gmra.mxu3 %vm75_vm0, %v69_v4  ;;  %v163_v7 = vld [vmem:[#allocation5 + $0x70] sm:$0xff]  ;;  %v164_v9 = vld [vmem:[#allocation5 + $0x78] sm:$0xff]  ;;  %s2145_s7 = smov 8  }
   0xf   :  { %v157_v6 = vld [vmem:[#allocation5 + $0x40] sm:$0xff]  ;;  %212 = vmatpush.msra.mxu1 %v161_v5  ;;  %294 = vmatpush.msrb.mxu3 %v163_v7  ;;  %v65_v11 = vld [vmem:[%s3244_s0 + $0x18] sm:$0xff]  ;;  %v67_v14 = vld [vmem:[%s3244_s0 + $0x28] sm:$0xff] }
  0x10   :  { %v153_v8 = vld [vmem:[#allocation5 + $0x20] sm:$0xff]  ;;  %1855 = vmatpush.msra.mxu2 %v161_v5  ;;  %335 = vmatpush.msrb.mxu0 %v164_v9  ;;  %v68_v15 = vld [vmem:[%s3244_s0 + $0x30] sm:$0xff]  ;;  %v160_v17 = vld [vmem:[#allocation5 + $0x58] sm:$0xff] }
  0x11   :  { %213 = vmatpush.msra.mxu1 %v157_v6  ;;  %v149_v10 = vld [vmem:[#allocation5] sm:$0xff]  ;;  %v159_v16 = vld [vmem:[#allocation5 + $0x50] sm:$0xff]  ;;  %v156_v20 = vld [vmem:[#allocation5 + $0x38] sm:$0xff] }
  0x12   :  { %1856 = vmatpush.msra.mxu2 %v157_v6  ;;  %v2209_v12 = vld [vmem:[#allocation8 + $0x1e0] sm:$0xff]  ;;  %295 = vmatpush.msrb.mxu3 %v159_v16  ;;  %v155_v19 = vld [vmem:[#allocation5 + $0x30] sm:$0xff]  ;;  %v152_v23 = vld [vmem:[#allocation5 + $0x18] sm:$0xff] }
  0x13   :  { %214 = vmatpush.msra.mxu1 %v153_v8  ;;  %v66_v13 = vld [vmem:[%s3244_s0 + $0x20] sm:$0xff]  ;;  %336 = vmatpush.msrb.mxu0 %v160_v17  ;;  %v151_v22 = vld [vmem:[#allocation5 + $0x10] sm:$0xff]  ;;  %v2278_v41 = vld [vmem:[#allocation8 + $0x1f8] sm:$0xff] }
  0x14   :  { %1857 = vmatpush.msra.mxu2 %v153_v8  ;;  %v2225_v18 = vld [vmem:[#allocation8 + $0x1c0] sm:$0xff]  ;;  %296 = vmatpush.msrb.mxu3 %v155_v19  ;;  %v2284_v42 = vld [vmem:[#allocation8 + $0x1d8] sm:$0xff]  ;;  %v2289_v43 = vld [vmem:[#allocation8 + $0x1f0] sm:$0xff] }
  0x15   :  { %215 = vmatpush.msra.mxu1 %v149_v10  ;;  %337 = vmatpush.msrb.mxu0 %v156_v20  ;;  %v2228_v21 = vld [vmem:[#allocation8 + $0x1a0] sm:$0xff]  ;;  %v2291_v44 = vld [vmem:[#allocation8 + $0x1b8] sm:$0xff]  ;;  %v2296_v46 = vld [vmem:[#allocation8 + $0x1d0] sm:$0xff] }
  0x16   :  { %1791 = vmatmul.msk.f32.gmra.mxu0 %vm75_vm0, %v63_v2  ;;  %1858 = vmatpush.msra.mxu2 %v149_v10  ;;  %v2231_v24 = vld [vmem:[#allocation8 + $0x180] sm:$0xff]  ;;  %v2299_v48 = vld [vmem:[#allocation8 + $0x198] sm:$0xff]  ;;  %v2304_v49 = vld [vmem:[#allocation8 + $0x1b0] sm:$0xff] }
  0x17   :  { %469 = vmatpush.msrb.mxu1 %v2209_v12  ;;  %297 = vmatpush.msrb.mxu3 %v151_v22  ;;  %v2234_v25 = vld [vmem:[#allocation8 + $0x160] sm:$0xff]  ;;  %3344 = vst [vmem:[#allocation19_spill] sm:$0xff] %v2304_v49  ;;  %v2308_v51 = vld [vmem:[#allocation8 + $0x178] sm:$0xff]  ;;  %v2313_v52 = vld [vmem:[#allocation8 + $0x190] sm:$0xff] }
  0x18   :  { %338 = vmatpush.msrb.mxu0 %v152_v23  ;;  %v2237_v26 = vld [vmem:[#allocation8 + $0x140] sm:$0xff]  ;;  %v2319_v53 = vld [vmem:[#allocation8 + $0x158] sm:$0xff]  ;;  %v2324_v54 = vld [vmem:[#allocation8 + $0x170] sm:$0xff] }
  0x19   :  { %470 = vmatpush.msrb.mxu1 %v2225_v18  ;;  %v2240_v27 = vld [vmem:[#allocation8 + $0x120] sm:$0xff]  ;;  %509 = vmatpush.msra.mxu3 %v2289_v43  ;;  %v2326_v55 = vld [vmem:[#allocation8 + $0x138] sm:$0xff]  ;;  %v2331_v57 = vld [vmem:[#allocation8 + $0x150] sm:$0xff] }
  0x1a   :  { %v2243_v28 = vld [vmem:[#allocation8 + $0x100] sm:$0xff]  ;;  %668 = vmatpush.msra.mxu0 %v2289_v43  ;;  %v2334_v59 = vld [vmem:[#allocation8 + $0x118] sm:$0xff]  ;;  %v2346_v62 = vld [vmem:[#allocation8 + $0x130] sm:$0xff] }
  0x1b   :  { %471 = vmatpush.msrb.mxu1 %v2228_v21  ;;  %v2246_v29 = vld [vmem:[#allocation8 + $0xe0] sm:$0xff]  ;;  %510 = vmatpush.msra.mxu3 %v2296_v46  ;;  %v2341_v61 = vld [vmem:[#allocation8 + $0xf8] sm:$0xff]  ;;  %3345 = vst [vmem:[#allocation20_spill] sm:$0xff] %v2346_v62  ;;  %v162_v0 = vld [vmem:[#allocation5 + $0x68] sm:$0xff] }
  0x1c   :  { %v2249_v30 = vld [vmem:[#allocation8 + $0xc0] sm:$0xff]  ;;  %669 = vmatpush.msra.mxu0 %v2296_v46  ;;  %v2352_v63 = vld [vmem:[#allocation8 + $0xd8] sm:$0xff]  ;;  %v2357_v1 = vld [vmem:[#allocation8 + $0x110] sm:$0xff]  ;;  %253 = vmatpush.msrb.mxu2 %v162_v0 }
  0x1d   :  { %472 = vmatpush.msrb.mxu1 %v2231_v24  ;;  %v2252_v31 = vld [vmem:[#allocation8 + $0xa0] sm:$0xff]  ;;  %511 = vmatpush.msra.mxu3 %v2304_v49  ;;  %3346 = vst [vmem:[#allocation21_spill] sm:$0xff] %v2357_v1  ;;  %v2360_v2 = vld [vmem:[#allocation8 + $0xb8] sm:$0xff]  ;;  %v2363_v5 = vld [vmem:[#allocation8 + $0xf0] sm:$0xff] }
  0x1e   :  { %1792 = vmatmul.msk.f32.gmra.mxu0 %vm75_vm0, %v64_v3  ;;  %v2255_v32 = vld [vmem:[#allocation8 + $0x80] sm:$0xff]  ;;  %3347 = vst [vmem:[#allocation22_spill] sm:$0xff] %v2360_v2  ;;  %v158_v3 = vld [vmem:[#allocation5 + $0x48] sm:$0xff]  ;;  %v2368_v7 = vld [vmem:[#allocation8 + $0x98] sm:$0xff] }
  0x1f   :  { %473 = vmatpush.msrb.mxu1 %v2234_v25  ;;  %3339 = vst [vmem:[#allocation14_spill] sm:$0xff] %v2255_v32  ;;  %v2258_v33 = vld [vmem:[#allocation8 + $0x60] sm:$0xff]  ;;  %670 = vmatpush.msra.mxu0 %v2304_v49  ;;  %v2375_v9 = vld [vmem:[#allocation8 + $0x78] sm:$0xff]  ;;  %v2378_v10 = vld [vmem:[#allocation8 + $0xd0] sm:$0xff] }
  0x20   :  { %3340 = vst [vmem:[#allocation15_spill] sm:$0xff] %v2258_v33  ;;  %v2261_v34 = vld [vmem:[#allocation8 + $0x40] sm:$0xff]  ;;  %512 = vmatpush.msra.mxu3 %v2313_v52  ;;  %254 = vmatpush.msrb.mxu2 %v158_v3  ;;  %v2393_v16 = vld [vmem:[#allocation8 + $0x38] sm:$0xff]  ;;  %v2396_v19 = vld [vmem:[#allocation8 + $0x90] sm:$0xff] }
  0x21   :  { %474 = vmatpush.msrb.mxu1 %v2237_v26  ;;  %3341 = vst [vmem:[#allocation16_spill] sm:$0xff] %v2261_v34  ;;  %v2264_v35 = vld [vmem:[#allocation8 + $0x20] sm:$0xff]  ;;  %671 = vmatpush.msra.mxu0 %v2313_v52  ;;  %v2401_v22 = vld [vmem:[#allocation8 + $0x18] sm:$0xff]  ;;  %v2438_v3 = vld [vmem:[#allocation8 + $0x1e8] sm:$0xff] }
  0x22   :  { %3342 = vst [vmem:[#allocation17_spill] sm:$0xff] %v2264_v35  ;;  %v2270_v36 = vld [vmem:[%s3246_s2] ss:$0 sm:$0xff]  ;;  %513 = vmatpush.msra.mxu3 %v2324_v54 }
  0x23   :  { %475 = vmatpush.msrb.mxu1 %v2240_v27  ;;  %v2272_v37 = vld [vmem:[#allocation8] sm:$0xff]  ;;  %672 = vmatpush.msra.mxu0 %v2324_v54  ;;  %3348 = vst [vmem:[#allocation23_spill] sm:$0xff] %v2368_v7 }
  0x24   :  { %3343 = vst [vmem:[#allocation18_spill] sm:$0xff] %v2272_v37  ;;  %514 = vmatpush.msra.mxu3 %v2331_v57 }
  0x25   :  { %476 = vmatpush.msrb.mxu1 %v2243_v28  ;;  %673 = vmatpush.msra.mxu0 %v2331_v57  ;;  %3349 = vst [vmem:[#allocation24_spill] sm:$0xff] %v2375_v9 }
  0x26   :  { %1793 = vmatmul.msk.f32.gmra.mxu0 %vm75_vm0, %v65_v11  ;;  %515 = vmatpush.msra.mxu3 %v2346_v62  ;;  %v2385_v11 = vld [vmem:[#allocation8 + $0x58] sm:$0xff]  ;;  %3352 = vst [vmem:[#allocation27_spill] sm:$0xff] %v2393_v16 }
  0x27   :  { %477 = vmatpush.msrb.mxu1 %v2246_v29  ;;  %674 = vmatpush.msra.mxu0 %v2346_v62  ;;  %3350 = vst [vmem:[#allocation25_spill] sm:$0xff] %v2385_v11 }
  0x28   :  { %516 = vmatpush.msra.mxu3 %v2357_v1  ;;  %3353 = vst [vmem:[#allocation28_spill] sm:$0xff] %v2396_v19 }
  0x29   :  { %478 = vmatpush.msrb.mxu1 %v2249_v30  ;;  %675 = vmatpush.msra.mxu0 %v2357_v1  ;;  %3354 = vst [vmem:[#allocation29_spill] sm:$0xff] %v2401_v22 }
  0x2a   :  { %517 = vmatpush.msra.mxu3 %v2363_v5 }
  0x2b   :  { %479 = vmatpush.msrb.mxu1 %v2252_v31  ;;  %676 = vmatpush.msra.mxu0 %v2363_v5 }
  0x2c   :  { %518 = vmatpush.msra.mxu3 %v2378_v10 }
  0x2d   :  { %480 = vmatpush.msrb.mxu1 %v2255_v32  ;;  %677 = vmatpush.msra.mxu0 %v2378_v10 }
  0x2e   :  { %1794 = vmatmul.msk.f32.gmra.mxu0 %vm75_vm0, %v66_v13  ;;  %v154_v13 = vld [vmem:[#allocation5 + $0x28] sm:$0xff] }
  0x2f   :  { %481 = vmatpush.msrb.mxu1 %v2258_v33  ;;  %255 = vmatpush.msrb.mxu2 %v154_v13 }
  0x31   :  { %482 = vmatpush.msrb.mxu1 %v2261_v34 }
  0x33   :  { %483 = vmatpush.msrb.mxu1 %v2264_v35 }
  0x35   :  { %484 = vmatpush.msrb.mxu1 %v2272_v37 }
  0x36   :  { %1795 = vmatmul.msk.f32.gmra.mxu0 %vm75_vm0, %v67_v14  ;;  %v2390_v14 = vld [vmem:[#allocation8 + $0xb0] sm:$0xff] }
  0x37   :  { %3351 = vst [vmem:[#allocation26_spill] sm:$0xff] %v2390_v14  ;;  %519 = vmatpush.msra.mxu3 %v2390_v14  ;;  %678 = vmatpush.msra.mxu0 %v2390_v14 }
  0x39   :  { %520 = vmatpush.msra.mxu3 %v2396_v19  ;;  %679 = vmatpush.msra.mxu0 %v2396_v19 }
  0x3e   :  { %1796 = vmatmul.msk.f32.gmra.mxu0 %vm75_vm0, %v68_v15  ;;  %v150_v15 = vld [vmem:[#allocation5 + $0x8] sm:$0xff] }
  0x3f   :  { %256 = vmatpush.msrb.mxu2 %v150_v15  ;;  %v2449_v15 = vld [vmem:[#allocation8 + $0x1a8] sm:$0xff] }
  0x8b   :  { %v117_v38 = vpop.f32.mrf.mxu0 }
  0x8c   :  { %v118_v39 = vadd.f32 %v2270_v36, %v117_v38  ;;  %v2408_v38 = vld [vmem:[#allocation8 + $0x70] sm:$0xff] }
  0x8d   :  { %3355 = vst [vmem:[#allocation30_spill] sm:$0xff] %v2408_v38  ;;  %521 = vmatpush.msra.mxu3 %v2408_v38  ;;  %680 = vmatpush.msra.mxu0 %v2408_v38 }
  0x8e   :  { %v2276_v40 = vmax.f32 %v118_v39, 0.0  ;;  %v2416_v39 = vld [vmem:[#allocation8 + $0x50] sm:$0xff] }
  0x8f   :  { %3356 = vst [vmem:[#allocation31_spill] sm:$0xff] %v2416_v39  ;;  %522 = vmatpush.msra.mxu3 %v2416_v39  ;;  %681 = vmatpush.msra.mxu0 %v2416_v39 }
  0x90   :  { %1798 = vmatmul.msk.f32.vlgmr.msra.gmra.mxu1 %vm175_vm1, %v2276_v40  ;;  %1814 = vmatmul.msk.f32.vlgmr.msrb.gmra.mxu3 %vm175_vm1, %v2276_v40 }
  0x91   :  { %1822 = vmatmul.msk.f32.vlgmr.msrb.gmra.mxu0 %vm175_vm1, %v2276_v40  ;;  %529 = vmatpush.msra.mxu1 %v2278_v41 }
  0x93   :  { %v120_v45 = vpop.f32.mrf.mxu0  ;;  %530 = vmatpush.msra.mxu1 %v2284_v42 }
  0x94   :  { %v121_v47 = vadd.f32 %v2270_v36, %v120_v45  ;;  %v2421_v45 = vld [vmem:[#allocation8 + $0x30] sm:$0xff] }
  0x95   :  { %531 = vmatpush.msra.mxu1 %v2291_v44  ;;  %3357 = vst [vmem:[#allocation32_spill] sm:$0xff] %v2421_v45  ;;  %523 = vmatpush.msra.mxu3 %v2421_v45 }
  0x96   :  { %v2306_v50 = vmax.f32 %v121_v47, 0.0  ;;  %682 = vmatpush.msra.mxu0 %v2421_v45 }
  0x97   :  { %532 = vmatpush.msra.mxu1 %v2299_v48 }
  0x98   :  { %1799 = vmatmul.msk.f32.gmra.mxu1 %vm175_vm1, %v2306_v50  ;;  %1815 = vmatmul.msk.f32.gmra.mxu3 %vm175_vm1, %v2306_v50 }
  0x99   :  { %1823 = vmatmul.msk.f32.gmra.mxu0 %vm175_vm1, %v2306_v50  ;;  %533 = vmatpush.msra.mxu1 %v2308_v51 }
  0x9b   :  { %v123_v56 = vpop.f32.mrf.mxu0  ;;  %534 = vmatpush.msra.mxu1 %v2319_v53 }
  0x9c   :  { %v124_v58 = vadd.f32 %v2270_v36, %v123_v56 }
  0x9d   :  { %535 = vmatpush.msra.mxu1 %v2326_v55 }
  0x9e   :  { %v2339_v60 = vmax.f32 %v124_v58, 0.0  ;;  %v2426_v58 = vld [vmem:[#allocation8 + $0x10] sm:$0xff] }
  0x9f   :  { %536 = vmatpush.msra.mxu1 %v2334_v59  ;;  %3358 = vst [vmem:[#allocation33_spill] sm:$0xff] %v2426_v58  ;;  %524 = vmatpush.msra.mxu3 %v2426_v58 }
  0xa0   :  { %1800 = vmatmul.msk.f32.gmra.mxu1 %vm175_vm1, %v2339_v60  ;;  %1816 = vmatmul.msk.f32.gmra.mxu3 %vm175_vm1, %v2339_v60 }
  0xa1   :  { %1824 = vmatmul.msk.f32.gmra.mxu0 %vm175_vm1, %v2339_v60  ;;  %537 = vmatpush.msra.mxu1 %v2341_v61 }
  0xa2   :  { %648 = vmatpush.msrb.mxu3 %v2438_v3  ;;  %683 = vmatpush.msra.mxu0 %v2426_v58 }
  0xa3   :  { %v126_v4 = vpop.f32.mrf.mxu0  ;;  %538 = vmatpush.msra.mxu1 %v2352_v63 }
  0xa4   :  { %v127_v6 = vadd.f32 %v2270_v36, %v126_v4  ;;  %v2443_v4 = vld [vmem:[#allocation8 + $0x1c8] sm:$0xff]  ;;  %828 = vmatpush.msrb.mxu0 %v2289_v43 }
  0xa5   :  { %539 = vmatpush.msra.mxu1 %v2360_v2  ;;  %649 = vmatpush.msrb.mxu3 %v2443_v4 }
  0xa6   :  { %v2372_v8 = vmax.f32 %v127_v6, 0.0  ;;  %829 = vmatpush.msrb.mxu0 %v2296_v46 }
  0xa7   :  { %540 = vmatpush.msra.mxu1 %v2368_v7  ;;  %650 = vmatpush.msrb.mxu3 %v2449_v15 }
  0xa8   :  { %1801 = vmatmul.msk.f32.gmra.mxu1 %vm175_vm1, %v2372_v8  ;;  %1817 = vmatmul.msk.f32.gmra.mxu3 %vm175_vm1, %v2372_v8 }
  0xa9   :  { %1825 = vmatmul.msk.f32.gmra.mxu0 %vm175_vm1, %v2372_v8  ;;  %541 = vmatpush.msra.mxu1 %v2375_v9 }
  0xaa   :  { %830 = vmatpush.msrb.mxu0 %v2304_v49 }
  0xab   :  { %v129_v17 = vpop.f32.mrf.mxu0  ;;  %542 = vmatpush.msra.mxu1 %v2385_v11 }
  0xac   :  { %v130_v20 = vadd.f32 %v2270_v36, %v129_v17  ;;  %v138_v17 = vpop.f32.mrf.mxu3  ;;  %831 = vmatpush.msrb.mxu0 %v2313_v52 }
  0xad   :  { %543 = vmatpush.msra.mxu1 %v2393_v16 }
  0xae   :  { %v2405_v23 = vmax.f32 %v130_v20, 0.0  ;;  %832 = vmatpush.msrb.mxu0 %v2324_v54 }
  0xaf   :  { %544 = vmatpush.msra.mxu1 %v2401_v22 }
  0xb0   :  { %1802 = vmatmul.msk.f32.gmra.mxu1 %vm175_vm1, %v2405_v23  ;;  %1818 = vmatmul.msk.f32.gmra.mxu3 %vm175_vm1, %v2405_v23 }
  0xb1   :  { %1826 = vmatmul.msk.f32.gmra.mxu0 %vm175_vm1, %v2405_v23 }
  0xb2   :  { %833 = vmatpush.msrb.mxu0 %v2331_v57 }
  0xb3   :  { %v132_v47 = vpop.f32.mrf.mxu0 }
  0xb4   :  { %v133_v56 = vadd.f32 %v2270_v36, %v132_v47  ;;  %v2455_v47 = vld [vmem:[#allocation8 + $0x188] sm:$0xff]  ;;  %834 = vmatpush.msrb.mxu0 %v2346_v62 }
  0xb5   :  { %651 = vmatpush.msrb.mxu3 %v2455_v47  ;;  %v2510_v62 = vld [vmem:[#allocation8 + $0xe8] sm:$0xff] }
  0xb6   :  { %v2430_v0 = vmax.f32 %v133_v56, 0.0  ;;  %v139_v56 = vadd.f32 %v2270_v36, %v138_v17  ;;  %v2492_v17 = vld [vmem:[#allocation8 + $0x128] sm:$0xff]  ;;  %835 = vmatpush.msrb.mxu0 %v2357_v1 }
  0xb7   :  { %v2516_v1 = vld [vmem:[#allocation8 + $0xc8] sm:$0xff] }
  0xb8   :  { %1803 = vmatmul.msk.f32.gmra.mxu1 %vm175_vm1, %v2430_v0  ;;  %1819 = vmatmul.msk.f32.gmra.mxu3 %vm175_vm1, %v2430_v0  ;;  %v2473_v49 = vmax.f32 %v139_v56, 0.0  ;;  %v2498_v56 = vld [vmem:[#allocation8 + $0x108] sm:$0xff] }
  0xb9   :  { %1827 = vmatmul.msk.f32.gmra.mxu0 %vm175_vm1, %v2430_v0 }
  0xba   :  { %836 = vmatpush.msrb.mxu0 %v2363_v5 }
  0xbb   :  { %v135_v6 = vpop.f32.mrf.mxu0 }
  0xbc   :  { %v136_v13 = vadd.f32 %v2270_v36, %v135_v6  ;;  %v3254_v6 = vmov 0.0   ;;  %v2476_v36 = vld [vmem:[#allocation8 + $0x148] sm:$0xff]  ;;  %837 = vmatpush.msrb.mxu0 %v2378_v10 }
  0xbe   :  { %v2453_v20 = vmax.f32 %v136_v13, 0.0  ;;  %v2468_v13 = vld [vmem:[#allocation8 + $0x168] sm:$0xff]  ;;  %838 = vmatpush.msrb.mxu0 %v2390_v14 }
  0xbf   :  { %652 = vmatpush.msrb.mxu3 %v2468_v13 }
  0xc0   :  { %1804 = vmatmul.msk.f32.vlgmr.msra.gmra.mxu2 %vm175_vm1, %v2453_v20  ;;  %1820 = vmatmul.msk.f32.gmra.mxu3 %vm175_vm1, %v2453_v20 }
  0xc1   :  { %1828 = vmatmul.msk.f32.gmra.mxu0 %vm175_vm1, %v2453_v20  ;;  %485 = vmatmul.f32.vlgmr.msrb.gmra.mxu1 %v3254_v6 }
  0xc2   :  { %489 = vmatpush.msra.mxu2 %v2438_v3  ;;  %688 = vmatpush.msrb.mxu1 %v2278_v41 }
  0xc3   :  { %653 = vmatpush.msrb.mxu3 %v2476_v36  ;;  %839 = vmatpush.msrb.mxu0 %v2396_v19 }
  0xc4   :  { %490 = vmatpush.msra.mxu2 %v2443_v4  ;;  %689 = vmatpush.msrb.mxu1 %v2284_v42 }
  0xc5   :  { %654 = vmatpush.msrb.mxu3 %v2492_v17  ;;  %840 = vmatpush.msrb.mxu0 %v2408_v38  ;;  %v2547_v38 = vld [vmem:[#allocation8 + $0x48] sm:$0xff] }
  0xc6   :  { %491 = vmatpush.msra.mxu2 %v2449_v15  ;;  %690 = vmatpush.msrb.mxu1 %v2291_v44  ;;  %3362 = vst [vmem:[#allocation37_spill] sm:$0xff] %v2547_v38 }
  0xc7   :  { %655 = vmatpush.msrb.mxu3 %v2498_v56  ;;  %841 = vmatpush.msrb.mxu0 %v2416_v39 }
  0xc8   :  { %1805 = vmatmul.msk.f32.gmra.mxu2 %vm175_vm1, %v2473_v49  ;;  %1821 = vmatmul.msk.f32.gmra.mxu3 %vm175_vm1, %v2473_v49 }
  0xc9   :  { %1829 = vmatmul.msk.f32.gmra.mxu0 %vm175_vm1, %v2473_v49  ;;  %545 = vmatmul.f32.vlgmr.msra.gmra.mxu1 %v3254_v6 }
  0xca   :  { %492 = vmatpush.msra.mxu2 %v2455_v47  ;;  %691 = vmatpush.msrb.mxu1 %v2299_v48 }
  0xcb   :  { %656 = vmatpush.msrb.mxu3 %v2510_v62  ;;  %842 = vmatpush.msrb.mxu0 %v2421_v45 }
  0xcc   :  { %493 = vmatpush.msra.mxu2 %v2468_v13  ;;  %692 = vmatpush.msrb.mxu1 %v2308_v51 }
  0xcd   :  { %657 = vmatpush.msrb.mxu3 %v2516_v1  ;;  %843 = vmatpush.msrb.mxu0 %v2426_v58  ;;  %v2562_v58 = vld [vmem:[#allocation8 + $0x8] sm:$0xff] }
  0xce   :  { %494 = vmatpush.msra.mxu2 %v2476_v36  ;;  %693 = vmatpush.msrb.mxu1 %v2319_v53  ;;  %3364 = vst [vmem:[#allocation39_spill] sm:$0xff] %v2562_v58 }
  0xd0   :  { %1806 = vmatmul.msk.f32.vlgmr.msrb.gmra.mxu2 %vm175_vm1, %v2276_v40  ;;  %525 = vmatmul.f32.vlgmr.msra.gmra.mxu3 %v3254_v6  ;;  %v2528_v40 = vld [vmem:[#allocation8 + $0xa8] sm:$0xff] }
  0xd1   :  { %495 = vmatpush.msra.mxu2 %v2492_v17  ;;  %694 = vmatpush.msrb.mxu1 %v2326_v55  ;;  %3359 = vst [vmem:[#allocation34_spill] sm:$0xff] %v2528_v40  ;;  %v2530_v6 = vld [vmem:[#allocation8 + $0x88] sm:$0xff] }
  0xd2   :  { %3360 = vst [vmem:[#allocation35_spill] sm:$0xff] %v2530_v6  ;;  %658 = vmatpush.msrb.mxu3 %v2528_v40 }
  0xd3   :  { %496 = vmatpush.msra.mxu2 %v2498_v56  ;;  %695 = vmatpush.msrb.mxu1 %v2334_v59 }
  0xd4   :  { %659 = vmatpush.msrb.mxu3 %v2530_v6 }
  0xd5   :  { %497 = vmatpush.msra.mxu2 %v2510_v62  ;;  %696 = vmatpush.msrb.mxu1 %v2341_v61 }
  0xd7   :  { %498 = vmatpush.msra.mxu2 %v2516_v1  ;;  %697 = vmatpush.msrb.mxu1 %v2352_v63 }
  0xd8   :  { %1807 = vmatmul.msk.f32.gmra.mxu2 %vm175_vm1, %v2306_v50  ;;  %v2545_v50 = vld [vmem:[#allocation8 + $0x68] sm:$0xff] }
  0xd9   :  { %499 = vmatpush.msra.mxu2 %v2528_v40  ;;  %698 = vmatpush.msrb.mxu1 %v2360_v2  ;;  %3361 = vst [vmem:[#allocation36_spill] sm:$0xff] %v2545_v50 }
  0xda   :  { %660 = vmatpush.msrb.mxu3 %v2545_v50 }
  0xdb   :  { %500 = vmatpush.msra.mxu2 %v2530_v6  ;;  %699 = vmatpush.msrb.mxu1 %v2368_v7 }
  0xdc   :  { %661 = vmatpush.msrb.mxu3 %v2547_v38 }
  0xdd   :  { %700 = vmatpush.msrb.mxu1 %v2375_v9  ;;  %501 = vmatpush.msra.mxu2 %v2545_v50 }
  0xdf   :  { %701 = vmatpush.msrb.mxu1 %v2385_v11  ;;  %502 = vmatpush.msra.mxu2 %v2547_v38 }
  0xe0   :  { %1808 = vmatmul.msk.f32.gmra.mxu2 %vm175_vm1, %v2339_v60  ;;  %v2560_v60 = vld [vmem:[#allocation8 + $0x28] sm:$0xff] }
  0xe1   :  { %702 = vmatpush.msrb.mxu1 %v2393_v16  ;;  %3363 = vst [vmem:[#allocation38_spill] sm:$0xff] %v2560_v60  ;;  %503 = vmatpush.msra.mxu2 %v2560_v60 }
  0xe2   :  { %662 = vmatpush.msrb.mxu3 %v2560_v60 }
  0xe3   :  { %703 = vmatpush.msrb.mxu1 %v2401_v22  ;;  %504 = vmatpush.msra.mxu2 %v2562_v58 }
  0xe4   :  { %663 = vmatpush.msrb.mxu3 %v2562_v58 }
  0xe5   :  { %848 = vmatpush.msra.mxu1 %v2278_v41  ;;  %628 = vmatpush.msrb.mxu2 %v2209_v12 }
  0xe6   :  { %808 = vmatpush.msra.mxu3 %v2438_v3 }
  0xe7   :  { %849 = vmatpush.msra.mxu1 %v2284_v42  ;;  %629 = vmatpush.msrb.mxu2 %v2225_v18 }
  0xe8   :  { %1809 = vmatmul.msk.f32.gmra.mxu2 %vm175_vm1, %v2372_v8  ;;  %809 = vmatpush.msra.mxu3 %v2443_v4 }
  0xe9   :  { %850 = vmatpush.msra.mxu1 %v2291_v44  ;;  %630 = vmatpush.msrb.mxu2 %v2228_v21 }
  0xea   :  { %810 = vmatpush.msra.mxu3 %v2449_v15 }
  0xeb   :  { %851 = vmatpush.msra.mxu1 %v2299_v48  ;;  %631 = vmatpush.msrb.mxu2 %v2231_v24 }
  0xec   :  { %811 = vmatpush.msra.mxu3 %v2455_v47 }
  0xed   :  { %852 = vmatpush.msra.mxu1 %v2308_v51  ;;  %632 = vmatpush.msrb.mxu2 %v2234_v25 }
  0xee   :  { %812 = vmatpush.msra.mxu3 %v2468_v13 }
  0xef   :  { %853 = vmatpush.msra.mxu1 %v2319_v53  ;;  %633 = vmatpush.msrb.mxu2 %v2237_v26 }
  0xf0   :  { %1810 = vmatmul.msk.f32.gmra.mxu2 %vm175_vm1, %v2405_v23  ;;  %813 = vmatpush.msra.mxu3 %v2476_v36 }
  0xf1   :  { %854 = vmatpush.msra.mxu1 %v2326_v55  ;;  %634 = vmatpush.msrb.mxu2 %v2240_v27 }
  0xf2   :  { %814 = vmatpush.msra.mxu3 %v2492_v17 }
  0xf3   :  { %855 = vmatpush.msra.mxu1 %v2334_v59  ;;  %635 = vmatpush.msrb.mxu2 %v2243_v28 }
  0xf4   :  { %815 = vmatpush.msra.mxu3 %v2498_v56 }
  0xf5   :  { %856 = vmatpush.msra.mxu1 %v2341_v61  ;;  %636 = vmatpush.msrb.mxu2 %v2246_v29 }
  0xf6   :  { %816 = vmatpush.msra.mxu3 %v2510_v62 }
  0xf7   :  { %857 = vmatpush.msra.mxu1 %v2352_v63  ;;  %637 = vmatpush.msrb.mxu2 %v2249_v30 }
  0xf8   :  { %1811 = vmatmul.msk.f32.gmra.mxu2 %vm175_vm1, %v2430_v0  ;;  %817 = vmatpush.msra.mxu3 %v2516_v1  ;;  %v3365_v0 = vmov 0.0  }
  0xf9   :  { %858 = vmatpush.msra.mxu1 %v2360_v2  ;;  %638 = vmatpush.msrb.mxu2 %v2252_v31 }
  0xfa   :  { %818 = vmatpush.msra.mxu3 %v2528_v40 }
  0xfb   :  { %859 = vmatpush.msra.mxu1 %v2368_v7  ;;  %639 = vmatpush.msrb.mxu2 %v2255_v32 }
  0xfc   :  { %819 = vmatpush.msra.mxu3 %v2530_v6 }
  0xfd   :  { %860 = vmatpush.msra.mxu1 %v2375_v9  ;;  %640 = vmatpush.msrb.mxu2 %v2258_v33 }
  0xfe   :  { %820 = vmatpush.msra.mxu3 %v2545_v50 }
  0xff   :  { %861 = vmatpush.msra.mxu1 %v2385_v11  ;;  %641 = vmatpush.msrb.mxu2 %v2261_v34 }
 0x100   :  { %1812 = vmatmul.msk.f32.gmra.mxu2 %vm175_vm1, %v2453_v20  ;;  %821 = vmatpush.msra.mxu3 %v2547_v38  ;;  %v165_v20 = vld [vmem:[%s3249_s5] sm:$0xf]  ;;  %s2143_s5 = smov [#allocation10]  }
 0x101   :  { %862 = vmatpush.msra.mxu1 %v2393_v16  ;;  %642 = vmatpush.msrb.mxu2 %v2264_v35  ;;  %v2647_v11 = vperm.slane %v165_v20, 2  ;;  %s1767_s26 = sshll.u32 %s2143_s5, 4  ;;  %s1768_s26 = int_to_ptr.vmem [resolvable:$true] %s1767_s26 }
 0x102   :  { %822 = vmatpush.msra.mxu3 %v2560_v60 }
 0x103   :  { %863 = vmatpush.msra.mxu1 %v2401_v22  ;;  %643 = vmatpush.msrb.mxu2 %v2272_v37  ;;  %v2634_v22 = vperm.slane %v165_v20, 0 }
 0x104   :  { %823 = vmatpush.msra.mxu3 %v2562_v58  ;;  %v2636_v58 = vperm.slane %v165_v20, 3 }
 0x106   :  { %3366 = vst [vmem:[#allocation40_spill] sm:$0xff] %v2636_v58 }
 0x108   :  { %1813 = vmatmul.msk.f32.gmra.mxu2 %vm175_vm1, %v2473_v49 }
 0x10d   :  { %v2622_v8 = vpop.f32.mrf.mxu1 }
 0x10e   :  { %v2624_v23 = vpop.f32.mrf.mxu0 }
 0x110   :  { %505 = vmatmul.f32.vlgmr.msra.gmra.mxu2 %v3365_v0 }
 0x111   :  { %788 = vmatpush.msra.mxu2 %v2209_v12 }
 0x113   :  { %v2631_v49 = vpop.f32.mrf.mxu3  ;;  %789 = vmatpush.msra.mxu2 %v2225_v18 }
 0x115   :  { %v220_v16 = vpop.f32.mrf.mxu1  ;;  %790 = vmatpush.msra.mxu2 %v2228_v21 }
 0x116   :  { %v2640_v45 = vadd.f32 %v220_v16, %v2634_v22  ;;  %v343_v0 = vpop.f32.mrf.mxu0 }
 0x117   :  { %v2643_v60 = vadd.f32 %v343_v0, %v2636_v58  ;;  %791 = vmatpush.msra.mxu2 %v2231_v24 }
 0x118   :  { %3367 = vst [vmem:[#allocation41_spill] sm:$0xff] %v2640_v45 }
 0x119   :  { %3368 = vst [vmem:[#allocation42_spill] sm:$0xff] %v2643_v60  ;;  %792 = vmatpush.msra.mxu2 %v2234_v25 }
 0x11b   :  { %v302_v39 = vpop.f32.mrf.mxu3  ;;  %793 = vmatpush.msra.mxu2 %v2237_v26 }
 0x11c   :  { %v2651_v38 = vadd.f32 %v302_v39, %v2647_v11 }
 0x11d   :  { %v223_v9 = vpop.f32.mrf.mxu1  ;;  %794 = vmatpush.msra.mxu2 %v2240_v27 }
 0x11e   :  { %3369 = vst [vmem:[#allocation43_spill] sm:$0xff] %v2651_v38  ;;  %v2655_v16 = vadd.f32 %v223_v9, %v2634_v22  ;;  %v346_v0 = vpop.f32.mrf.mxu0 }
 0x11f   :  { %v2658_v60 = vadd.f32 %v346_v0, %v2636_v58  ;;  %795 = vmatpush.msra.mxu2 %v2243_v28 }
 0x120   :  { %3370 = vst [vmem:[#allocation44_spill] sm:$0xff] %v2655_v16 }
 0x121   :  { %3371 = vst [vmem:[#allocation45_spill] sm:$0xff] %v2658_v60  ;;  %796 = vmatpush.msra.mxu2 %v2246_v29 }
 0x123   :  { %v305_v45 = vpop.f32.mrf.mxu3  ;;  %797 = vmatpush.msra.mxu2 %v2249_v30 }
 0x124   :  { %v2664_v39 = vadd.f32 %v305_v45, %v2647_v11 }
 0x125   :  { %v226_v38 = vpop.f32.mrf.mxu1  ;;  %798 = vmatpush.msra.mxu2 %v2252_v31 }
 0x126   :  { %3372 = vst [vmem:[#allocation46_spill] sm:$0xff] %v2664_v39  ;;  %v2668_v9 = vadd.f32 %v226_v38, %v2634_v22  ;;  %v349_v16 = vpop.f32.mrf.mxu0 }
 0x127   :  { %v2671_v0 = vadd.f32 %v349_v16, %v2636_v58  ;;  %799 = vmatpush.msra.mxu2 %v2255_v32 }
 0x128   :  { %3373 = vst [vmem:[#allocation47_spill] sm:$0xff] %v2668_v9 }
 0x129   :  { %3374 = vst [vmem:[#allocation48_spill] sm:$0xff] %v2671_v0  ;;  %800 = vmatpush.msra.mxu2 %v2258_v33 }
 0x12b   :  { %v308_v60 = vpop.f32.mrf.mxu3  ;;  %801 = vmatpush.msra.mxu2 %v2261_v34 }
 0x12c   :  { %v2677_v45 = vadd.f32 %v308_v60, %v2647_v11 }
 0x12d   :  { %v229_v39 = vpop.f32.mrf.mxu1  ;;  %802 = vmatpush.msra.mxu2 %v2264_v35 }
 0x12e   :  { %3375 = vst [vmem:[#allocation49_spill] sm:$0xff] %v2677_v45  ;;  %v2681_v38 = vadd.f32 %v229_v39, %v2634_v22  ;;  %v352_v9 = vpop.f32.mrf.mxu0 }
 0x12f   :  { %v2684_v16 = vadd.f32 %v352_v9, %v2636_v58  ;;  %803 = vmatpush.msra.mxu2 %v2272_v37 }
 0x130   :  { %3376 = vst [vmem:[#allocation50_spill] sm:$0xff] %v2681_v38 }
 0x131   :  { %3377 = vst [vmem:[#allocation51_spill] sm:$0xff] %v2684_v16 }
 0x133   :  { %v311_v0 = vpop.f32.mrf.mxu3 }
 0x134   :  { %v2688_v50 = vadd.f32 %v311_v0, %v2647_v11 }
 0x135   :  { %v232_v34 = vpop.f32.mrf.mxu1 }
 0x136   :  { %3378 = vst [vmem:[#allocation52_spill] sm:$0xff] %v2688_v50  ;;  %v2691_v60 = vadd.f32 %v232_v34, %v2634_v22  ;;  %v355_v45 = vpop.f32.mrf.mxu0 }
 0x137   :  { %v2694_v35 = vadd.f32 %v355_v45, %v2636_v58 }
 0x138   :  { %3379 = vst [vmem:[#allocation53_spill] sm:$0xff] %v2691_v60 }
 0x139   :  { %3380 = vst [vmem:[#allocation54_spill] sm:$0xff] %v2694_v35 }
 0x13b   :  { %v314_v39 = vpop.f32.mrf.mxu3 }
 0x13c   :  { %v2697_v38 = vadd.f32 %v314_v39, %v2647_v11 }
 0x13e   :  { %3381 = vst [vmem:[#allocation55_spill] sm:$0xff] %v2697_v38  ;;  %v358_v9 = vpop.f32.mrf.mxu0  ;;  %v168_v38 = vperm.slane %v165_v20, 1  ;;  %v486_v6 = vpop.f32.mrf.mxu1 }
 0x13f   :  { %v2700_v16 = vadd.f32 %v358_v9, %v2636_v58 }
 0x141   :  { %3382 = vst [vmem:[#allocation56_spill] sm:$0xff] %v2700_v16 }
 0x143   :  { %v235_v37 = vpop.f32.mrf.mxu2  ;;  %v317_v33 = vpop.f32.mrf.mxu3 }
 0x144   :  { %v2703_v0 = vadd.f32 %v235_v37, %v2634_v22  ;;  %v2706_v34 = vadd.f32 %v317_v33, %v2647_v11 }
 0x146   :  { %3383 = vst [vmem:[#allocation57_spill] sm:$0xff] %v2703_v0 }
 0x147   :  { %3384 = vst [vmem:[#allocation58_spill] sm:$0xff] %v2706_v34 }
 0x14b   :  { %v238_v60 = vpop.f32.mrf.mxu2  ;;  %v320_v50 = vpop.f32.mrf.mxu3 }
 0x14c   :  { %v2709_v45 = vadd.f32 %v238_v60, %v2634_v22  ;;  %v2712_v39 = vadd.f32 %v320_v50, %v2647_v11  ;;  %v218_v60 = vadd.f32 %v2622_v8, %v2634_v22 }
 0x14e   :  { %3385 = vst [vmem:[#allocation59_spill] sm:$0xff] %v2709_v45  ;;  %v549_v20 = vadd.f32 %v486_v6, %v218_v60 }
 0x14f   :  { %3386 = vst [vmem:[#allocation60_spill] sm:$0xff] %v2712_v39 }
 0x150   :  { %v1830_v39 = vmul.f32 -1.442695, %v549_v20 }
 0x152   :  { %1868 = vpow2.f32 %v1830_v39 }
 0x153   :  { %v258_v35 = vpop.f32.mrf.mxu2 }
 0x154   :  { %v259_v8 = vadd.f32 %v258_v35, %v168_v38 }
 0x15b   :  { %v261_v9 = vpop.f32.mrf.mxu2 }
 0x15c   :  { %v2714_v16 = vadd.f32 %v261_v9, %v168_v38 }
 0x15e   :  { %3387 = vst [vmem:[#allocation61_spill] sm:$0xff] %v2714_v16 }
 0x163   :  { %v264_v7 = vpop.f32.mrf.mxu2 }
 0x164   :  { %v2716_v19 = vadd.f32 %v264_v7, %v168_v38  ;;  %v526_v7 = vpop.f32.mrf.mxu3 }
 0x166   :  { %3388 = vst [vmem:[#allocation62_spill] sm:$0xff] %v2716_v19 }
 0x16b   :  { %v267_v37 = vpop.f32.mrf.mxu2 }
 0x16c   :  { %v2718_v0 = vadd.f32 %v267_v37, %v168_v38  ;;  %v300_v37 = vadd.f32 %v2631_v49, %v2647_v11 }
 0x16e   :  { %3389 = vst [vmem:[#allocation63_spill] sm:$0xff] %v2718_v0  ;;  %v1869_v0 = vpop.eup %1868 }
 0x16f   :  { %v562_v32 = vadd.f32 1.0, %v1869_v0  ;;  %v341_v0 = vadd.f32 %v2624_v23, %v2636_v58 }
 0x171   :  { %1870 = vrcp.f32 %v562_v32  ;;  %vm570_vm3 = vweird.f32 %v562_v32 }
 0x173   :  { %v270_v33 = vpop.f32.mrf.mxu2 }
 0x174   :  { %v2720_v34 = vadd.f32 %v270_v33, %v168_v38  ;;  %v551_v33 = vadd.f32 %v526_v7, %v300_v37 }
 0x176   :  { %3390 = vst [vmem:[#allocation64_spill] sm:$0xff] %v2720_v34  ;;  %v1832_v22 = vmul.f32 -1.442695, %v551_v33 }
 0x177   :  { %v1871_v20 = vpop.eup %1870 }
 0x178   :  { %1872 = vpow2.f32 %v1832_v22  ;;  %vm571_vm2 = vweird.f32 %v1871_v20 }
 0x179   :  { %vm572_vm4 = vmor %vm570_vm3, %vm571_vm2 }
 0x17b   :  { %v273_v50 = vpop.f32.mrf.mxu2 }
 0x17c   :  { %v2724_v45 = vadd.f32 %v273_v50, %v168_v38 }
 0x17e   :  { %3391 = vst [vmem:[#allocation65_spill] sm:$0xff] %v2724_v45  ;;  %v1873_v39 = vpop.eup %1872 }
 0x183   :  { %v276_v9 = vpop.f32.mrf.mxu2 }
 0x184   :  { %v2726_v16 = vadd.f32 %v276_v9, %v168_v38  ;;  %v566_v9 = vmul.f32 %v1871_v20, %v562_v32 }
 0x186   :  { %3392 = vst [vmem:[#allocation66_spill] sm:$0xff] %v2726_v16  ;;  %v564_v16 = vadd.f32 1.0, %v1873_v39  ;;  %v567_v49 = vsub.f32 1.0, %v566_v9 }
 0x188   :  { %v568_v7 = vmul.f32 %v1871_v20, %v567_v49  ;;  %vm600_vm11 = vweird.f32 %v564_v16 }
 0x18a   :  { %v569_v33 = vadd.f32 %v1871_v20, %v568_v7 }
 0x18b   :  { %v279_v34 = vpop.f32.mrf.mxu2 }
 0x18c   :  { %v2730_v19 = vadd.f32 %v279_v34, %v168_v38  ;;  %v546_v34 = vpop.f32.mrf.mxu1  ;;  %v573_v39 = vsel %vm572_vm4, %v1871_v20, %v569_v33  ;;  %v606_v33 = vand.u32 2147483648, %v564_v16 }
 0x18d   :  { %v552_v37 = vadd.f32 %v546_v34, %v341_v0 }
 0x18e   :  { %3393 = vst [vmem:[#allocation67_spill] sm:$0xff] %v2730_v19 }
 0x193   :  { %v506_v6 = vpop.f32.mrf.mxu2 }
 0x194   :  { %v550_v60 = vadd.f32 %v506_v6, %v259_v8  ;;  %v576_v8 = vand.u32 2147483648, %v562_v32 }
 0x196   :  { %v1831_v50 = vmul.f32 -1.442695, %v550_v60  ;;  %v574_v60 = vand.u32 2147483647, %v562_v32  ;;  %v577_v19 = vor.u32 1.1754944e-38, %v576_v8 }
 0x197   :  { %v604_v8 = vand.u32 2147483647, %v564_v16 }
 0x198   :  { %1874 = vpow2.f32 %v1831_v50  ;;  %vm575_vm6 = vcmp.eq.f32.partialorder %v574_v60, 8.507059e+37 }
 0x199   :  { %1876 = vrcp.f32 %v564_v16  ;;  %v578_v34 = vsel %vm575_vm6, %v577_v19, %v573_v39  ;;  %vm605_vm13 = vcmp.eq.f32.partialorder %v604_v8, 8.507059e+37 }
 0x19e   :  { %v1875_v45 = vpop.eup %1874 }
 0x19f   :  { %v563_v11 = vadd.f32 1.0, %v1875_v45  ;;  %v1877_v35 = vpop.eup %1876 }
 0x1a0   :  { %v596_v6 = vmul.f32 %v1877_v35, %v564_v16  ;;  %vm601_vm10 = vweird.f32 %v1877_v35 }
 0x1a1   :  { %1878 = vrcp.f32 %v563_v11  ;;  %v591_v45 = vand.u32 2147483648, %v563_v11  ;;  %v589_v49 = vand.u32 2147483647, %v563_v11  ;;  %vm585_vm7 = vweird.f32 %v563_v11  ;;  %vm602_vm12 = vmor %vm600_vm11, %vm601_vm10 }
 0x1a2   :  { %1880 = vtanh.f32 %v552_v37  ;;  %v597_v23 = vsub.f32 1.0, %v596_v6 }
 0x1a3   :  { %v592_v7 = vor.u32 1.1754944e-38, %v591_v45  ;;  %vm590_vm9 = vcmp.eq.f32.partialorder %v589_v49, 8.507059e+37  ;;  %v3422_v45 = vld [vmem:[#allocation41_spill] sm:$0xff] }
 0x1a4   :  { %v598_v32 = vmul.f32 %v1877_v35, %v597_v23 }
 0x1a6   :  { %v599_v20 = vadd.f32 %v1877_v35, %v598_v32 }
 0x1a7   :  { %v1879_v38 = vpop.eup %1878 }
 0x1a8   :  { %v581_v22 = vmul.f32 %v1879_v38, %v563_v11  ;;  %vm586_vm5 = vweird.f32 %v1879_v38  ;;  %v1881_v2 = vpop.eup %1880  ;;  %v603_v19 = vsel %vm602_vm12, %v1877_v35, %v599_v20  ;;  %v607_v11 = vor.u32 1.1754944e-38, %v606_v33 }
 0x1a9   :  { %vm587_vm8 = vmor %vm585_vm7, %vm586_vm5  ;;  %v612_v14 = vmul.f32 %v1881_v2, %v578_v34  ;;  %v3394_v2 = vld [vmem:[#allocation19_spill] sm:$0xff] }
 0x1aa   :  { %v582_v50 = vsub.f32 1.0, %v581_v22 }
 0x1ac   :  { %v583_v9 = vmul.f32 %v1879_v38, %v582_v50 }
 0x1ae   :  { %v584_v58 = vadd.f32 %v1879_v38, %v583_v9  ;;  %v3423_v9 = vld [vmem:[#allocation61_spill] sm:$0xff] }
 0x1b0   :  { %v588_v0 = vsel %vm587_vm8, %v1879_v38, %v584_v58  ;;  %v608_v38 = vsel %vm605_vm13, %v607_v11, %v603_v19  ;;  %v3424_v11 = vld [vmem:[#allocation42_spill] sm:$0xff] }
 0x1b1   :  { %v593_v22 = vsel %vm590_vm9, %v592_v7, %v588_v0 }
 0x1b2   :  { %v611_v37 = vmul.f32 0.0, %v593_v22 }
 0x1b4   :  { %v2734_v40 = vadd.f32 %v612_v14, %v611_v37 }
 0x1b6   :  { %1882 = vtanh.f32 %v2734_v40 }
 0x1bc   :  { %v1883_v58 = vpop.eup %1882 }
 0x1bd   :  { %v615_v6 = vmul.f32 %v1883_v58, %v608_v38 }
 0x1bf   :  { %644 = vmatmul.f32.vlgmr.msrb.gmra.mxu2 %v615_v6  ;;  %v1747_v60 = vmax.f32 %v615_v6, 0.0  ;;  %664 = vmatmul.f32.vlgmr.msrb.gmra.mxu3 %v615_v6 }
 0x1c0   :  { %684 = vmatmul.f32.vlgmr.msra.gmra.mxu0 %v615_v6  ;;  %704 = vmatmul.f32.vlgmr.msrb.gmra.mxu1 %v615_v6 }
 0x1c1   :  { %1755 = vst [vmem:[#allocation10] sm:$0xff] %v1747_v60  ;;  %948 = vmatpush.msrb.mxu2 %v2209_v12  ;;  %968 = vmatpush.msrb.mxu3 %v2438_v3  ;;  %v3395_v12 = vld [vmem:[#allocation20_spill] sm:$0xff] }
 0x1c2   :  { %988 = vmatpush.msra.mxu0 %v2289_v43  ;;  %1008 = vmatpush.msrb.mxu1 %v2278_v41  ;;  %v3405_v41 = vld [vmem:[#allocation36_spill] sm:$0xff] }
 0x1c3   :  { %949 = vmatpush.msrb.mxu2 %v2225_v18  ;;  %969 = vmatpush.msrb.mxu3 %v2443_v4  ;;  %v3396_v18 = vld [vmem:[#allocation21_spill] sm:$0xff]  ;;  %v3408_v43 = vld [vmem:[#allocation16_spill] sm:$0xff] }
 0x1c4   :  { %989 = vmatpush.msra.mxu0 %v2296_v46  ;;  %1009 = vmatpush.msrb.mxu1 %v2284_v42  ;;  %v3406_v42 = vld [vmem:[#allocation30_spill] sm:$0xff]  ;;  %v3410_v46 = vld [vmem:[#allocation31_spill] sm:$0xff] }
 0x1c5   :  { %950 = vmatpush.msrb.mxu2 %v2228_v21  ;;  %970 = vmatpush.msrb.mxu3 %v2449_v15  ;;  %v3397_v21 = vld [vmem:[#allocation34_spill] sm:$0xff] }
 0x1c6   :  { %990 = vmatpush.msra.mxu0 %v3394_v2  ;;  %1010 = vmatpush.msrb.mxu1 %v2291_v44  ;;  %v3409_v44 = vld [vmem:[#allocation37_spill] sm:$0xff] }
 0x1c7   :  { %951 = vmatpush.msrb.mxu2 %v2231_v24  ;;  %971 = vmatpush.msrb.mxu3 %v2455_v47  ;;  %v3398_v24 = vld [vmem:[#allocation26_spill] sm:$0xff] }
 0x1c8   :  { %991 = vmatpush.msra.mxu0 %v2313_v52  ;;  %1011 = vmatpush.msrb.mxu1 %v2299_v48  ;;  %v3411_v48 = vld [vmem:[#allocation25_spill] sm:$0xff]  ;;  %v3413_v52 = vld [vmem:[#allocation38_spill] sm:$0xff] }
 0x1c9   :  { %952 = vmatpush.msrb.mxu2 %v2234_v25  ;;  %972 = vmatpush.msrb.mxu3 %v2468_v13  ;;  %v3399_v25 = vld [vmem:[#allocation22_spill] sm:$0xff] }
 0x1ca   :  { %992 = vmatpush.msra.mxu0 %v2324_v54  ;;  %1012 = vmatpush.msrb.mxu1 %v2308_v51  ;;  %v3412_v51 = vld [vmem:[#allocation17_spill] sm:$0xff]  ;;  %v3415_v54 = vld [vmem:[#allocation27_spill] sm:$0xff] }
 0x1cb   :  { %953 = vmatpush.msrb.mxu2 %v2237_v26  ;;  %973 = vmatpush.msrb.mxu3 %v2476_v36  ;;  %v3400_v26 = vld [vmem:[#allocation14_spill] sm:$0xff] }
 0x1cc   :  { %993 = vmatpush.msra.mxu0 %v2331_v57  ;;  %1013 = vmatpush.msrb.mxu1 %v2319_v53  ;;  %v3414_v53 = vld [vmem:[#allocation32_spill] sm:$0xff]  ;;  %v3417_v57 = vld [vmem:[#allocation39_spill] sm:$0xff] }
 0x1cd   :  { %954 = vmatpush.msrb.mxu2 %v2240_v27  ;;  %974 = vmatpush.msrb.mxu3 %v2492_v17  ;;  %v3401_v27 = vld [vmem:[#allocation35_spill] sm:$0xff] }
 0x1ce   :  { %994 = vmatpush.msra.mxu0 %v3395_v12  ;;  %1014 = vmatpush.msrb.mxu1 %v2326_v55  ;;  %v3416_v55 = vld [vmem:[#allocation18_spill] sm:$0xff] }
 0x1cf   :  { %955 = vmatpush.msrb.mxu2 %v2243_v28  ;;  %975 = vmatpush.msrb.mxu3 %v2498_v56  ;;  %v3402_v28 = vld [vmem:[#allocation28_spill] sm:$0xff] }
 0x1d0   :  { %995 = vmatpush.msra.mxu0 %v3396_v18  ;;  %1015 = vmatpush.msrb.mxu1 %v2334_v59  ;;  %v3418_v59 = vld [vmem:[#allocation33_spill] sm:$0xff] }
 0x1d1   :  { %956 = vmatpush.msrb.mxu2 %v2246_v29  ;;  %976 = vmatpush.msrb.mxu3 %v2510_v62  ;;  %v3403_v29 = vld [vmem:[#allocation23_spill] sm:$0xff] }
 0x1d2   :  { %996 = vmatpush.msra.mxu0 %v2363_v5  ;;  %1016 = vmatpush.msrb.mxu1 %v2341_v61  ;;  %v3419_v61 = vld [vmem:[#allocation29_spill] sm:$0xff] }
 0x1d3   :  { %957 = vmatpush.msrb.mxu2 %v2249_v30  ;;  %977 = vmatpush.msrb.mxu3 %v2516_v1  ;;  %v3404_v30 = vld [vmem:[#allocation15_spill] sm:$0xff] }
 0x1d4   :  { %997 = vmatpush.msra.mxu0 %v2378_v10  ;;  %1017 = vmatpush.msrb.mxu1 %v2352_v63  ;;  %v2801_v63 = vpop.f32.mrf.mxu0  ;;  %v3421_v10 = vld [vmem:[#allocation43_spill] sm:$0xff] }
 0x1d5   :  { %958 = vmatpush.msrb.mxu2 %v2252_v31  ;;  %978 = vmatpush.msrb.mxu3 %v3397_v21  ;;  %v3407_v31 = vld [vmem:[#allocation24_spill] sm:$0xff]  ;;  %3420 = vst [vmem:[#allocation19_spill] sm:$0xff] %v2801_v63 }
 0x1d6   :  { %998 = vmatpush.msra.mxu0 %v3398_v24  ;;  %1018 = vmatpush.msrb.mxu1 %v3399_v25 }
 0x1d7   :  { %959 = vmatpush.msrb.mxu2 %v3400_v26  ;;  %979 = vmatpush.msrb.mxu3 %v3401_v27 }
 0x1d8   :  { %999 = vmatpush.msra.mxu0 %v3402_v28  ;;  %1019 = vmatpush.msrb.mxu1 %v3403_v29 }
 0x1d9   :  { %960 = vmatpush.msrb.mxu2 %v3404_v30  ;;  %980 = vmatpush.msrb.mxu3 %v3405_v41 }
 0x1da   :  { %1000 = vmatpush.msra.mxu0 %v3406_v42  ;;  %1020 = vmatpush.msrb.mxu1 %v3407_v31 }
 0x1db   :  { %961 = vmatpush.msrb.mxu2 %v3408_v43  ;;  %981 = vmatpush.msrb.mxu3 %v3409_v44 }
 0x1dc   :  { %1001 = vmatpush.msra.mxu0 %v3410_v46  ;;  %1021 = vmatpush.msrb.mxu1 %v3411_v48 }
 0x1dd   :  { %962 = vmatpush.msrb.mxu2 %v3412_v51  ;;  %982 = vmatpush.msrb.mxu3 %v3413_v52 }
 0x1de   :  { %1002 = vmatpush.msra.mxu0 %v3414_v53  ;;  %1022 = vmatpush.msrb.mxu1 %v3415_v54 }
 0x1df   :  { %963 = vmatpush.msrb.mxu2 %v3416_v55  ;;  %983 = vmatpush.msrb.mxu3 %v3417_v57 }
 0x1e0   :  { %1003 = vmatpush.msra.mxu0 %v3418_v59  ;;  %1023 = vmatpush.msrb.mxu1 %v3419_v61 }
 0x23d   :  { %v685_v5 = vpop.f32.mrf.mxu0  ;;  %v705_v33 = vpop.f32.mrf.mxu1 }
 0x23e   :  { %v710_v14 = vadd.f32 %v685_v5, %v3421_v10  ;;  %v711_v58 = vadd.f32 %v705_v33, %v3424_v11  ;;  %v2838_v33 = vld [vmem:[#allocation8 + $0x1b8] sm:$0xff]  ;;  %v2855_v11 = vld [vmem:[#allocation8 + $0x170] sm:$0xff] }
 0x240   :  { %v1835_v16 = vmul.f32 -1.442695, %v710_v14 }
 0x242   :  { %1884 = vpow2.f32 %v1835_v16  ;;  %v645_v35 = vpop.f32.mrf.mxu2  ;;  %v665_v50 = vpop.f32.mrf.mxu3 }
 0x243   :  { %v708_v39 = vadd.f32 %v645_v35, %v3422_v45  ;;  %v709_v49 = vadd.f32 %v665_v50, %v3423_v9 }
 0x245   :  { %v1833_v23 = vmul.f32 -1.442695, %v708_v39  ;;  %v1834_v34 = vmul.f32 -1.442695, %v709_v49 }
 0x247   :  { %1886 = vpow2.f32 %v1833_v23 }
 0x248   :  { %v1885_v7 = vpop.eup %1884  ;;  %1888 = vpow2.f32 %v1834_v34 }
 0x249   :  { %v723_v0 = vadd.f32 1.0, %v1885_v7  ;;  %v2815_v7 = vld [vmem:[#allocation8 + $0x1f0] sm:$0xff] }
 0x24b   :  { %1890 = vrcp.f32 %v723_v0  ;;  %v765_v35 = vand.u32 2147483648, %v723_v0  ;;  %vm759_vm7 = vweird.f32 %v723_v0  ;;  %v763_v50 = vand.u32 2147483647, %v723_v0 }
 0x24d   :  { %v1887_v32 = vpop.eup %1886  ;;  %v766_v39 = vor.u32 1.1754944e-38, %v765_v35  ;;  %vm764_vm9 = vcmp.eq.f32.partialorder %v763_v50, 8.507059e+37  ;;  %v3446_v50 = vld [vmem:[#allocation44_spill] sm:$0xff] }
 0x24e   :  { %v1889_v22 = vpop.eup %1888  ;;  %v721_v37 = vadd.f32 1.0, %v1887_v32  ;;  %v2821_v32 = vld [vmem:[#allocation8 + $0x1c0] sm:$0xff] }
 0x24f   :  { %v722_v20 = vadd.f32 1.0, %v1889_v22  ;;  %v2825_v22 = vld [vmem:[#allocation8 + $0x1d0] sm:$0xff] }
 0x250   :  { %1892 = vrcp.f32 %v721_v37  ;;  %v735_v18 = vand.u32 2147483648, %v721_v37  ;;  %v733_v26 = vand.u32 2147483647, %v721_v37  ;;  %vm729_vm0 = vweird.f32 %v721_v37 }
 0x251   :  { %1894 = vrcp.f32 %v722_v20  ;;  %v1891_v8 = vpop.eup %1890  ;;  %v750_v28 = vand.u32 2147483648, %v722_v20  ;;  %v748_v30 = vand.u32 2147483647, %v722_v20  ;;  %vm744_vm2 = vweird.f32 %v722_v20 }
 0x252   :  { %v755_v2 = vmul.f32 %v1891_v8, %v723_v0  ;;  %1896 = vtanh.f32 %v711_v58  ;;  %v736_v43 = vor.u32 1.1754944e-38, %v735_v18  ;;  %vm734_vm3 = vcmp.eq.f32.partialorder %v733_v26, 8.507059e+37  ;;  %v2818_v0 = vld [vmem:[#allocation8 + $0x1f8] sm:$0xff]  ;;  %v2905_v26 = vld [vmem:[#allocation8 + $0xd0] sm:$0xff] }
 0x253   :  { %v751_v51 = vor.u32 1.1754944e-38, %v750_v28  ;;  %vm749_vm5 = vcmp.eq.f32.partialorder %v748_v30, 8.507059e+37  ;;  %vm760_vm6 = vweird.f32 %v1891_v8  ;;  %v2858_v58 = vld [vmem:[#allocation8 + $0x178] sm:$0xff]  ;;  %3425 = vst [vmem:[#allocation20_spill] sm:$0xff] %v2905_v26 }
 0x254   :  { %v756_v42 = vsub.f32 1.0, %v755_v2  ;;  %vm761_vm8 = vmor %vm759_vm7, %vm760_vm6  ;;  %v2878_v2 = vld [vmem:[#allocation8 + $0x138] sm:$0xff] }
 0x255   :  { %v2888_v18 = vld [vmem:[#allocation8 + $0x118] sm:$0xff] }
 0x256   :  { %v1893_v19 = vpop.eup %1892  ;;  %v757_v59 = vmul.f32 %v1891_v8, %v756_v42  ;;  %v2908_v28 = vld [vmem:[#allocation8 + $0xd8] sm:$0xff]  ;;  %v2925_v42 = vld [vmem:[#allocation8 + $0x90] sm:$0xff] }
 0x257   :  { %v1895_v38 = vpop.eup %1894  ;;  %v725_v6 = vmul.f32 %v1893_v19, %v721_v37  ;;  %vm730_vm14 = vweird.f32 %v1893_v19  ;;  %v2828_v37 = vld [vmem:[#allocation8 + $0x1d8] sm:$0xff]  ;;  %3426 = vst [vmem:[#allocation21_spill] sm:$0xff] %v2908_v28 }
 0x258   :  { %v740_v60 = vmul.f32 %v1895_v38, %v722_v20  ;;  %vm745_vm15 = vweird.f32 %v1895_v38  ;;  %vm731_vm1 = vmor %vm729_vm0, %vm730_vm14  ;;  %v1897_v53 = vpop.eup %1896  ;;  %v758_v16 = vadd.f32 %v1891_v8, %v757_v59  ;;  %v2835_v20 = vld [vmem:[#allocation8 + $0x1b0] sm:$0xff]  ;;  %v2918_v30 = vld [vmem:[#allocation8 + $0xb8] sm:$0xff]  ;;  %3431 = vst [vmem:[#allocation35_spill] sm:$0xff] %v2925_v42 }
 0x259   :  { %v726_v12 = vsub.f32 1.0, %v725_v6  ;;  %vm746_vm4 = vmor %vm744_vm2, %vm745_vm15  ;;  %v2868_v6 = vld [vmem:[#allocation8 + $0x158] sm:$0xff]  ;;  %3429 = vst [vmem:[#allocation22_spill] sm:$0xff] %v2918_v30 }
 0x25a   :  { %v741_v24 = vsub.f32 1.0, %v740_v60  ;;  %v762_v45 = vsel %vm761_vm8, %v1891_v8, %v758_v16  ;;  %v2845_v8 = vld [vmem:[#allocation8 + $0x190] sm:$0xff]  ;;  %v2968_v59 = vld [vmem:[#allocation8 + $0x18] sm:$0xff] }
 0x25b   :  { %v727_v25 = vmul.f32 %v1893_v19, %v726_v12  ;;  %v767_v49 = vsel %vm764_vm9, %v766_v39, %v762_v45  ;;  %v2875_v60 = vld [vmem:[#allocation8 + $0x130] sm:$0xff]  ;;  %3444 = vst [vmem:[#allocation32_spill] sm:$0xff] %v2968_v59  ;;  %v3447_v39 = vld [vmem:[#allocation62_spill] sm:$0xff] }
 0x25c   :  { %v742_v29 = vmul.f32 %v1895_v38, %v741_v24  ;;  %v2885_v12 = vld [vmem:[#allocation8 + $0x110] sm:$0xff] }
 0x25d   :  { %v728_v31 = vadd.f32 %v1893_v19, %v727_v25  ;;  %v2895_v24 = vld [vmem:[#allocation8 + $0xf0] sm:$0xff]  ;;  %v2898_v25 = vld [vmem:[#allocation8 + $0xf8] sm:$0xff] }
 0x25e   :  { %v743_v46 = vadd.f32 %v1895_v38, %v742_v29  ;;  %v2915_v29 = vld [vmem:[#allocation8 + $0xb0] sm:$0xff] }
 0x25f   :  { %v732_v48 = vsel %vm731_vm1, %v1893_v19, %v728_v31  ;;  %v2848_v19 = vld [vmem:[#allocation8 + $0x198] sm:$0xff]  ;;  %3428 = vst [vmem:[#allocation26_spill] sm:$0xff] %v2915_v29 }
 0x260   :  { %v737_v54 = vsel %vm734_vm3, %v736_v43, %v732_v48  ;;  %v747_v55 = vsel %vm746_vm4, %v1895_v38, %v743_v46  ;;  %v2865_v38 = vld [vmem:[#allocation8 + $0x150] sm:$0xff]  ;;  %v2928_v31 = vld [vmem:[#allocation8 + $0x98] sm:$0xff] }
 0x261   :  { %v771_v61 = vmul.f32 %v1897_v53, %v737_v54  ;;  %v752_v5 = vsel %vm749_vm5, %v751_v51, %v747_v55  ;;  %3432 = vst [vmem:[#allocation28_spill] sm:$0xff] %v2928_v31  ;;  %v2935_v43 = vld [vmem:[#allocation8 + $0x70] sm:$0xff]  ;;  %v2938_v46 = vld [vmem:[#allocation8 + $0x78] sm:$0xff] }
 0x262   :  { %v770_v10 = vmul.f32 %v752_v5, %v2734_v40  ;;  %v2811_v40 = vld [vmem:[#allocation8 + $0x1e0] sm:$0xff]  ;;  %3434 = vst [vmem:[#allocation15_spill] sm:$0xff] %v2935_v43  ;;  %v2945_v48 = vld [vmem:[#allocation8 + $0x50] sm:$0xff]  ;;  %v2948_v51 = vld [vmem:[#allocation8 + $0x58] sm:$0xff] }
 0x263   :  { %3435 = vst [vmem:[#allocation36_spill] sm:$0xff] %v2938_v46  ;;  %v2955_v53 = vld [vmem:[#allocation8 + $0x30] sm:$0xff]  ;;  %v2958_v54 = vld [vmem:[#allocation8 + $0x38] sm:$0xff] }
 0x264   :  { %v2808_v14 = vadd.f32 %v771_v61, %v770_v10  ;;  %3437 = vst [vmem:[#allocation24_spill] sm:$0xff] %v2945_v48  ;;  %v2965_v55 = vld [vmem:[#allocation8 + $0x10] sm:$0xff]  ;;  %v3445_v61 = vld [vmem:[#allocation46_spill] sm:$0xff] }
 0x265   :  { %3438 = vst [vmem:[#allocation16_spill] sm:$0xff] %v2948_v51 }
 0x266   :  { %1898 = vtanh.f32 %v2808_v14  ;;  %3440 = vst [vmem:[#allocation31_spill] sm:$0xff] %v2955_v53 }
 0x267   :  { %3441 = vst [vmem:[#allocation25_spill] sm:$0xff] %v2958_v54 }
 0x268   :  { %3443 = vst [vmem:[#allocation38_spill] sm:$0xff] %v2965_v55 }
 0x26c   :  { %v1899_v9 = vpop.eup %1898 }
 0x26d   :  { %v774_v23 = vmul.f32 %v1899_v9, %v767_v49 }
 0x26f   :  { %804 = vmatmul.f32.vlgmr.msra.gmra.mxu2 %v774_v23  ;;  %v1748_v34 = vmax.f32 %v774_v23, 0.0  ;;  %824 = vmatmul.f32.vlgmr.msra.gmra.mxu3 %v774_v23 }
 0x270   :  { %844 = vmatmul.f32.vlgmr.msrb.gmra.mxu0 %v774_v23  ;;  %864 = vmatmul.f32.vlgmr.msra.gmra.mxu1 %v774_v23 }
 0x271   :  { %1756 = vst [vmem:[#allocation10 + $0x8] sm:$0xff] %v1748_v34  ;;  %1108 = vmatpush.msra.mxu2 %v2811_v40  ;;  %1128 = vmatpush.msra.mxu3 %v2438_v3  ;;  %v2831_v3 = vld [vmem:[#allocation8 + $0x1a0] sm:$0xff] }
 0x272   :  { %1148 = vmatpush.msrb.mxu0 %v2815_v7  ;;  %1168 = vmatpush.msra.mxu1 %v2818_v0 }
 0x273   :  { %1109 = vmatpush.msra.mxu2 %v2821_v32  ;;  %1129 = vmatpush.msra.mxu3 %v2443_v4  ;;  %v2841_v4 = vld [vmem:[#allocation8 + $0x180] sm:$0xff] }
 0x274   :  { %1149 = vmatpush.msrb.mxu0 %v2825_v22  ;;  %1169 = vmatpush.msra.mxu1 %v2828_v37 }
 0x275   :  { %1110 = vmatpush.msra.mxu2 %v2831_v3  ;;  %1130 = vmatpush.msra.mxu3 %v2449_v15  ;;  %v2851_v15 = vld [vmem:[#allocation8 + $0x160] sm:$0xff] }
 0x276   :  { %1150 = vmatpush.msrb.mxu0 %v2835_v20  ;;  %1170 = vmatpush.msra.mxu1 %v2838_v33 }
 0x277   :  { %1111 = vmatpush.msra.mxu2 %v2841_v4  ;;  %1131 = vmatpush.msra.mxu3 %v2455_v47  ;;  %v2861_v47 = vld [vmem:[#allocation8 + $0x140] sm:$0xff] }
 0x278   :  { %1151 = vmatpush.msrb.mxu0 %v2845_v8  ;;  %1171 = vmatpush.msra.mxu1 %v2848_v19 }
 0x279   :  { %1112 = vmatpush.msra.mxu2 %v2851_v15  ;;  %1132 = vmatpush.msra.mxu3 %v2468_v13  ;;  %v2871_v13 = vld [vmem:[#allocation8 + $0x120] sm:$0xff] }
 0x27a   :  { %1152 = vmatpush.msrb.mxu0 %v2855_v11  ;;  %1172 = vmatpush.msra.mxu1 %v2858_v58 }
 0x27b   :  { %1113 = vmatpush.msra.mxu2 %v2861_v47  ;;  %1133 = vmatpush.msra.mxu3 %v2476_v36  ;;  %v2881_v36 = vld [vmem:[#allocation8 + $0x100] sm:$0xff] }
 0x27c   :  { %1153 = vmatpush.msrb.mxu0 %v2865_v38  ;;  %1173 = vmatpush.msra.mxu1 %v2868_v6 }
 0x27d   :  { %1114 = vmatpush.msra.mxu2 %v2871_v13  ;;  %1134 = vmatpush.msra.mxu3 %v2492_v17  ;;  %v2891_v17 = vld [vmem:[#allocation8 + $0xe0] sm:$0xff] }
 0x27e   :  { %1154 = vmatpush.msrb.mxu0 %v2875_v60  ;;  %1174 = vmatpush.msra.mxu1 %v2878_v2 }
 0x27f   :  { %1115 = vmatpush.msra.mxu2 %v2881_v36  ;;  %1135 = vmatpush.msra.mxu3 %v2498_v56  ;;  %v2901_v56 = vld [vmem:[#allocation8 + $0xc0] sm:$0xff] }
 0x280   :  { %1155 = vmatpush.msrb.mxu0 %v2885_v12  ;;  %1175 = vmatpush.msra.mxu1 %v2888_v18 }
 0x281   :  { %1116 = vmatpush.msra.mxu2 %v2891_v17  ;;  %1136 = vmatpush.msra.mxu3 %v2510_v62  ;;  %v2911_v62 = vld [vmem:[#allocation8 + $0xa0] sm:$0xff] }
 0x282   :  { %1156 = vmatpush.msrb.mxu0 %v2895_v24  ;;  %1176 = vmatpush.msra.mxu1 %v2898_v25  ;;  %3427 = vst [vmem:[#allocation34_spill] sm:$0xff] %v2911_v62 }
 0x283   :  { %1117 = vmatpush.msra.mxu2 %v2901_v56  ;;  %1137 = vmatpush.msra.mxu3 %v2516_v1  ;;  %v2921_v1 = vld [vmem:[#allocation8 + $0x80] sm:$0xff] }
 0x284   :  { %1157 = vmatpush.msrb.mxu0 %v2905_v26  ;;  %1177 = vmatpush.msra.mxu1 %v2908_v28  ;;  %3430 = vst [vmem:[#allocation14_spill] sm:$0xff] %v2921_v1 }
 0x285   :  { %1118 = vmatpush.msra.mxu2 %v2911_v62  ;;  %1138 = vmatpush.msra.mxu3 %v3397_v21  ;;  %v2931_v21 = vld [vmem:[#allocation8 + $0x60] sm:$0xff] }
 0x286   :  { %1158 = vmatpush.msrb.mxu0 %v2915_v29  ;;  %1178 = vmatpush.msra.mxu1 %v2918_v30  ;;  %3433 = vst [vmem:[#allocation23_spill] sm:$0xff] %v2931_v21 }
 0x287   :  { %1119 = vmatpush.msra.mxu2 %v2921_v1  ;;  %1139 = vmatpush.msra.mxu3 %v3401_v27  ;;  %v2941_v27 = vld [vmem:[#allocation8 + $0x40] sm:$0xff] }
 0x288   :  { %1159 = vmatpush.msrb.mxu0 %v2925_v42  ;;  %1179 = vmatpush.msra.mxu1 %v2928_v31  ;;  %3436 = vst [vmem:[#allocation30_spill] sm:$0xff] %v2941_v27 }
 0x289   :  { %1120 = vmatpush.msra.mxu2 %v2931_v21  ;;  %1140 = vmatpush.msra.mxu3 %v3405_v41  ;;  %v2951_v41 = vld [vmem:[#allocation8 + $0x20] sm:$0xff] }
 0x28a   :  { %1160 = vmatpush.msrb.mxu0 %v2935_v43  ;;  %1180 = vmatpush.msra.mxu1 %v2938_v46  ;;  %3439 = vst [vmem:[#allocation37_spill] sm:$0xff] %v2951_v41 }
 0x28b   :  { %1121 = vmatpush.msra.mxu2 %v2941_v27  ;;  %1141 = vmatpush.msra.mxu3 %v3409_v44  ;;  %v2961_v44 = vld [vmem:[#allocation8] sm:$0xff] }
 0x28c   :  { %1161 = vmatpush.msrb.mxu0 %v2945_v48  ;;  %1181 = vmatpush.msra.mxu1 %v2948_v51  ;;  %3442 = vst [vmem:[#allocation17_spill] sm:$0xff] %v2961_v44 }
 0x28d   :  { %1122 = vmatpush.msra.mxu2 %v2951_v41  ;;  %1142 = vmatpush.msra.mxu3 %v3413_v52 }
 0x28e   :  { %1162 = vmatpush.msrb.mxu0 %v2955_v53  ;;  %1182 = vmatpush.msra.mxu1 %v2958_v54 }
 0x28f   :  { %1123 = vmatpush.msra.mxu2 %v2961_v44  ;;  %1143 = vmatpush.msra.mxu3 %v3417_v57 }
 0x290   :  { %1163 = vmatpush.msrb.mxu0 %v2965_v55  ;;  %1183 = vmatpush.msra.mxu1 %v2968_v59 }
 0x2ed   :  { %v845_v52 = vpop.f32.mrf.mxu0 }
 0x2ee   :  { %v870_v5 = vadd.f32 %v845_v52, %v3445_v61  ;;  %v865_v52 = vpop.f32.mrf.mxu1 }
 0x2f0   :  { %v1838_v10 = vmul.f32 -1.442695, %v870_v5 }
 0x2f2   :  { %1900 = vpow2.f32 %v1838_v10  ;;  %v805_v16 = vpop.f32.mrf.mxu2  ;;  %v825_v35 = vpop.f32.mrf.mxu3  ;;  %v3448_v10 = vld [vmem:[#allocation45_spill] sm:$0xff] }
 0x2f3   :  { %v868_v45 = vadd.f32 %v805_v16, %v3446_v50  ;;  %v869_v9 = vadd.f32 %v825_v35, %v3447_v39  ;;  %v871_v16 = vadd.f32 %v865_v52, %v3448_v10 }
 0x2f5   :  { %v1836_v57 = vmul.f32 -1.442695, %v868_v45  ;;  %v1837_v49 = vmul.f32 -1.442695, %v869_v9 }
 0x2f7   :  { %1902 = vpow2.f32 %v1836_v57 }
 0x2f8   :  { %v1901_v23 = vpop.eup %1900  ;;  %1904 = vpow2.f32 %v1837_v49 }
 0x2f9   :  { %v883_v34 = vadd.f32 1.0, %v1901_v23 }
 0x2fb   :  { %1906 = vrcp.f32 %v883_v34  ;;  %vm919_vm3 = vweird.f32 %v883_v34 }
 0x2fd   :  { %v1903_v63 = vpop.eup %1902 }
 0x2fe   :  { %v1905_v55 = vpop.eup %1904  ;;  %v881_v59 = vadd.f32 1.0, %v1903_v63 }
 0x2ff   :  { %v882_v44 = vadd.f32 1.0, %v1905_v55 }
 0x300   :  { %1908 = vrcp.f32 %v881_v59  ;;  %v895_v57 = vand.u32 2147483648, %v881_v59  ;;  %v893_v63 = vand.u32 2147483647, %v881_v59  ;;  %vm889_vm12 = vweird.f32 %v881_v59 }
 0x301   :  { %1910 = vrcp.f32 %v882_v44  ;;  %v1907_v61 = vpop.eup %1906  ;;  %v910_v54 = vand.u32 2147483648, %v882_v44  ;;  %v908_v53 = vand.u32 2147483647, %v882_v44  ;;  %vm904_vm14 = vweird.f32 %v882_v44 }
 0x302   :  { %v915_v39 = vmul.f32 %v1907_v61, %v883_v34  ;;  %1912 = vtanh.f32 %v871_v16  ;;  %v896_v52 = vor.u32 1.1754944e-38, %v895_v57  ;;  %vm894_vm15 = vcmp.eq.f32.partialorder %v893_v63, 8.507059e+37  ;;  %v3028_v63 = vld [vmem:[#allocation8 + $0xe8] sm:$0xff] }
 0x303   :  { %v911_v16 = vor.u32 1.1754944e-38, %v910_v54  ;;  %vm909_vm1 = vcmp.eq.f32.partialorder %v908_v53, 8.507059e+37  ;;  %vm920_vm2 = vweird.f32 %v1907_v61  ;;  %v925_v57 = vand.u32 2147483648, %v883_v34 }
 0x304   :  { %v916_v41 = vsub.f32 1.0, %v915_v39  ;;  %vm921_vm4 = vmor %vm919_vm3, %vm920_vm2 }
 0x306   :  { %v1909_v5 = vpop.eup %1908  ;;  %v917_v27 = vmul.f32 %v1907_v61, %v916_v41 }
 0x307   :  { %v1911_v50 = vpop.eup %1910  ;;  %v885_v35 = vmul.f32 %v1909_v5, %v881_v59  ;;  %vm890_vm10 = vweird.f32 %v1909_v5 }
 0x308   :  { %v900_v45 = vmul.f32 %v1911_v50, %v882_v44  ;;  %vm905_vm11 = vweird.f32 %v1911_v50  ;;  %vm891_vm13 = vmor %vm889_vm12, %vm890_vm10  ;;  %v918_v59 = vadd.f32 %v1907_v61, %v917_v27  ;;  %v926_v44 = vor.u32 1.1754944e-38, %v925_v57  ;;  %v2998_v27 = vld [vmem:[#allocation8 + $0x188] sm:$0xff]  ;;  %v3458_v57 = vld [vmem:[#allocation16_spill] sm:$0xff] }
 0x309   :  { %v886_v9 = vsub.f32 1.0, %v885_v35  ;;  %vm906_vm0 = vmor %vm904_vm14, %vm905_vm11  ;;  %v1913_v35 = vpop.eup %1912 }
 0x30a   :  { %v901_v49 = vsub.f32 1.0, %v900_v45  ;;  %v922_v54 = vsel %vm921_vm4, %v1907_v61, %v918_v59  ;;  %v3010_v61 = vld [vmem:[#allocation8 + $0x148] sm:$0xff]  ;;  %v3457_v59 = vld [vmem:[#allocation24_spill] sm:$0xff] }
 0x30b   :  { %v887_v23 = vmul.f32 %v1909_v5, %v886_v9 }
 0x30c   :  { %v902_v55 = vmul.f32 %v1911_v50, %v901_v49 }
 0x30d   :  { %v888_v51 = vadd.f32 %v1909_v5, %v887_v23  ;;  %v3022_v23 = vld [vmem:[#allocation8 + $0x108] sm:$0xff] }
 0x30e   :  { %v903_v10 = vadd.f32 %v1911_v50, %v902_v55  ;;  %v3034_v55 = vld [vmem:[#allocation8 + $0xc8] sm:$0xff] }
 0x30f   :  { %v892_v48 = vsel %vm891_vm13, %v1909_v5, %v888_v51  ;;  %v923_v51 = vand.u32 2147483647, %v883_v34  ;;  %v3004_v34 = vld [vmem:[#allocation8 + $0x168] sm:$0xff]  ;;  %3449 = vst [vmem:[#allocation27_spill] sm:$0xff] %v3034_v55 }
 0x310   :  { %v897_v45 = vsel %vm894_vm15, %v896_v52, %v892_v48  ;;  %v907_v9 = vsel %vm906_vm0, %v1911_v50, %v903_v10  ;;  %v3016_v50 = vld [vmem:[#allocation8 + $0x128] sm:$0xff] }
 0x311   :  { %v931_v46 = vmul.f32 %v1913_v35, %v897_v45  ;;  %v912_v49 = vsel %vm909_vm1, %v911_v16, %v907_v9  ;;  %vm924_vm5 = vcmp.eq.f32.partialorder %v923_v51, 8.507059e+37  ;;  %v3040_v52 = vld [vmem:[#allocation8 + $0xa8] sm:$0xff]  ;;  %v3454_v45 = vld [vmem:[#allocation36_spill] sm:$0xff]  ;;  %v3455_v9 = vld [vmem:[#allocation30_spill] sm:$0xff] }
 0x312   :  { %v930_v43 = vmul.f32 %v912_v49, %v2808_v14  ;;  %v927_v53 = vsel %vm924_vm5, %v926_v44, %v922_v54  ;;  %v2980_v14 = vld [vmem:[#allocation8 + $0x1e8] sm:$0xff]  ;;  %3450 = vst [vmem:[#allocation18_spill] sm:$0xff] %v3040_v52  ;;  %v3459_v51 = vld [vmem:[#allocation37_spill] sm:$0xff] }
 0x313   :  { %v3046_v10 = vld [vmem:[#allocation8 + $0x88] sm:$0xff] }
 0x314   :  { %v2976_v39 = vadd.f32 %v931_v46, %v930_v43  ;;  %v2986_v43 = vld [vmem:[#allocation8 + $0x1c8] sm:$0xff]  ;;  %3451 = vst [vmem:[#allocation39_spill] sm:$0xff] %v3046_v10 }
 0x315   :  { %v2992_v46 = vld [vmem:[#allocation8 + $0x1a8] sm:$0xff] }
 0x316   :  { %1914 = vtanh.f32 %v2976_v39  ;;  %v3052_v16 = vld [vmem:[#allocation8 + $0x68] sm:$0xff] }
 0x317   :  { %3452 = vst [vmem:[#allocation33_spill] sm:$0xff] %v3052_v16  ;;  %v3453_v35 = vld [vmem:[#allocation15_spill] sm:$0xff] }
 0x318   :  { %v3058_v49 = vld [vmem:[#allocation8 + $0x48] sm:$0xff] }
 0x319   :  { %3456 = vst [vmem:[#allocation29_spill] sm:$0xff] %v3058_v49  ;;  %v3064_v54 = vld [vmem:[#allocation8 + $0x28] sm:$0xff] }
 0x31a   :  { %3460 = vst [vmem:[#allocation43_spill] sm:$0xff] %v3064_v54  ;;  %v3461_v44 = vld [vmem:[#allocation31_spill] sm:$0xff] }
 0x31c   :  { %v1915_v48 = vpop.eup %1914 }
 0x31d   :  { %v934_v41 = vmul.f32 %v1915_v48, %v927_v53  ;;  %v3462_v48 = vld [vmem:[#allocation25_spill] sm:$0xff] }
 0x31e   :  { %v3463_v53 = vld [vmem:[#allocation17_spill] sm:$0xff] }
 0x31f   :  { %964 = vmatmul.f32.vlgmr.msrb.gmra.mxu2 %v934_v41  ;;  %v1749_v5 = vmax.f32 %v934_v41, 0.0  ;;  %984 = vmatmul.f32.vlgmr.msrb.gmra.mxu3 %v934_v41 }
 0x320   :  { %1004 = vmatmul.f32.vlgmr.msra.gmra.mxu0 %v934_v41  ;;  %1024 = vmatmul.f32.vlgmr.msrb.gmra.mxu1 %v934_v41  ;;  %v3070_v41 = vld [vmem:[#allocation8 + $0x8] sm:$0xff] }
 0x321   :  { %1757 = vst [vmem:[#allocation10 + $0x10] sm:$0xff] %v1749_v5  ;;  %1268 = vmatpush.msrb.mxu2 %v2811_v40  ;;  %1288 = vmatpush.msrb.mxu3 %v2980_v14  ;;  %v3465_v5 = vld [vmem:[#allocation38_spill] sm:$0xff] }
 0x322   :  { %1308 = vmatpush.msra.mxu0 %v2815_v7  ;;  %1328 = vmatpush.msrb.mxu1 %v2818_v0  ;;  %3464 = vst [vmem:[#allocation41_spill] sm:$0xff] %v3070_v41 }
 0x323   :  { %1269 = vmatpush.msrb.mxu2 %v2821_v32  ;;  %1289 = vmatpush.msrb.mxu3 %v2986_v43 }
 0x324   :  { %1309 = vmatpush.msra.mxu0 %v2825_v22  ;;  %1329 = vmatpush.msrb.mxu1 %v2828_v37 }
 0x325   :  { %1270 = vmatpush.msrb.mxu2 %v2831_v3  ;;  %1290 = vmatpush.msrb.mxu3 %v2992_v46 }
 0x326   :  { %1310 = vmatpush.msra.mxu0 %v2835_v20  ;;  %1330 = vmatpush.msrb.mxu1 %v2838_v33 }
 0x327   :  { %1271 = vmatpush.msrb.mxu2 %v2841_v4  ;;  %1291 = vmatpush.msrb.mxu3 %v2998_v27 }
 0x328   :  { %1311 = vmatpush.msra.mxu0 %v2845_v8  ;;  %1331 = vmatpush.msrb.mxu1 %v2848_v19 }
 0x329   :  { %1272 = vmatpush.msrb.mxu2 %v2851_v15  ;;  %1292 = vmatpush.msrb.mxu3 %v3004_v34 }
 0x32a   :  { %1312 = vmatpush.msra.mxu0 %v2855_v11  ;;  %1332 = vmatpush.msrb.mxu1 %v2858_v58 }
 0x32b   :  { %1273 = vmatpush.msrb.mxu2 %v2861_v47  ;;  %1293 = vmatpush.msrb.mxu3 %v3010_v61 }
 0x32c   :  { %1313 = vmatpush.msra.mxu0 %v2865_v38  ;;  %1333 = vmatpush.msrb.mxu1 %v2868_v6 }
 0x32d   :  { %1274 = vmatpush.msrb.mxu2 %v2871_v13  ;;  %1294 = vmatpush.msrb.mxu3 %v3016_v50 }
 0x32e   :  { %1314 = vmatpush.msra.mxu0 %v2875_v60  ;;  %1334 = vmatpush.msrb.mxu1 %v2878_v2 }
 0x32f   :  { %1275 = vmatpush.msrb.mxu2 %v2881_v36  ;;  %1295 = vmatpush.msrb.mxu3 %v3022_v23 }
 0x330   :  { %1315 = vmatpush.msra.mxu0 %v2885_v12  ;;  %1335 = vmatpush.msrb.mxu1 %v2888_v18 }
 0x331   :  { %1276 = vmatpush.msrb.mxu2 %v2891_v17  ;;  %1296 = vmatpush.msrb.mxu3 %v3028_v63 }
 0x332   :  { %1316 = vmatpush.msra.mxu0 %v2895_v24  ;;  %1336 = vmatpush.msrb.mxu1 %v2898_v25 }
 0x333   :  { %1277 = vmatpush.msrb.mxu2 %v2901_v56  ;;  %1297 = vmatpush.msrb.mxu3 %v3034_v55 }
 0x334   :  { %1317 = vmatpush.msra.mxu0 %v2905_v26  ;;  %1337 = vmatpush.msrb.mxu1 %v2908_v28 }
 0x335   :  { %1278 = vmatpush.msrb.mxu2 %v2911_v62  ;;  %1298 = vmatpush.msrb.mxu3 %v3040_v52 }
 0x336   :  { %1318 = vmatpush.msra.mxu0 %v2915_v29  ;;  %1338 = vmatpush.msrb.mxu1 %v2918_v30 }
 0x337   :  { %1279 = vmatpush.msrb.mxu2 %v2921_v1  ;;  %1299 = vmatpush.msrb.mxu3 %v3046_v10 }
 0x338   :  { %1319 = vmatpush.msra.mxu0 %v2925_v42  ;;  %1339 = vmatpush.msrb.mxu1 %v2928_v31 }
 0x339   :  { %1280 = vmatpush.msrb.mxu2 %v2931_v21  ;;  %1300 = vmatpush.msrb.mxu3 %v3052_v16 }
 0x33a   :  { %1320 = vmatpush.msra.mxu0 %v3453_v35  ;;  %1340 = vmatpush.msrb.mxu1 %v3454_v45 }
 0x33b   :  { %1281 = vmatpush.msrb.mxu2 %v3455_v9  ;;  %1301 = vmatpush.msrb.mxu3 %v3058_v49 }
 0x33c   :  { %1321 = vmatpush.msra.mxu0 %v3457_v59  ;;  %1341 = vmatpush.msrb.mxu1 %v3458_v57  ;;  %v3466_v59 = vld [vmem:[#allocation32_spill] sm:$0xff] }
 0x33d   :  { %1282 = vmatpush.msrb.mxu2 %v3459_v51  ;;  %1302 = vmatpush.msrb.mxu3 %v3064_v54  ;;  %v3467_v51 = vld [vmem:[#allocation49_spill] sm:$0xff] }
 0x33e   :  { %1322 = vmatpush.msra.mxu0 %v3461_v44  ;;  %1342 = vmatpush.msrb.mxu1 %v3462_v48  ;;  %v3468_v44 = vld [vmem:[#allocation47_spill] sm:$0xff] }
 0x33f   :  { %1283 = vmatpush.msrb.mxu2 %v3463_v53  ;;  %1303 = vmatpush.msrb.mxu3 %v3070_v41  ;;  %v3469_v48 = vld [vmem:[#allocation63_spill] sm:$0xff] }
 0x340   :  { %1323 = vmatpush.msra.mxu0 %v3465_v5  ;;  %1343 = vmatpush.msrb.mxu1 %v3466_v59 }
 0x39d   :  { %v1005_v57 = vpop.f32.mrf.mxu0 }
 0x39e   :  { %v1030_v49 = vadd.f32 %v1005_v57, %v3467_v51  ;;  %v3470_v51 = vld [vmem:[#allocation48_spill] sm:$0xff] }
 0x3a0   :  { %v1841_v9 = vmul.f32 -1.442695, %v1030_v49 }
 0x3a2   :  { %1916 = vpow2.f32 %v1841_v9  ;;  %v965_v54 = vpop.f32.mrf.mxu2  ;;  %v985_v45 = vpop.f32.mrf.mxu3 }
 0x3a3   :  { %v1028_v35 = vadd.f32 %v965_v54, %v3468_v44  ;;  %v1029_v16 = vadd.f32 %v985_v45, %v3469_v48  ;;  %v1025_v9 = vpop.f32.mrf.mxu1 }
 0x3a4   :  { %v1031_v54 = vadd.f32 %v1025_v9, %v3470_v51 }
 0x3a5   :  { %v1839_v53 = vmul.f32 -1.442695, %v1028_v35  ;;  %v1840_v21 = vmul.f32 -1.442695, %v1029_v16 }
 0x3a7   :  { %1918 = vpow2.f32 %v1839_v53 }
 0x3a8   :  { %v1917_v31 = vpop.eup %1916  ;;  %1920 = vpow2.f32 %v1840_v21 }
 0x3a9   :  { %v1043_v41 = vadd.f32 1.0, %v1917_v31 }
 0x3ab   :  { %1922 = vrcp.f32 %v1043_v41  ;;  %vm1079_vm15 = vweird.f32 %v1043_v41 }
 0x3ad   :  { %v1919_v5 = vpop.eup %1918 }
 0x3ae   :  { %v1921_v42 = vpop.eup %1920  ;;  %v1041_v59 = vadd.f32 1.0, %v1919_v5 }
 0x3af   :  { %v1042_v10 = vadd.f32 1.0, %v1921_v42 }
 0x3b0   :  { %1924 = vrcp.f32 %v1041_v59  ;;  %v1055_v21 = vand.u32 2147483648, %v1041_v59  ;;  %v1053_v5 = vand.u32 2147483647, %v1041_v59  ;;  %vm1049_vm8 = vweird.f32 %v1041_v59 }
 0x3b1   :  { %1926 = vrcp.f32 %v1042_v10  ;;  %v1923_v49 = vpop.eup %1922  ;;  %v1070_v1 = vand.u32 2147483648, %v1042_v10  ;;  %v1068_v30 = vand.u32 2147483647, %v1042_v10  ;;  %vm1064_vm10 = vweird.f32 %v1042_v10 }
 0x3b2   :  { %v1075_v16 = vmul.f32 %v1923_v49, %v1043_v41  ;;  %1928 = vtanh.f32 %v1031_v54  ;;  %v1056_v9 = vor.u32 1.1754944e-38, %v1055_v21  ;;  %vm1054_vm11 = vcmp.eq.f32.partialorder %v1053_v5, 8.507059e+37  ;;  %v3479_v5 = vld [vmem:[#allocation39_spill] sm:$0xff] }
 0x3b3   :  { %v1071_v54 = vor.u32 1.1754944e-38, %v1070_v1  ;;  %vm1069_vm13 = vcmp.eq.f32.partialorder %v1068_v30, 8.507059e+37  ;;  %vm1080_vm14 = vweird.f32 %v1923_v49  ;;  %v1085_v21 = vand.u32 2147483648, %v1043_v41 }
 0x3b4   :  { %v1076_v29 = vsub.f32 1.0, %v1075_v16  ;;  %vm1081_vm0 = vmor %vm1079_vm15, %vm1080_vm14 }
 0x3b6   :  { %v1925_v57 = vpop.eup %1924  ;;  %v1077_v28 = vmul.f32 %v1923_v49, %v1076_v29 }
 0x3b7   :  { %v1927_v44 = vpop.eup %1926  ;;  %v1045_v45 = vmul.f32 %v1925_v57, %v1041_v59  ;;  %vm1050_vm6 = vweird.f32 %v1925_v57 }
 0x3b8   :  { %v1060_v35 = vmul.f32 %v1927_v44, %v1042_v10  ;;  %vm1065_vm7 = vweird.f32 %v1927_v44  ;;  %vm1051_vm9 = vmor %vm1049_vm8, %vm1050_vm6  ;;  %v1078_v59 = vadd.f32 %v1923_v49, %v1077_v28  ;;  %v1086_v10 = vor.u32 1.1754944e-38, %v1085_v21  ;;  %v3472_v28 = vld [vmem:[#allocation20_spill] sm:$0xff] }
 0x3b9   :  { %v1046_v48 = vsub.f32 1.0, %v1045_v45  ;;  %vm1066_vm12 = vmor %vm1064_vm10, %vm1065_vm7  ;;  %v1929_v45 = vpop.eup %1928  ;;  %v3489_v21 = vld [vmem:[#allocation16_spill] sm:$0xff] }
 0x3ba   :  { %v1061_v31 = vsub.f32 1.0, %v1060_v35  ;;  %v1082_v1 = vsel %vm1081_vm0, %v1923_v49, %v1078_v59  ;;  %v3476_v49 = vld [vmem:[#allocation26_spill] sm:$0xff]  ;;  %v3488_v59 = vld [vmem:[#allocation24_spill] sm:$0xff] }
 0x3bb   :  { %v1047_v53 = vmul.f32 %v1925_v57, %v1046_v48 }
 0x3bc   :  { %v1062_v42 = vmul.f32 %v1927_v44, %v1061_v31 }
 0x3bd   :  { %v1048_v52 = vadd.f32 %v1925_v57, %v1047_v53  ;;  %v3478_v53 = vld [vmem:[#allocation14_spill] sm:$0xff] }
 0x3be   :  { %v1063_v51 = vadd.f32 %v1927_v44, %v1062_v42  ;;  %v3480_v42 = vld [vmem:[#allocation35_spill] sm:$0xff] }
 0x3bf   :  { %v1052_v62 = vsel %vm1051_vm9, %v1925_v57, %v1048_v52  ;;  %v1083_v52 = vand.u32 2147483647, %v1043_v41  ;;  %v3475_v41 = vld [vmem:[#allocation18_spill] sm:$0xff] }
 0x3c0   :  { %v1057_v35 = vsel %vm1054_vm11, %v1056_v9, %v1052_v62  ;;  %v1067_v48 = vsel %vm1066_vm12, %v1927_v44, %v1063_v51  ;;  %v3477_v44 = vld [vmem:[#allocation22_spill] sm:$0xff]  ;;  %v3481_v9 = vld [vmem:[#allocation28_spill] sm:$0xff]  ;;  %v3482_v51 = vld [vmem:[#allocation23_spill] sm:$0xff] }
 0x3c1   :  { %v1091_v26 = vmul.f32 %v1929_v45, %v1057_v35  ;;  %v1072_v31 = vsel %vm1069_vm13, %v1071_v54, %v1067_v48  ;;  %vm1084_vm1 = vcmp.eq.f32.partialorder %v1083_v52, 8.507059e+37  ;;  %v3483_v54 = vld [vmem:[#allocation33_spill] sm:$0xff]  ;;  %v3484_v45 = vld [vmem:[#allocation15_spill] sm:$0xff]  ;;  %v3485_v35 = vld [vmem:[#allocation36_spill] sm:$0xff] }
 0x3c2   :  { %v1090_v55 = vmul.f32 %v1072_v31, %v2976_v39  ;;  %v1087_v30 = vsel %vm1084_vm1, %v1086_v10, %v1082_v1  ;;  %v3473_v39 = vld [vmem:[#allocation21_spill] sm:$0xff]  ;;  %v3486_v48 = vld [vmem:[#allocation30_spill] sm:$0xff]  ;;  %v3491_v1 = vld [vmem:[#allocation43_spill] sm:$0xff] }
 0x3c3   :  { %v3487_v31 = vld [vmem:[#allocation29_spill] sm:$0xff]  ;;  %v3492_v10 = vld [vmem:[#allocation31_spill] sm:$0xff] }
 0x3c4   :  { %v3080_v16 = vadd.f32 %v1091_v26, %v1090_v55  ;;  %v3471_v26 = vld [vmem:[#allocation27_spill] sm:$0xff]  ;;  %v3474_v55 = vld [vmem:[#allocation34_spill] sm:$0xff]  ;;  %v3490_v52 = vld [vmem:[#allocation37_spill] sm:$0xff] }
 0x3c6   :  { %1930 = vtanh.f32 %v3080_v16 }
 0x3cc   :  { %v1931_v62 = vpop.eup %1930 }
 0x3cd   :  { %v1094_v29 = vmul.f32 %v1931_v62, %v1087_v30  ;;  %v3493_v62 = vld [vmem:[#allocation25_spill] sm:$0xff] }
 0x3ce   :  { %v3494_v30 = vld [vmem:[#allocation17_spill] sm:$0xff] }
 0x3cf   :  { %1124 = vmatmul.f32.vlgmr.msra.gmra.mxu2 %v1094_v29  ;;  %v1750_v57 = vmax.f32 %v1094_v29, 0.0  ;;  %1144 = vmatmul.f32.vlgmr.msra.gmra.mxu3 %v1094_v29 }
 0x3d0   :  { %1164 = vmatmul.f32.vlgmr.msrb.gmra.mxu0 %v1094_v29  ;;  %1184 = vmatmul.f32.vlgmr.msra.gmra.mxu1 %v1094_v29  ;;  %v3495_v29 = vld [vmem:[#allocation41_spill] sm:$0xff] }
 0x3d1   :  { %1758 = vst [vmem:[#allocation10 + $0x18] sm:$0xff] %v1750_v57  ;;  %1428 = vmatpush.msra.mxu2 %v2811_v40  ;;  %1448 = vmatpush.msra.mxu3 %v2980_v14  ;;  %v3496_v57 = vld [vmem:[#allocation38_spill] sm:$0xff] }
 0x3d2   :  { %1468 = vmatpush.msrb.mxu0 %v2815_v7  ;;  %1488 = vmatpush.msra.mxu1 %v2818_v0 }
 0x3d3   :  { %1429 = vmatpush.msra.mxu2 %v2821_v32  ;;  %1449 = vmatpush.msra.mxu3 %v2986_v43 }
 0x3d4   :  { %1469 = vmatpush.msrb.mxu0 %v2825_v22  ;;  %1489 = vmatpush.msra.mxu1 %v2828_v37 }
 0x3d5   :  { %1430 = vmatpush.msra.mxu2 %v2831_v3  ;;  %1450 = vmatpush.msra.mxu3 %v2992_v46 }
 0x3d6   :  { %1470 = vmatpush.msrb.mxu0 %v2835_v20  ;;  %1490 = vmatpush.msra.mxu1 %v2838_v33 }
 0x3d7   :  { %1431 = vmatpush.msra.mxu2 %v2841_v4  ;;  %1451 = vmatpush.msra.mxu3 %v2998_v27 }
 0x3d8   :  { %1471 = vmatpush.msrb.mxu0 %v2845_v8  ;;  %1491 = vmatpush.msra.mxu1 %v2848_v19 }
 0x3d9   :  { %1432 = vmatpush.msra.mxu2 %v2851_v15  ;;  %1452 = vmatpush.msra.mxu3 %v3004_v34 }
 0x3da   :  { %1472 = vmatpush.msrb.mxu0 %v2855_v11  ;;  %1492 = vmatpush.msra.mxu1 %v2858_v58 }
 0x3db   :  { %1433 = vmatpush.msra.mxu2 %v2861_v47  ;;  %1453 = vmatpush.msra.mxu3 %v3010_v61 }
 0x3dc   :  { %1473 = vmatpush.msrb.mxu0 %v2865_v38  ;;  %1493 = vmatpush.msra.mxu1 %v2868_v6 }
 0x3dd   :  { %1434 = vmatpush.msra.mxu2 %v2871_v13  ;;  %1454 = vmatpush.msra.mxu3 %v3016_v50 }
 0x3de   :  { %1474 = vmatpush.msrb.mxu0 %v2875_v60  ;;  %1494 = vmatpush.msra.mxu1 %v2878_v2 }
 0x3df   :  { %1435 = vmatpush.msra.mxu2 %v2881_v36  ;;  %1455 = vmatpush.msra.mxu3 %v3022_v23 }
 0x3e0   :  { %1475 = vmatpush.msrb.mxu0 %v2885_v12  ;;  %1495 = vmatpush.msra.mxu1 %v2888_v18 }
 0x3e1   :  { %1436 = vmatpush.msra.mxu2 %v2891_v17  ;;  %1456 = vmatpush.msra.mxu3 %v3028_v63 }
 0x3e2   :  { %1476 = vmatpush.msrb.mxu0 %v2895_v24  ;;  %1496 = vmatpush.msra.mxu1 %v2898_v25 }
 0x3e3   :  { %1437 = vmatpush.msra.mxu2 %v2901_v56  ;;  %1457 = vmatpush.msra.mxu3 %v3471_v26 }
 0x3e4   :  { %1477 = vmatpush.msrb.mxu0 %v3472_v28  ;;  %1497 = vmatpush.msra.mxu1 %v3473_v39 }
 0x3e5   :  { %1438 = vmatpush.msra.mxu2 %v3474_v55  ;;  %1458 = vmatpush.msra.mxu3 %v3475_v41 }
 0x3e6   :  { %1478 = vmatpush.msrb.mxu0 %v3476_v49  ;;  %1498 = vmatpush.msra.mxu1 %v3477_v44 }
 0x3e7   :  { %1439 = vmatpush.msra.mxu2 %v3478_v53  ;;  %1459 = vmatpush.msra.mxu3 %v3479_v5 }
 0x3e8   :  { %1479 = vmatpush.msrb.mxu0 %v3480_v42  ;;  %1499 = vmatpush.msra.mxu1 %v3481_v9 }
 0x3e9   :  { %1440 = vmatpush.msra.mxu2 %v3482_v51  ;;  %1460 = vmatpush.msra.mxu3 %v3483_v54 }
 0x3ea   :  { %1480 = vmatpush.msrb.mxu0 %v3484_v45  ;;  %1500 = vmatpush.msra.mxu1 %v3485_v35 }
 0x3eb   :  { %1441 = vmatpush.msra.mxu2 %v3486_v48  ;;  %1461 = vmatpush.msra.mxu3 %v3487_v31  ;;  %v3497_v48 = vld [vmem:[#allocation32_spill] sm:$0xff] }
 0x3ec   :  { %1481 = vmatpush.msrb.mxu0 %v3488_v59  ;;  %1501 = vmatpush.msra.mxu1 %v3489_v21  ;;  %v3498_v59 = vld [vmem:[#allocation52_spill] sm:$0xff] }
 0x3ed   :  { %1442 = vmatpush.msra.mxu2 %v3490_v52  ;;  %1462 = vmatpush.msra.mxu3 %v3491_v1  ;;  %v3499_v1 = vld [vmem:[#allocation50_spill] sm:$0xff] }
 0x3ee   :  { %1482 = vmatpush.msrb.mxu0 %v3492_v10  ;;  %1502 = vmatpush.msra.mxu1 %v3493_v62  ;;  %v3500_v10 = vld [vmem:[#allocation64_spill] sm:$0xff] }
 0x3ef   :  { %1443 = vmatpush.msra.mxu2 %v3494_v30  ;;  %1463 = vmatpush.msra.mxu3 %v3495_v29 }
 0x3f0   :  { %1483 = vmatpush.msrb.mxu0 %v3496_v57  ;;  %1503 = vmatpush.msra.mxu1 %v3497_v48 }
 0x44d   :  { %v1165_v31 = vpop.f32.mrf.mxu0 }
 0x44e   :  { %v1190_v35 = vadd.f32 %v1165_v31, %v3498_v59 }
 0x450   :  { %v1844_v21 = vmul.f32 -1.442695, %v1190_v35  ;;  %v1185_v35 = vpop.f32.mrf.mxu1 }
 0x452   :  { %1932 = vpow2.f32 %v1844_v21  ;;  %v1125_v52 = vpop.f32.mrf.mxu2  ;;  %v1145_v45 = vpop.f32.mrf.mxu3  ;;  %v3501_v21 = vld [vmem:[#allocation51_spill] sm:$0xff] }
 0x453   :  { %v1188_v54 = vadd.f32 %v1125_v52, %v3499_v1  ;;  %v1189_v51 = vadd.f32 %v1145_v45, %v3500_v10  ;;  %v1191_v52 = vadd.f32 %v1185_v35, %v3501_v21 }
 0x455   :  { %v1842_v62 = vmul.f32 -1.442695, %v1188_v54  ;;  %v1843_v9 = vmul.f32 -1.442695, %v1189_v51 }
 0x457   :  { %1934 = vpow2.f32 %v1842_v62 }
 0x458   :  { %v1933_v30 = vpop.eup %1932  ;;  %1936 = vpow2.f32 %v1843_v9 }
 0x459   :  { %v1203_v29 = vadd.f32 1.0, %v1933_v30 }
 0x45b   :  { %1938 = vrcp.f32 %v1203_v29  ;;  %vm1239_vm11 = vweird.f32 %v1203_v29 }
 0x45d   :  { %v1935_v57 = vpop.eup %1934 }
 0x45e   :  { %v1937_v42 = vpop.eup %1936  ;;  %v1201_v48 = vadd.f32 1.0, %v1935_v57 }
 0x45f   :  { %v1202_v5 = vadd.f32 1.0, %v1937_v42 }
 0x460   :  { %1940 = vrcp.f32 %v1201_v48  ;;  %v1215_v9 = vand.u32 2147483648, %v1201_v48  ;;  %v1213_v57 = vand.u32 2147483647, %v1201_v48  ;;  %vm1209_vm4 = vweird.f32 %v1201_v48 }
 0x461   :  { %1942 = vrcp.f32 %v1202_v5  ;;  %v1939_v31 = vpop.eup %1938  ;;  %v1230_v53 = vand.u32 2147483648, %v1202_v5  ;;  %v1228_v44 = vand.u32 2147483647, %v1202_v5  ;;  %vm1224_vm6 = vweird.f32 %v1202_v5 }
 0x462   :  { %v1235_v51 = vmul.f32 %v1939_v31, %v1203_v29  ;;  %1944 = vtanh.f32 %v1191_v52  ;;  %v1216_v35 = vor.u32 1.1754944e-38, %v1215_v9  ;;  %vm1214_vm7 = vcmp.eq.f32.partialorder %v1213_v57, 8.507059e+37 }
 0x463   :  { %v1231_v52 = vor.u32 1.1754944e-38, %v1230_v53  ;;  %vm1229_vm9 = vcmp.eq.f32.partialorder %v1228_v44, 8.507059e+37  ;;  %vm1240_vm10 = vweird.f32 %v1939_v31  ;;  %v1245_v9 = vand.u32 2147483648, %v1203_v29 }
 0x464   :  { %v1236_v49 = vsub.f32 1.0, %v1235_v51  ;;  %vm1241_vm12 = vmor %vm1239_vm11, %vm1240_vm10 }
 0x466   :  { %v1941_v59 = vpop.eup %1940  ;;  %v1237_v39 = vmul.f32 %v1939_v31, %v1236_v49 }
 0x467   :  { %v1943_v1 = vpop.eup %1942  ;;  %v1205_v45 = vmul.f32 %v1941_v59, %v1201_v48  ;;  %vm1210_vm2 = vweird.f32 %v1941_v59 }
 0x468   :  { %v1220_v54 = vmul.f32 %v1943_v1, %v1202_v5  ;;  %vm1225_vm3 = vweird.f32 %v1943_v1  ;;  %vm1211_vm5 = vmor %vm1209_vm4, %vm1210_vm2  ;;  %v1238_v48 = vadd.f32 %v1939_v31, %v1237_v39  ;;  %v1246_v5 = vor.u32 1.1754944e-38, %v1245_v9 }
 0x469   :  { %v1206_v10 = vsub.f32 1.0, %v1205_v45  ;;  %vm1226_vm8 = vmor %vm1224_vm6, %vm1225_vm3  ;;  %v1945_v45 = vpop.eup %1944 }
 0x46a   :  { %v1221_v62 = vsub.f32 1.0, %v1220_v54  ;;  %v1242_v53 = vsel %vm1241_vm12, %v1939_v31, %v1238_v48 }
 0x46b   :  { %v1207_v30 = vmul.f32 %v1941_v59, %v1206_v10 }
 0x46c   :  { %v1222_v42 = vmul.f32 %v1943_v1, %v1221_v62 }
 0x46d   :  { %v1208_v41 = vadd.f32 %v1941_v59, %v1207_v30 }
 0x46e   :  { %v1223_v21 = vadd.f32 %v1943_v1, %v1222_v42 }
 0x46f   :  { %v1212_v55 = vsel %vm1211_vm5, %v1941_v59, %v1208_v41  ;;  %v1243_v41 = vand.u32 2147483647, %v1203_v29 }
 0x470   :  { %v1217_v54 = vsel %vm1214_vm7, %v1216_v35, %v1212_v55  ;;  %v1227_v10 = vsel %vm1226_vm8, %v1943_v1, %v1223_v21  ;;  %v3532_v21 = vld [vmem:[#allocation54_spill] sm:$0xff] }
 0x471   :  { %v1251_v28 = vmul.f32 %v1945_v45, %v1217_v54  ;;  %v1232_v62 = vsel %vm1229_vm9, %v1231_v52, %v1227_v10  ;;  %vm1244_vm13 = vcmp.eq.f32.partialorder %v1243_v41, 8.507059e+37 }
 0x472   :  { %v1250_v26 = vmul.f32 %v1232_v62, %v3080_v16  ;;  %v1247_v44 = vsel %vm1244_vm13, %v1246_v5, %v1242_v53 }
 0x474   :  { %v3152_v51 = vadd.f32 %v1251_v28, %v1250_v26 }
 0x476   :  { %1946 = vtanh.f32 %v3152_v51 }
 0x47c   :  { %v1947_v55 = vpop.eup %1946 }
 0x47d   :  { %v1254_v49 = vmul.f32 %v1947_v55, %v1247_v44 }
 0x47f   :  { %1284 = vmatmul.f32.vlgmr.msrb.gmra.mxu2 %v1254_v49  ;;  %v1751_v59 = vmax.f32 %v1254_v49, 0.0  ;;  %1304 = vmatmul.f32.vlgmr.msrb.gmra.mxu3 %v1254_v49 }
 0x480   :  { %1324 = vmatmul.f32.vlgmr.msra.gmra.mxu0 %v1254_v49  ;;  %1344 = vmatmul.f32.vlgmr.msrb.gmra.mxu1 %v1254_v49 }
 0x481   :  { %1759 = vst [vmem:[#allocation10 + $0x20] sm:$0xff] %v1751_v59  ;;  %1588 = vmatpush.msrb.mxu2 %v2811_v40  ;;  %1608 = vmatpush.msrb.mxu3 %v2980_v14  ;;  %v3502_v40 = vld [vmem:[#allocation27_spill] sm:$0xff] }
 0x482   :  { %1628 = vmatpush.msra.mxu0 %v2815_v7  ;;  %1648 = vmatpush.msrb.mxu1 %v2818_v0  ;;  %v3503_v7 = vld [vmem:[#allocation20_spill] sm:$0xff]  ;;  %v3504_v0 = vld [vmem:[#allocation21_spill] sm:$0xff]  ;;  %v3529_v14 = vld [vmem:[#allocation55_spill] sm:$0xff] }
 0x483   :  { %1589 = vmatpush.msrb.mxu2 %v2821_v32  ;;  %1609 = vmatpush.msrb.mxu3 %v2986_v43  ;;  %v3505_v32 = vld [vmem:[#allocation34_spill] sm:$0xff] }
 0x484   :  { %1629 = vmatpush.msra.mxu0 %v2825_v22  ;;  %1649 = vmatpush.msrb.mxu1 %v2828_v37  ;;  %v3506_v22 = vld [vmem:[#allocation18_spill] sm:$0xff] }
 0x485   :  { %1590 = vmatpush.msrb.mxu2 %v2831_v3  ;;  %1610 = vmatpush.msrb.mxu3 %v2992_v46  ;;  %v3507_v37 = vld [vmem:[#allocation26_spill] sm:$0xff] }
 0x486   :  { %1630 = vmatpush.msra.mxu0 %v2835_v20  ;;  %1650 = vmatpush.msrb.mxu1 %v2838_v33  ;;  %v3508_v3 = vld [vmem:[#allocation22_spill] sm:$0xff]  ;;  %v3510_v33 = vld [vmem:[#allocation39_spill] sm:$0xff] }
 0x487   :  { %1591 = vmatpush.msrb.mxu2 %v2841_v4  ;;  %1611 = vmatpush.msrb.mxu3 %v2998_v27  ;;  %v3509_v20 = vld [vmem:[#allocation14_spill] sm:$0xff]  ;;  %v3511_v4 = vld [vmem:[#allocation35_spill] sm:$0xff] }
 0x488   :  { %1631 = vmatpush.msra.mxu0 %v2845_v8  ;;  %1651 = vmatpush.msrb.mxu1 %v2848_v19  ;;  %v3512_v8 = vld [vmem:[#allocation28_spill] sm:$0xff]  ;;  %v3513_v19 = vld [vmem:[#allocation23_spill] sm:$0xff] }
 0x489   :  { %1592 = vmatpush.msrb.mxu2 %v2851_v15  ;;  %1612 = vmatpush.msrb.mxu3 %v3004_v34  ;;  %v3514_v15 = vld [vmem:[#allocation33_spill] sm:$0xff] }
 0x48a   :  { %1632 = vmatpush.msra.mxu0 %v2855_v11  ;;  %1652 = vmatpush.msrb.mxu1 %v2858_v58  ;;  %v3515_v11 = vld [vmem:[#allocation15_spill] sm:$0xff]  ;;  %v3516_v58 = vld [vmem:[#allocation36_spill] sm:$0xff] }
 0x48b   :  { %1593 = vmatpush.msrb.mxu2 %v2861_v47  ;;  %1613 = vmatpush.msrb.mxu3 %v3010_v61  ;;  %v3517_v47 = vld [vmem:[#allocation30_spill] sm:$0xff]  ;;  %v3530_v61 = vld [vmem:[#allocation53_spill] sm:$0xff] }
 0x48c   :  { %1633 = vmatpush.msra.mxu0 %v2865_v38  ;;  %1653 = vmatpush.msrb.mxu1 %v2868_v6  ;;  %v3518_v38 = vld [vmem:[#allocation29_spill] sm:$0xff]  ;;  %v3519_v6 = vld [vmem:[#allocation24_spill] sm:$0xff] }
 0x48d   :  { %1594 = vmatpush.msrb.mxu2 %v2871_v13  ;;  %1614 = vmatpush.msrb.mxu3 %v3016_v50  ;;  %v3520_v13 = vld [vmem:[#allocation16_spill] sm:$0xff] }
 0x48e   :  { %1634 = vmatpush.msra.mxu0 %v2875_v60  ;;  %1654 = vmatpush.msrb.mxu1 %v2878_v2  ;;  %v3521_v60 = vld [vmem:[#allocation37_spill] sm:$0xff]  ;;  %v3522_v2 = vld [vmem:[#allocation43_spill] sm:$0xff] }
 0x48f   :  { %1595 = vmatpush.msrb.mxu2 %v2881_v36  ;;  %1615 = vmatpush.msrb.mxu3 %v3022_v23  ;;  %v3523_v36 = vld [vmem:[#allocation31_spill] sm:$0xff]  ;;  %v3531_v23 = vld [vmem:[#allocation65_spill] sm:$0xff] }
 0x490   :  { %1635 = vmatpush.msra.mxu0 %v2885_v12  ;;  %1655 = vmatpush.msrb.mxu1 %v2888_v18  ;;  %v3524_v12 = vld [vmem:[#allocation25_spill] sm:$0xff] }
 0x491   :  { %1596 = vmatpush.msrb.mxu2 %v2891_v17  ;;  %1616 = vmatpush.msrb.mxu3 %v3028_v63  ;;  %v3525_v18 = vld [vmem:[#allocation17_spill] sm:$0xff] }
 0x492   :  { %1636 = vmatpush.msra.mxu0 %v2895_v24  ;;  %1656 = vmatpush.msrb.mxu1 %v2898_v25  ;;  %v3526_v17 = vld [vmem:[#allocation41_spill] sm:$0xff]  ;;  %v3527_v24 = vld [vmem:[#allocation38_spill] sm:$0xff]  ;;  %v3528_v25 = vld [vmem:[#allocation32_spill] sm:$0xff] }
 0x493   :  { %1597 = vmatpush.msrb.mxu2 %v2901_v56  ;;  %1617 = vmatpush.msrb.mxu3 %v3502_v40 }
 0x494   :  { %1637 = vmatpush.msra.mxu0 %v3503_v7  ;;  %1657 = vmatpush.msrb.mxu1 %v3504_v0 }
 0x495   :  { %1598 = vmatpush.msrb.mxu2 %v3505_v32  ;;  %1618 = vmatpush.msrb.mxu3 %v3506_v22 }
 0x496   :  { %1638 = vmatpush.msra.mxu0 %v3507_v37  ;;  %1658 = vmatpush.msrb.mxu1 %v3508_v3 }
 0x497   :  { %1599 = vmatpush.msrb.mxu2 %v3509_v20  ;;  %1619 = vmatpush.msrb.mxu3 %v3510_v33 }
 0x498   :  { %1639 = vmatpush.msra.mxu0 %v3511_v4  ;;  %1659 = vmatpush.msrb.mxu1 %v3512_v8 }
 0x499   :  { %1600 = vmatpush.msrb.mxu2 %v3513_v19  ;;  %1620 = vmatpush.msrb.mxu3 %v3514_v15 }
 0x49a   :  { %1640 = vmatpush.msra.mxu0 %v3515_v11  ;;  %1660 = vmatpush.msrb.mxu1 %v3516_v58 }
 0x49b   :  { %1601 = vmatpush.msrb.mxu2 %v3517_v47  ;;  %1621 = vmatpush.msrb.mxu3 %v3518_v38 }
 0x49c   :  { %1641 = vmatpush.msra.mxu0 %v3519_v6  ;;  %1661 = vmatpush.msrb.mxu1 %v3520_v13 }
 0x49d   :  { %1602 = vmatpush.msrb.mxu2 %v3521_v60  ;;  %1622 = vmatpush.msrb.mxu3 %v3522_v2 }
 0x49e   :  { %1642 = vmatpush.msra.mxu0 %v3523_v36  ;;  %1662 = vmatpush.msrb.mxu1 %v3524_v12  ;;  %v3533_v12 = vld [vmem:[#allocation58_spill] sm:$0xff] }
 0x49f   :  { %1603 = vmatpush.msrb.mxu2 %v3525_v18  ;;  %1623 = vmatpush.msrb.mxu3 %v3526_v17 }
 0x4a0   :  { %1643 = vmatpush.msra.mxu0 %v3527_v24  ;;  %1663 = vmatpush.msrb.mxu1 %v3528_v25 }
 0x4fd   :  { %v1325_v56 = vpop.f32.mrf.mxu0  ;;  %v1345_v57 = vpop.f32.mrf.mxu1 }
 0x4fe   :  { %v1350_v43 = vadd.f32 %v1325_v56, %v3529_v14  ;;  %v1351_v52 = vadd.f32 %v1345_v57, %v3532_v21  ;;  %v3534_v56 = vld [vmem:[#allocation57_spill] sm:$0xff] }
 0x500   :  { %v1847_v46 = vmul.f32 -1.442695, %v1350_v43  ;;  %v3535_v43 = vld [vmem:[#allocation66_spill] sm:$0xff] }
 0x502   :  { %1948 = vpow2.f32 %v1847_v46  ;;  %v1285_v27 = vpop.f32.mrf.mxu2  ;;  %v1305_v34 = vpop.f32.mrf.mxu3 }
 0x503   :  { %v1348_v50 = vadd.f32 %v1285_v27, %v3530_v61  ;;  %v1349_v63 = vadd.f32 %v1305_v34, %v3531_v23 }
 0x505   :  { %v1845_v16 = vmul.f32 -1.442695, %v1348_v50  ;;  %v1846_v26 = vmul.f32 -1.442695, %v1349_v63 }
 0x507   :  { %1950 = vpow2.f32 %v1845_v16 }
 0x508   :  { %v1949_v28 = vpop.eup %1948  ;;  %1952 = vpow2.f32 %v1846_v26 }
 0x509   :  { %v1363_v39 = vadd.f32 1.0, %v1949_v28 }
 0x50b   :  { %1954 = vrcp.f32 %v1363_v39  ;;  %v1405_v58 = vand.u32 2147483648, %v1363_v39  ;;  %vm1399_vm7 = vweird.f32 %v1363_v39  ;;  %v1403_v47 = vand.u32 2147483647, %v1363_v39 }
 0x50d   :  { %v1951_v29 = vpop.eup %1950  ;;  %v1406_v6 = vor.u32 1.1754944e-38, %v1405_v58  ;;  %vm1404_vm9 = vcmp.eq.f32.partialorder %v1403_v47, 8.507059e+37 }
 0x50e   :  { %v1953_v31 = vpop.eup %1952  ;;  %v1361_v1 = vadd.f32 1.0, %v1951_v29 }
 0x50f   :  { %v1362_v30 = vadd.f32 1.0, %v1953_v31  ;;  %v3536_v31 = vld [vmem:[#allocation56_spill] sm:$0xff] }
 0x510   :  { %1956 = vrcp.f32 %v1361_v1  ;;  %v1375_v9 = vand.u32 2147483648, %v1361_v1  ;;  %v1373_v5 = vand.u32 2147483647, %v1361_v1  ;;  %vm1369_vm0 = vweird.f32 %v1361_v1 }
 0x511   :  { %1958 = vrcp.f32 %v1362_v30  ;;  %v1955_v42 = vpop.eup %1954  ;;  %v1390_v55 = vand.u32 2147483648, %v1362_v30  ;;  %v1388_v49 = vand.u32 2147483647, %v1362_v30  ;;  %vm1384_vm2 = vweird.f32 %v1362_v30 }
 0x512   :  { %v1395_v62 = vmul.f32 %v1955_v42, %v1363_v39  ;;  %1960 = vtanh.f32 %v1351_v52  ;;  %v1376_v7 = vor.u32 1.1754944e-38, %v1375_v9  ;;  %vm1374_vm3 = vcmp.eq.f32.partialorder %v1373_v5, 8.507059e+37 }
 0x513   :  { %v1391_v22 = vor.u32 1.1754944e-38, %v1390_v55  ;;  %vm1389_vm5 = vcmp.eq.f32.partialorder %v1388_v49, 8.507059e+37  ;;  %vm1400_vm6 = vweird.f32 %v1955_v42 }
 0x514   :  { %v1396_v59 = vsub.f32 1.0, %v1395_v62  ;;  %vm1401_vm8 = vmor %vm1399_vm7, %vm1400_vm6 }
 0x516   :  { %v1957_v35 = vpop.eup %1956  ;;  %v1397_v33 = vmul.f32 %v1955_v42, %v1396_v59 }
 0x517   :  { %v1959_v45 = vpop.eup %1958  ;;  %v1365_v54 = vmul.f32 %v1957_v35, %v1361_v1  ;;  %vm1370_vm14 = vweird.f32 %v1957_v35 }
 0x518   :  { %v1380_v10 = vmul.f32 %v1959_v45, %v1362_v30  ;;  %vm1385_vm15 = vweird.f32 %v1959_v45  ;;  %vm1371_vm1 = vmor %vm1369_vm0, %vm1370_vm14  ;;  %v1961_v37 = vpop.eup %1960  ;;  %v1398_v11 = vadd.f32 %v1955_v42, %v1397_v33 }
 0x519   :  { %v1366_v48 = vsub.f32 1.0, %v1365_v54  ;;  %vm1386_vm4 = vmor %vm1384_vm2, %vm1385_vm15 }
 0x51a   :  { %v1381_v41 = vsub.f32 1.0, %v1380_v10  ;;  %v1402_v38 = vsel %vm1401_vm8, %v1955_v42, %v1398_v11 }
 0x51b   :  { %v1367_v53 = vmul.f32 %v1957_v35, %v1366_v48  ;;  %v1407_v60 = vsel %vm1404_vm9, %v1406_v6, %v1402_v38  ;;  %v3537_v6 = vld [vmem:[#allocation60_spill] sm:$0xff] }
 0x51c   :  { %v1382_v44 = vmul.f32 %v1959_v45, %v1381_v41 }
 0x51d   :  { %v1368_v40 = vadd.f32 %v1957_v35, %v1367_v53 }
 0x51e   :  { %v1383_v0 = vadd.f32 %v1959_v45, %v1382_v44 }
 0x51f   :  { %v1372_v32 = vsel %vm1371_vm1, %v1957_v35, %v1368_v40 }
 0x520   :  { %v1377_v3 = vsel %vm1374_vm3, %v1376_v7, %v1372_v32  ;;  %v1387_v20 = vsel %vm1386_vm4, %v1959_v45, %v1383_v0 }
 0x521   :  { %v1411_v4 = vmul.f32 %v1961_v37, %v1377_v3  ;;  %v1392_v8 = vsel %vm1389_vm5, %v1391_v22, %v1387_v20 }
 0x522   :  { %v1410_v19 = vmul.f32 %v1392_v8, %v3152_v51 }
 0x524   :  { %v3224_v15 = vadd.f32 %v1411_v4, %v1410_v19 }
 0x526   :  { %1962 = vtanh.f32 %v3224_v15 }
 0x52c   :  { %v1963_v13 = vpop.eup %1962 }
 0x52d   :  { %v1414_v2 = vmul.f32 %v1963_v13, %v1407_v60 }
 0x52f   :  { %1444 = vmatmul.f32.vlgmr.msra.gmra.mxu2 %v1414_v2  ;;  %v1752_v36 = vmax.f32 %v1414_v2, 0.0  ;;  %1464 = vmatmul.f32.vlgmr.msra.gmra.mxu3 %v1414_v2 }
 0x530   :  { %1484 = vmatmul.f32.vlgmr.msrb.gmra.mxu0 %v1414_v2  ;;  %1504 = vmatmul.f32.vlgmr.msra.gmra.mxu1 %v1414_v2 }
 0x531   :  { %1760 = vst [vmem:[#allocation10 + $0x28] sm:$0xff] %v1752_v36 }
 0x5ad   :  { %v1485_v51 = vpop.f32.mrf.mxu0  ;;  %v1505_v28 = vpop.f32.mrf.mxu1 }
 0x5ae   :  { %v1510_v18 = vadd.f32 %v1485_v51, %v3533_v12  ;;  %v1511_v1 = vadd.f32 %v1505_v28, %v3536_v31  ;;  %v3538_v51 = vld [vmem:[#allocation59_spill] sm:$0xff] }
 0x5b0   :  { %v1850_v17 = vmul.f32 -1.442695, %v1510_v18  ;;  %v3539_v18 = vld [vmem:[#allocation67_spill] sm:$0xff] }
 0x5b2   :  { %1964 = vpow2.f32 %v1850_v17  ;;  %v1445_v24 = vpop.f32.mrf.mxu2  ;;  %v1465_v25 = vpop.f32.mrf.mxu3 }
 0x5b3   :  { %v1508_v14 = vadd.f32 %v1445_v24, %v3534_v56  ;;  %v1509_v46 = vadd.f32 %v1465_v25, %v3535_v43 }
 0x5b5   :  { %v1848_v27 = vmul.f32 -1.442695, %v1508_v14  ;;  %v1849_v34 = vmul.f32 -1.442695, %v1509_v46 }
 0x5b7   :  { %1966 = vpow2.f32 %v1848_v27 }
 0x5b8   :  { %v1965_v61 = vpop.eup %1964  ;;  %1968 = vpow2.f32 %v1849_v34 }
 0x5b9   :  { %v1523_v50 = vadd.f32 1.0, %v1965_v61 }
 0x5bb   :  { %1970 = vrcp.f32 %v1523_v50  ;;  %v1565_v33 = vand.u32 2147483648, %v1523_v50  ;;  %vm1559_vm3 = vweird.f32 %v1523_v50  ;;  %v1563_v4 = vand.u32 2147483647, %v1523_v50 }
 0x5bd   :  { %v1967_v23 = vpop.eup %1966  ;;  %v1566_v19 = vor.u32 1.1754944e-38, %v1565_v33  ;;  %vm1564_vm5 = vcmp.eq.f32.partialorder %v1563_v4, 8.507059e+37 }
 0x5be   :  { %v1969_v63 = vpop.eup %1968  ;;  %v1521_v16 = vadd.f32 1.0, %v1967_v23  ;;  %v3541_v23 = vld [vmem:[#allocation19_spill] sm:$0xff] }
 0x5bf   :  { %v1522_v26 = vadd.f32 1.0, %v1969_v63 }
 0x5c0   :  { %1972 = vrcp.f32 %v1521_v16  ;;  %v1535_v52 = vand.u32 2147483648, %v1521_v16  ;;  %v1533_v10 = vand.u32 2147483647, %v1521_v16  ;;  %vm1529_vm12 = vweird.f32 %v1521_v16 }
 0x5c1   :  { %1974 = vrcp.f32 %v1522_v26  ;;  %v1971_v39 = vpop.eup %1970  ;;  %v1550_v62 = vand.u32 2147483648, %v1522_v26  ;;  %v1548_v9 = vand.u32 2147483647, %v1522_v26  ;;  %vm1544_vm14 = vweird.f32 %v1522_v26 }
 0x5c2   :  { %v1555_v35 = vmul.f32 %v1971_v39, %v1523_v50  ;;  %1976 = vtanh.f32 %v1511_v1  ;;  %v1536_v5 = vor.u32 1.1754944e-38, %v1535_v52  ;;  %vm1534_vm15 = vcmp.eq.f32.partialorder %v1533_v10, 8.507059e+37  ;;  %v3540_v50 = vld [vmem:[#allocation40_spill] sm:$0xff] }
 0x5c3   :  { %v1551_v49 = vor.u32 1.1754944e-38, %v1550_v62  ;;  %vm1549_vm1 = vcmp.eq.f32.partialorder %v1548_v9, 8.507059e+37  ;;  %vm1560_vm2 = vweird.f32 %v1971_v39  ;;  %v362_v63 = vadd.f32 %v3541_v23, %v3540_v50 }
 0x5c4   :  { %v1556_v41 = vsub.f32 1.0, %v1555_v35  ;;  %vm1561_vm4 = vmor %vm1559_vm3, %vm1560_vm2 }
 0x5c6   :  { %v1973_v29 = vpop.eup %1972  ;;  %v1557_v0 = vmul.f32 %v1971_v39, %v1556_v41 }
 0x5c7   :  { %v1975_v30 = vpop.eup %1974  ;;  %v1525_v57 = vmul.f32 %v1973_v29, %v1521_v16  ;;  %vm1530_vm10 = vweird.f32 %v1973_v29 }
 0x5c8   :  { %v1540_v42 = vmul.f32 %v1975_v30, %v1522_v26  ;;  %vm1545_vm11 = vweird.f32 %v1975_v30  ;;  %vm1531_vm13 = vmor %vm1529_vm12, %vm1530_vm10  ;;  %v1977_v59 = vpop.eup %1976  ;;  %v1558_v20 = vadd.f32 %v1971_v39, %v1557_v0 }
 0x5c9   :  { %v1526_v21 = vsub.f32 1.0, %v1525_v57  ;;  %vm1546_vm0 = vmor %vm1544_vm14, %vm1545_vm11 }
 0x5ca   :  { %v1541_v45 = vsub.f32 1.0, %v1540_v42  ;;  %v1562_v8 = vsel %vm1561_vm4, %v1971_v39, %v1558_v20 }
 0x5cb   :  { %v1527_v54 = vmul.f32 %v1973_v29, %v1526_v21  ;;  %v1567_v58 = vsel %vm1564_vm5, %v1566_v19, %v1562_v8 }
 0x5cc   :  { %v1542_v48 = vmul.f32 %v1975_v30, %v1541_v45 }
 0x5cd   :  { %v1528_v53 = vadd.f32 %v1973_v29, %v1527_v54 }
 0x5ce   :  { %v1543_v55 = vadd.f32 %v1975_v30, %v1542_v48 }
 0x5cf   :  { %v1532_v44 = vsel %vm1531_vm13, %v1973_v29, %v1528_v53 }
 0x5d0   :  { %v1537_v40 = vsel %vm1534_vm15, %v1536_v5, %v1532_v44  ;;  %v1547_v7 = vsel %vm1546_vm0, %v1975_v30, %v1543_v55 }
 0x5d1   :  { %v1571_v32 = vmul.f32 %v1977_v59, %v1537_v40  ;;  %v1552_v22 = vsel %vm1549_vm1, %v1551_v49, %v1547_v7 }
 0x5d2   :  { %v1570_v37 = vmul.f32 %v1552_v22, %v3224_v15 }
 0x5d4   :  { %v3232_v3 = vadd.f32 %v1571_v32, %v1570_v37 }
 0x5d6   :  { %1978 = vtanh.f32 %v3232_v3 }
 0x5dc   :  { %v1979_v11 = vpop.eup %1978 }
 0x5dd   :  { %v1574_v47 = vmul.f32 %v1979_v11, %v1567_v58 }
 0x5df   :  { %1604 = vmatmul.f32.vlgmr.msrb.gmra.mxu2 %v1574_v47  ;;  %v1753_v38 = vmax.f32 %v1574_v47, 0.0  ;;  %1624 = vmatmul.f32.vlgmr.msrb.gmra.mxu3 %v1574_v47 }
 0x5e0   :  { %1644 = vmatmul.f32.vlgmr.msra.gmra.mxu0 %v1574_v47  ;;  %1664 = vmatmul.f32.vlgmr.msrb.gmra.mxu1 %v1574_v47 }
 0x5e1   :  { %1761 = vst [vmem:[#allocation10 + $0x30] sm:$0xff] %v1753_v38 }
 0x65d   :  { %v1645_v15 = vpop.f32.mrf.mxu0  ;;  %v1665_v61 = vpop.f32.mrf.mxu1 }
 0x65e   :  { %v1670_v13 = vadd.f32 %v1645_v15, %v3537_v6  ;;  %v1671_v28 = vadd.f32 %v1665_v61, %v362_v63 }
 0x660   :  { %v1853_v60 = vmul.f32 -1.442695, %v1670_v13 }
 0x662   :  { %1980 = vpow2.f32 %v1853_v60  ;;  %v1605_v2 = vpop.f32.mrf.mxu2  ;;  %v1625_v36 = vpop.f32.mrf.mxu3 }
 0x663   :  { %v1668_v12 = vadd.f32 %v1605_v2, %v3538_v51  ;;  %v1669_v17 = vadd.f32 %v1625_v36, %v3539_v18 }
 0x665   :  { %v1851_v24 = vmul.f32 -1.442695, %v1668_v12  ;;  %v1852_v25 = vmul.f32 -1.442695, %v1669_v17 }
 0x667   :  { %1982 = vpow2.f32 %v1851_v24 }
 0x668   :  { %v1981_v56 = vpop.eup %1980  ;;  %1984 = vpow2.f32 %v1852_v25 }
 0x669   :  { %v1683_v14 = vadd.f32 1.0, %v1981_v56 }
 0x66b   :  { %1986 = vrcp.f32 %v1683_v14  ;;  %v1725_v22 = vand.u32 2147483648, %v1683_v14  ;;  %vm1719_vm15 = vweird.f32 %v1683_v14  ;;  %v1723_v37 = vand.u32 2147483647, %v1683_v14 }
 0x66d   :  { %v1983_v43 = vpop.eup %1982  ;;  %v1726_v33 = vor.u32 1.1754944e-38, %v1725_v22  ;;  %vm1724_vm1 = vcmp.eq.f32.partialorder %v1723_v37, 8.507059e+37 }
 0x66e   :  { %v1985_v46 = vpop.eup %1984  ;;  %v1681_v27 = vadd.f32 1.0, %v1983_v43 }
 0x66f   :  { %v1682_v34 = vadd.f32 1.0, %v1985_v46 }
 0x670   :  { %1988 = vrcp.f32 %v1681_v27  ;;  %v1695_v57 = vand.u32 2147483648, %v1681_v27  ;;  %v1693_v21 = vand.u32 2147483647, %v1681_v27  ;;  %vm1689_vm8 = vweird.f32 %v1681_v27 }
 0x671   :  { %1990 = vrcp.f32 %v1682_v34  ;;  %v1987_v16 = vpop.eup %1986  ;;  %v1710_v52 = vand.u32 2147483648, %v1682_v34  ;;  %v1708_v54 = vand.u32 2147483647, %v1682_v34  ;;  %vm1704_vm10 = vweird.f32 %v1682_v34 }
 0x672   :  { %v1715_v1 = vmul.f32 %v1987_v16, %v1683_v14  ;;  %1992 = vtanh.f32 %v1671_v28  ;;  %v1696_v48 = vor.u32 1.1754944e-38, %v1695_v57  ;;  %vm1694_vm11 = vcmp.eq.f32.partialorder %v1693_v21, 8.507059e+37 }
 0x673   :  { %v1711_v53 = vor.u32 1.1754944e-38, %v1710_v52  ;;  %vm1709_vm13 = vcmp.eq.f32.partialorder %v1708_v54, 8.507059e+37  ;;  %vm1720_vm14 = vweird.f32 %v1987_v16 }
 0x674   :  { %v1716_v10 = vsub.f32 1.0, %v1715_v1  ;;  %vm1721_vm0 = vmor %vm1719_vm15, %vm1720_vm14 }
 0x676   :  { %v1989_v26 = vpop.eup %1988  ;;  %v1717_v49 = vmul.f32 %v1987_v16, %v1716_v10 }
 0x677   :  { %v1991_v39 = vpop.eup %1990  ;;  %v1685_v29 = vmul.f32 %v1989_v26, %v1681_v27  ;;  %vm1690_vm6 = vweird.f32 %v1989_v26 }
 0x678   :  { %v1700_v31 = vmul.f32 %v1991_v39, %v1682_v34  ;;  %vm1705_vm7 = vweird.f32 %v1991_v39  ;;  %vm1691_vm9 = vmor %vm1689_vm8, %vm1690_vm6  ;;  %v1993_v5 = vpop.eup %1992  ;;  %v1718_v32 = vadd.f32 %v1987_v16, %v1717_v49 }
 0x679   :  { %v1686_v30 = vsub.f32 1.0, %v1685_v29  ;;  %vm1706_vm12 = vmor %vm1704_vm10, %vm1705_vm7 }
 0x67a   :  { %v1701_v42 = vsub.f32 1.0, %v1700_v31  ;;  %v1722_v20 = vsel %vm1721_vm0, %v1987_v16, %v1718_v32 }
 0x67b   :  { %v1687_v35 = vmul.f32 %v1989_v26, %v1686_v30  ;;  %v1727_v8 = vsel %vm1724_vm1, %v1726_v33, %v1722_v20 }
 0x67c   :  { %v1702_v45 = vmul.f32 %v1991_v39, %v1701_v42 }
 0x67d   :  { %v1688_v62 = vadd.f32 %v1989_v26, %v1687_v35 }
 0x67e   :  { %v1703_v9 = vadd.f32 %v1991_v39, %v1702_v45 }
 0x67f   :  { %v1692_v41 = vsel %vm1691_vm9, %v1989_v26, %v1688_v62 }
 0x680   :  { %v1697_v55 = vsel %vm1694_vm11, %v1696_v48, %v1692_v41  ;;  %v1707_v44 = vsel %vm1706_vm12, %v1991_v39, %v1703_v9 }
 0x681   :  { %v1731_v59 = vmul.f32 %v1993_v5, %v1697_v55  ;;  %v1712_v40 = vsel %vm1709_vm13, %v1711_v53, %v1707_v44 }
 0x682   :  { %v1730_v7 = vmul.f32 %v1712_v40, %v3232_v3 }
 0x684   :  { %v1732_v0 = vadd.f32 %v1731_v59, %v1730_v7 }
 0x686   :  { %1994 = vtanh.f32 %v1732_v0 }
 0x68c   :  { %v1995_v4 = vpop.eup %1994 }
 0x68d   :  { %v1734_v3 = vmul.f32 %v1995_v4, %v1727_v8 }
 0x68f   :  { %v1754_v19 = vmax.f32 %v1734_v3, 0.0 }
 0x691   :  { %1762 = vst [vmem:[#allocation10 + $0x38] sm:$0xff] %v1754_v19 }
 0x692   :  { %1775 = dma.vmem_to_hbm [thread:$0]  %s1768_s26, 1024, %s1770_s29, [#allocation7], %s2144_s30, %s2144_s30, %s2145_s7  }
 0x693   :  { %2136 = dma.done.wait [#allocation7], 1024  }
 0x694   :  { %2137 = vsyncadd [#allocation7], 4294966272 }
 0x695   :  { %1780 = vsyncpa [#allocation6], 1 }
 0x696   :  { %1781 = vsyncpa [#allocation9], 1 }
 0x697   :  { %1782 = vsyncpa [#allocation7], 1 }

</bundles_post_ra>
